<compile_context>
chip_gen: v6e
topology: v6e:2x2x1
jax: 0.10.0
libtpu: 0.0.40
codegen_flags: <defaults>
</compile_context>

<pallas_src>
import functools

import numpy as np

import jax
import jax.numpy as jnp
from jax.experimental import pallas as pl
from jax.experimental.pallas import tpu as pltpu


B_TILE = 8   # images per grid step; must be a multiple of 8 (one sublane tile)


# ---------------------------------------------------------------------------
# Fused Pallas kernel (one grid step == B_TILE images)
# ---------------------------------------------------------------------------
def _cnn_fashion_kernel(x_ref, m1_ref, b1_ref, m2_ref, b2_ref,
                        wf_ref, bf_ref, wo_ref, bo_ref, out_ref):
    B = B_TILE
    bf16 = jnp.bfloat16
    dot = functools.partial(jnp.dot, preferred_element_type=jnp.float32)

    x = x_ref[0]                                               # (28B, 28) f32, row = h*B + b

    # conv1 (1->16, 3x3, valid): fuse the 3 row-shifted slabs along lanes -> one matmul.
    l1 = jnp.concatenate([x[0:26 * B], x[B:27 * B], x[2 * B:28 * B]], axis=-1)   # (26B, 84)
    a1 = jnp.maximum(dot(l1.astype(bf16), m1_ref[...]) + b1_ref[...], 0.0)       # (26B, 416)

    # maxpool 2x2 on the VPU, no compaction: valid data lives at even row-blocks
    # (h = 2p) and even 16-lane column blocks (w = 2q); the rest is never read.
    rm1 = jnp.maximum(a1[0:25 * B], a1[B:26 * B])              # (25B, 416)
    cm1 = jnp.maximum(rm1[:, 0:400], rm1[:, 16:416])           # (25B, 400)

    # conv2 (16->32, 3x3, valid): 3 banded matmuls over 8-aligned row slices;
    # pool1's even-column selection is folded into m2 (zero rows at odd columns).
    # Output rows at odd g-blocks are garbage and are skipped by pool2/fc1.
    acc2 = dot(cm1[0:21 * B].astype(bf16), m2_ref[0])
    acc2 = acc2 + dot(cm1[2 * B:23 * B].astype(bf16), m2_ref[1])
    acc2 = acc2 + dot(cm1[4 * B:25 * B].astype(bf16), m2_ref[2])
    a2 = jnp.maximum(acc2 + b2_ref[...], 0.0)                  # (21B, 352)

    # maxpool 2x2 (valid pooled row p2 lives at g = 4*p2, valid column at w = 2*q2).
    rm2 = jnp.maximum(a2[0:19 * B], a2[2 * B:21 * B])          # (19B, 352)
    cm2 = jnp.maximum(rm2[:, 0:320], rm2[:, 32:352])           # (19B, 320)

    # fc1 (800 -> 64): gather the 5 valid pooled row-blocks, lane-concat, one matmul
    # with M = B_TILE.  pool2's even-column selection + PyTorch x.view(-1, 800)
    # ordering are folded into wf on the host.
    f = jnp.concatenate([cm2[4 * p * B:(4 * p + 1) * B] for p in range(5)],
                        axis=-1)                               # (B, 1600)
    h = jnp.maximum(dot(f.astype(bf16), wf_ref[...]) + bf_ref[...], 0.0)          # (B, 64)

    # classifier head (64 -> 128 padded lanes) + log_softmax, all in f32 after the dot.
    # Padded lanes carry bias = -1e30 so they contribute 0 to the normalisation.
    z = dot(h.astype(bf16), wo_ref[...]) + bo_ref[...]         # (B, 128)
    m = jnp.max(z, axis=-1, keepdims=True)
    lse = jnp.log(jnp.sum(jnp.exp(z - m), axis=-1, keepdims=True))
    out_ref[0] = z - m - lse


# ---------------------------------------------------------------------------
# Wrapper
# ---------------------------------------------------------------------------
def cnn_fashion_forward(x_nchw, kparams, num_classes):
    B = x_nchw.shape[0]
    T = (B + B_TILE - 1) // B_TILE
    Bp = T * B_TILE

    x = x_nchw.astype(jnp.float32).reshape(B, 28, 28)          # C_in == 1
    if Bp != B:
        x = jnp.pad(x, ((0, Bp - B), (0, 0), (0, 0)))
    # per-tile slab layout: row = h * B_TILE + b  (h-major, image-minor)
    x = x.reshape(T, B_TILE, 28, 28).transpose(0, 2, 1, 3).reshape(T, 28 * B_TILE, 28)

    out = pl.pallas_call(
        _cnn_fashion_kernel,
        out_shape=jax.ShapeDtypeStruct((T, B_TILE, 128), jnp.float32),
        grid=(T,),
        in_specs=[
            pl.BlockSpec((1, 28 * B_TILE, 28), lambda t: (t, 0, 0)),  # image slab
            pl.BlockSpec((84, 416), lambda t: (0, 0)),                # conv1 fused banded W (bf16)
            pl.BlockSpec((1, 416), lambda t: (0, 0)),                 # conv1 bias (f32, tiled)
            pl.BlockSpec((3, 400, 352), lambda t: (0, 0, 0)),         # conv2 banded W (bf16, pool folded)
            pl.BlockSpec((1, 352), lambda t: (0, 0)),                 # conv2 bias (f32, tiled)
            pl.BlockSpec((1600, 64), lambda t: (0, 0)),               # fc1 W (bf16, permuted+pool folded)
            pl.BlockSpec((1, 64), lambda t: (0, 0)),                  # fc1 bias (f32)
            pl.BlockSpec((64, 128), lambda t: (0, 0)),                # head W (bf16, lane-padded)
            pl.BlockSpec((1, 128), lambda t: (0, 0)),                 # head bias (f32, -1e30 pads)
        ],
        out_specs=pl.BlockSpec((1, B_TILE, 128), lambda t: (t, 0, 0)),
        compiler_params=pltpu.CompilerParams(
            dimension_semantics=("parallel",)),
    )(x, kparams["m1"], kparams["b1"], kparams["m2"], kparams["b2"],
      kparams["wf"], kparams["bf"], kparams["wo"], kparams["bo"])

    return out.reshape(Bp, 128)[:B, :num_classes]


# ---------------------------------------------------------------------------
# Host-side preparation of kernel operands from PyTorch-layout parameters
# ---------------------------------------------------------------------------
def prepare_kernel_params(tp, num_classes):
    assert num_classes <= 128
    w1 = np.asarray(tp["conv1_w"], np.float32)   # (16, 1, 3, 3)  (O, I, kH, kW)
    b1 = np.asarray(tp["conv1_b"], np.float32)
    w2 = np.asarray(tp["conv2_w"], np.float32)   # (32, 16, 3, 3)
    b2 = np.asarray(tp["conv2_b"], np.float32)
    fw = np.asarray(tp["fc1_w"], np.float32)     # (64, 800)
    fb = np.asarray(tp["fc1_b"], np.float32)
    ow = np.asarray(tp["out_w"], np.float32)     # (nc, 64)
    ob = np.asarray(tp["out_b"], np.float32)

    C1, C2 = 16, 32
    W1_OUT, W2_OUT = 26, 11
    L1 = W1_OUT * C1          # 416
    LP1 = L1 - C1             # 400 (column-pooled conv1 lane width)
    L2 = W2_OUT * C2          # 352
    LP2 = L2 - C2             # 320 (column-pooled conv2 lane width)

    # conv1 fused banded weight: M1[ky*28 + wi, wo*16 + co] = w1[co, 0, ky, wi - wo]
    m1 = np.zeros((3 * 28, L1), np.float32)
    for ky in range(3):
        for kx in range(3):
            col = w1[:, 0, ky, kx]                               # (16,)
            for wo in range(W1_OUT):
                m1[ky * 28 + wo + kx, wo * C1:(wo + 1) * C1] = col
    b1t = np.tile(b1, W1_OUT).reshape(1, L1)

    # conv2 banded weights with pool1's even-column selection folded in:
    # M2[ky, 2*(wo+kx)*16 + ci, wo*32 + co] = w2[co, ci, ky, kx]
    m2 = np.zeros((3, LP1, L2), np.float32)
    for ky in range(3):
        for kx in range(3):
            blk = w2[:, :, ky, kx].T                             # (ci, co) = (16, 32)
            for wo in range(W2_OUT):
                wi = 2 * (wo + kx)                               # even cm1 column
                m2[ky, wi * C1:(wi + 1) * C1, wo * C2:(wo + 1) * C2] = blk
    b2t = np.tile(b2, W2_OUT).reshape(1, L2)

    # fc1 weights: pool2 even-column selection folded in, PyTorch x.view(-1, 800)
    # flatten order preserved (flat index = c*25 + p*5 + q).
    wf = np.zeros((5 * LP2, 64), np.float32)
    for p in range(5):
        for q in range(5):
            for c in range(C2):
                wf[p * LP2 + (2 * q) * C2 + c, :] = fw[:, c * 25 + p * 5 + q]
    bft = fb.reshape(1, 64)

    # classifier head, lane-padded to 128 (pad bias = -1e30, kept f32 -> exact log_softmax)
    wo_p = np.zeros((64, 128), np.float32)
    wo_p[:, :num_classes] = ow.T
    bo_p = np.full((1, 128), -1e30, np.float32)
    bo_p[0, :num_classes] = ob

    return {
        "m1": jnp.asarray(m1, jnp.bfloat16),
        "b1": jnp.asarray(b1t),
        "m2": jnp.asarray(m2, jnp.bfloat16),
        "b2": jnp.asarray(b2t),
        "wf": jnp.asarray(wf, jnp.bfloat16),
        "bf": jnp.asarray(bft),
        "wo": jnp.asarray(wo_p, jnp.bfloat16),
        "bo": jnp.asarray(bo_p),
    }


# ---------------------------------------------------------------------------
# Deterministic parameter init (PyTorch layouts) + pure-JAX reference forward
# ---------------------------------------------------------------------------
def init_params(key, num_classes):
    ks = jax.random.split(key, 8)
    init = lambda k, shape: 0.05 * jax.random.normal(k, shape, dtype=jnp.float32)
    return {
        "conv1_w": init(ks[0], (16, 1, 3, 3)),
        "conv1_b": init(ks[1], (16,)),
        "conv2_w": init(ks[2], (32, 16, 3, 3)),
        "conv2_b": init(ks[3], (32,)),
        "fc1_w":   init(ks[4], (64, 32 * 5 * 5)),
        "fc1_b":   init(ks[5], (64,)),
        "out_w":   init(ks[6], (num_classes, 64)),
        "out_b":   init(ks[7], (num_classes,)),
    }


def _maxpool2x2_ref(y):
    B, C, H, W = y.shape
    Ho, Wo = H // 2, W // 2
    y = y[:, :, : Ho * 2, : Wo * 2].reshape(B, C, Ho, 2, Wo, 2)
    return y.max(axis=(3, 5))


def reference_forward(x_nchw, tp):
    x = x_nchw.astype(jnp.float32)
    y = jax.lax.conv_general_dilated(
        x, tp["conv1_w"], (1, 1), "VALID",
        dimension_numbers=("NCHW", "OIHW", "NCHW"))
    y = jax.nn.relu(y + tp["conv1_b"][None, :, None, None])
    y = _maxpool2x2_ref(y)
    y = jax.lax.conv_general_dilated(
        y, tp["conv2_w"], (1, 1), "VALID",
        dimension_numbers=("NCHW", "OIHW", "NCHW"))
    y = jax.nn.relu(y + tp["conv2_b"][None, :, None, None])
    y = _maxpool2x2_ref(y)
    y = y.reshape(y.shape[0], -1)                      # NCHW flatten, like x.view
    y = jax.nn.relu(y @ tp["fc1_w"].T + tp["fc1_b"])
    z = y @ tp["out_w"].T + tp["out_b"]
    return jax.nn.log_softmax(z, axis=-1)


if __name__ == "__main__":
    num_classes = 10
    key = jax.random.PRNGKey(0)
    pkey, xkey = jax.random.split(key)

    torch_params = init_params(pkey, num_classes)
    kparams = prepare_kernel_params(torch_params, num_classes)

    # 28x28 single-channel input (implied by fc1's 32*5*5 fan-in).  batch=10 is not a
    # multiple of B_TILE -> exercises padding, and gives a 2-step grid (both v7x cores).
    batch = 10
    x = jax.random.normal(xkey, (batch, 1, 28, 28), dtype=jnp.float32)

    fwd = jax.jit(functools.partial(
        cnn_fashion_forward, kparams=kparams, num_classes=num_classes))
    out = jax.block_until_ready(fwd(x))
    ref = jax.block_until_ready(reference_forward(x, torch_params))

    assert out.shape == (batch, num_classes)
    assert out.dtype == jnp.float32
    # rows of exp(log_softmax) must sum to ~1
    assert bool(jnp.all(jnp.abs(jnp.sum(jnp.exp(out), axis=-1) - 1.0) < 1e-3))
    # match the pure-JAX reference forward (loose tol: bf16 MXU operands)
    assert bool(jnp.allclose(out, ref, atol=5e-2, rtol=5e-2))
    print("KERNEL_OK")
</pallas_src>

<mosaic_0001>
module attributes {stable_mosaic.version = 11 : i64} {
  func.func @_cnn_fashion_kernel(%arg0: i32, %arg1: memref<1x224x28xf32, #tpu.memory_space<vmem>>, %arg2: memref<84x416xbf16, #tpu.memory_space<vmem>>, %arg3: memref<1x416xf32, #tpu.memory_space<vmem>>, %arg4: memref<3x400x352xbf16, #tpu.memory_space<vmem>>, %arg5: memref<1x352xf32, #tpu.memory_space<vmem>>, %arg6: memref<1600x64xbf16, #tpu.memory_space<vmem>>, %arg7: memref<1x64xf32, #tpu.memory_space<vmem>>, %arg8: memref<64x128xbf16, #tpu.memory_space<vmem>>, %arg9: memref<1x128xf32, #tpu.memory_space<vmem>>, %arg10: memref<1x8x128xf32, #tpu.memory_space<vmem>>) attributes {dimension_semantics = [#tpu.dimension_semantics<parallel>], iteration_bounds = array<i64: 2>, scalar_prefetch = 0 : i64, scratch_operands = 0 : i64, tpu.core_type = #tpu.core_type<tc>, window_params = [{transform_indices = @transform_0, window_bounds = array<i64: 1, 224, 28>}, {pipeline_mode = #tpu.pipeline_mode<synchronous>, transform_indices = @transform_1, window_bounds = array<i64: 84, 416>}, {pipeline_mode = #tpu.pipeline_mode<synchronous>, transform_indices = @transform_2, window_bounds = array<i64: 1, 416>}, {pipeline_mode = #tpu.pipeline_mode<synchronous>, transform_indices = @transform_3, window_bounds = array<i64: 3, 400, 352>}, {pipeline_mode = #tpu.pipeline_mode<synchronous>, transform_indices = @transform_4, window_bounds = array<i64: 1, 352>}, {pipeline_mode = #tpu.pipeline_mode<synchronous>, transform_indices = @transform_5, window_bounds = array<i64: 1600, 64>}, {pipeline_mode = #tpu.pipeline_mode<synchronous>, transform_indices = @transform_6, window_bounds = array<i64: 1, 64>}, {pipeline_mode = #tpu.pipeline_mode<synchronous>, transform_indices = @transform_7, window_bounds = array<i64: 64, 128>}, {pipeline_mode = #tpu.pipeline_mode<synchronous>, transform_indices = @transform_8, window_bounds = array<i64: 1, 128>}, {transform_indices = @transform_9, window_bounds = array<i64: 1, 8, 128>}]} {
    %c0 = arith.constant 0 : index
    %c0_0 = arith.constant 0 : index
    %c0_1 = arith.constant 0 : index
    %0 = vector.load %arg1[%c0, %c0_0, %c0_1] : memref<1x224x28xf32, #tpu.memory_space<vmem>>, vector<1x224x28xf32>
    %1 = vector.shape_cast %0 : vector<1x224x28xf32> to vector<224x28xf32>
    %2 = vector.extract_strided_slice %1 {offsets = [0, 0], sizes = [208, 28], strides = [1, 1]} : vector<224x28xf32> to vector<208x28xf32>
    %3 = vector.extract_strided_slice %1 {offsets = [8, 0], sizes = [208, 28], strides = [1, 1]} : vector<224x28xf32> to vector<208x28xf32>
    %4 = vector.extract_strided_slice %1 {offsets = [16, 0], sizes = [208, 28], strides = [1, 1]} : vector<224x28xf32> to vector<208x28xf32>
    %5 = tpu.concatenate %2, %3, %4 in 1 : vector<208x28xf32>, vector<208x28xf32>, vector<208x28xf32> -> vector<208x84xf32>
    %6 = arith.truncf %5 : vector<208x84xf32> to vector<208x84xbf16>
    %c0_2 = arith.constant 0 : index
    %c0_3 = arith.constant 0 : index
    %7 = vector.load %arg2[%c0_2, %c0_3] : memref<84x416xbf16, #tpu.memory_space<vmem>>, vector<84x416xbf16>
    %cst = arith.constant dense<0.000000e+00> : vector<208x416xf32>
    %8 = tpu.matmul %6, %7, %cst {dimension_numbers = #tpu.dot_dimension_numbers<[1], [0], [0], [1], [0, 0, 1, 1], [], []>} : vector<208x84xbf16>, vector<84x416xbf16>, vector<208x416xf32> -> vector<208x416xf32>
    %c0_4 = arith.constant 0 : index
    %c0_5 = arith.constant 0 : index
    %9 = vector.load %arg3[%c0_4, %c0_5] : memref<1x416xf32, #tpu.memory_space<vmem>>, vector<1x416xf32>
    %10 = vector.broadcast %9 : vector<1x416xf32> to vector<208x416xf32>
    %11 = arith.addf %8, %10 : vector<208x416xf32>
    %cst_6 = arith.constant 0.000000e+00 : f32
    %12 = vector.broadcast %cst_6 : f32 to vector<208x416xf32>
    %13 = arith.maximumf %11, %12 : vector<208x416xf32>
    %14 = vector.extract_strided_slice %13 {offsets = [0, 0], sizes = [200, 416], strides = [1, 1]} : vector<208x416xf32> to vector<200x416xf32>
    %15 = vector.extract_strided_slice %13 {offsets = [8, 0], sizes = [200, 416], strides = [1, 1]} : vector<208x416xf32> to vector<200x416xf32>
    %16 = arith.maximumf %14, %15 : vector<200x416xf32>
    %17 = vector.extract_strided_slice %16 {offsets = [0, 0], sizes = [200, 400], strides = [1, 1]} : vector<200x416xf32> to vector<200x400xf32>
    %18 = vector.extract_strided_slice %16 {offsets = [0, 16], sizes = [200, 400], strides = [1, 1]} : vector<200x416xf32> to vector<200x400xf32>
    %19 = arith.maximumf %17, %18 : vector<200x400xf32>
    %20 = vector.extract_strided_slice %19 {offsets = [0, 0], sizes = [168, 400], strides = [1, 1]} : vector<200x400xf32> to vector<168x400xf32>
    %21 = arith.truncf %20 : vector<168x400xf32> to vector<168x400xbf16>
    %c0_7 = arith.constant 0 : index
    %c0_8 = arith.constant 0 : index
    %c0_9 = arith.constant 0 : index
    %22 = vector.load %arg4[%c0_7, %c0_8, %c0_9] : memref<3x400x352xbf16, #tpu.memory_space<vmem>>, vector<1x400x352xbf16>
    %23 = vector.shape_cast %22 : vector<1x400x352xbf16> to vector<400x352xbf16>
    %cst_10 = arith.constant dense<0.000000e+00> : vector<168x352xf32>
    %24 = tpu.matmul %21, %23, %cst_10 {dimension_numbers = #tpu.dot_dimension_numbers<[1], [0], [0], [1], [0, 0, 1, 1], [], []>} : vector<168x400xbf16>, vector<400x352xbf16>, vector<168x352xf32> -> vector<168x352xf32>
    %25 = vector.extract_strided_slice %19 {offsets = [16, 0], sizes = [168, 400], strides = [1, 1]} : vector<200x400xf32> to vector<168x400xf32>
    %26 = arith.truncf %25 : vector<168x400xf32> to vector<168x400xbf16>
    %c1 = arith.constant 1 : index
    %c0_11 = arith.constant 0 : index
    %c0_12 = arith.constant 0 : index
    %27 = vector.load %arg4[%c1, %c0_11, %c0_12] : memref<3x400x352xbf16, #tpu.memory_space<vmem>>, vector<1x400x352xbf16>
    %28 = vector.shape_cast %27 : vector<1x400x352xbf16> to vector<400x352xbf16>
    %cst_13 = arith.constant dense<0.000000e+00> : vector<168x352xf32>
    %29 = tpu.matmul %26, %28, %cst_13 {dimension_numbers = #tpu.dot_dimension_numbers<[1], [0], [0], [1], [0, 0, 1, 1], [], []>} : vector<168x400xbf16>, vector<400x352xbf16>, vector<168x352xf32> -> vector<168x352xf32>
    %30 = arith.addf %24, %29 : vector<168x352xf32>
    %31 = vector.extract_strided_slice %19 {offsets = [32, 0], sizes = [168, 400], strides = [1, 1]} : vector<200x400xf32> to vector<168x400xf32>
    %32 = arith.truncf %31 : vector<168x400xf32> to vector<168x400xbf16>
    %c2 = arith.constant 2 : index
    %c0_14 = arith.constant 0 : index
    %c0_15 = arith.constant 0 : index
    %33 = vector.load %arg4[%c2, %c0_14, %c0_15] : memref<3x400x352xbf16, #tpu.memory_space<vmem>>, vector<1x400x352xbf16>
    %34 = vector.shape_cast %33 : vector<1x400x352xbf16> to vector<400x352xbf16>
    %cst_16 = arith.constant dense<0.000000e+00> : vector<168x352xf32>
    %35 = tpu.matmul %32, %34, %cst_16 {dimension_numbers = #tpu.dot_dimension_numbers<[1], [0], [0], [1], [0, 0, 1, 1], [], []>} : vector<168x400xbf16>, vector<400x352xbf16>, vector<168x352xf32> -> vector<168x352xf32>
    %36 = arith.addf %30, %35 : vector<168x352xf32>
    %c0_17 = arith.constant 0 : index
    %c0_18 = arith.constant 0 : index
    %37 = vector.load %arg5[%c0_17, %c0_18] : memref<1x352xf32, #tpu.memory_space<vmem>>, vector<1x352xf32>
    %38 = vector.broadcast %37 : vector<1x352xf32> to vector<168x352xf32>
    %39 = arith.addf %36, %38 : vector<168x352xf32>
    %cst_19 = arith.constant 0.000000e+00 : f32
    %40 = vector.broadcast %cst_19 : f32 to vector<168x352xf32>
    %41 = arith.maximumf %39, %40 : vector<168x352xf32>
    %42 = vector.extract_strided_slice %41 {offsets = [0, 0], sizes = [152, 352], strides = [1, 1]} : vector<168x352xf32> to vector<152x352xf32>
    %43 = vector.extract_strided_slice %41 {offsets = [16, 0], sizes = [152, 352], strides = [1, 1]} : vector<168x352xf32> to vector<152x352xf32>
    %44 = arith.maximumf %42, %43 : vector<152x352xf32>
    %45 = vector.extract_strided_slice %44 {offsets = [0, 0], sizes = [152, 320], strides = [1, 1]} : vector<152x352xf32> to vector<152x320xf32>
    %46 = vector.extract_strided_slice %44 {offsets = [0, 32], sizes = [152, 320], strides = [1, 1]} : vector<152x352xf32> to vector<152x320xf32>
    %47 = arith.maximumf %45, %46 : vector<152x320xf32>
    %48 = vector.extract_strided_slice %47 {offsets = [0, 0], sizes = [8, 320], strides = [1, 1]} : vector<152x320xf32> to vector<8x320xf32>
    %49 = vector.extract_strided_slice %47 {offsets = [32, 0], sizes = [8, 320], strides = [1, 1]} : vector<152x320xf32> to vector<8x320xf32>
    %50 = vector.extract_strided_slice %47 {offsets = [64, 0], sizes = [8, 320], strides = [1, 1]} : vector<152x320xf32> to vector<8x320xf32>
    %51 = vector.extract_strided_slice %47 {offsets = [96, 0], sizes = [8, 320], strides = [1, 1]} : vector<152x320xf32> to vector<8x320xf32>
    %52 = vector.extract_strided_slice %47 {offsets = [128, 0], sizes = [8, 320], strides = [1, 1]} : vector<152x320xf32> to vector<8x320xf32>
    %53 = tpu.concatenate %48, %49, %50, %51, %52 in 1 : vector<8x320xf32>, vector<8x320xf32>, vector<8x320xf32>, vector<8x320xf32>, vector<8x320xf32> -> vector<8x1600xf32>
    %54 = arith.truncf %53 : vector<8x1600xf32> to vector<8x1600xbf16>
    %c0_20 = arith.constant 0 : index
    %c0_21 = arith.constant 0 : index
    %55 = vector.load %arg6[%c0_20, %c0_21] : memref<1600x64xbf16, #tpu.memory_space<vmem>>, vector<1600x64xbf16>
    %cst_22 = arith.constant dense<0.000000e+00> : vector<8x64xf32>
    %56 = tpu.matmul %54, %55, %cst_22 {dimension_numbers = #tpu.dot_dimension_numbers<[1], [0], [0], [1], [0, 0, 1, 1], [], []>} : vector<8x1600xbf16>, vector<1600x64xbf16>, vector<8x64xf32> -> vector<8x64xf32>
    %c0_23 = arith.constant 0 : index
    %c0_24 = arith.constant 0 : index
    %57 = vector.load %arg7[%c0_23, %c0_24] : memref<1x64xf32, #tpu.memory_space<vmem>>, vector<1x64xf32>
    %58 = vector.broadcast %57 : vector<1x64xf32> to vector<8x64xf32>
    %59 = arith.addf %56, %58 : vector<8x64xf32>
    %cst_25 = arith.constant 0.000000e+00 : f32
    %60 = vector.broadcast %cst_25 : f32 to vector<8x64xf32>
    %61 = arith.maximumf %59, %60 : vector<8x64xf32>
    %62 = arith.truncf %61 : vector<8x64xf32> to vector<8x64xbf16>
    %c0_26 = arith.constant 0 : index
    %c0_27 = arith.constant 0 : index
    %63 = vector.load %arg8[%c0_26, %c0_27] : memref<64x128xbf16, #tpu.memory_space<vmem>>, vector<64x128xbf16>
    %cst_28 = arith.constant dense<0.000000e+00> : vector<8x128xf32>
    %64 = tpu.matmul %62, %63, %cst_28 {dimension_numbers = #tpu.dot_dimension_numbers<[1], [0], [0], [1], [0, 0, 1, 1], [], []>} : vector<8x64xbf16>, vector<64x128xbf16>, vector<8x128xf32> -> vector<8x128xf32>
    %c0_29 = arith.constant 0 : index
    %c0_30 = arith.constant 0 : index
    %65 = vector.load %arg9[%c0_29, %c0_30] : memref<1x128xf32, #tpu.memory_space<vmem>>, vector<1x128xf32>
    %66 = vector.broadcast %65 : vector<1x128xf32> to vector<8x128xf32>
    %67 = arith.addf %64, %66 : vector<8x128xf32>
    %cst_31 = arith.constant dense<0xFF800000> : vector<8xf32>
    %68 = vector.multi_reduction <maximumf>, %67, %cst_31 [1] : vector<8x128xf32> to vector<8xf32>
    %69 = vector.shape_cast %68 : vector<8xf32> to vector<8x1xf32>
    %70 = vector.broadcast %69 : vector<8x1xf32> to vector<8x128xf32>
    %71 = arith.subf %67, %70 : vector<8x128xf32>
    %72 = math.exp %71 : vector<8x128xf32>
    %cst_32 = arith.constant dense<0.000000e+00> : vector<8xf32>
    %73 = vector.multi_reduction <add>, %72, %cst_32 [1] : vector<8x128xf32> to vector<8xf32>
    %74 = vector.shape_cast %73 : vector<8xf32> to vector<8x1xf32>
    %75 = math.log %74 : vector<8x1xf32>
    %76 = vector.broadcast %69 : vector<8x1xf32> to vector<8x128xf32>
    %77 = arith.subf %67, %76 : vector<8x128xf32>
    %78 = vector.broadcast %75 : vector<8x1xf32> to vector<8x128xf32>
    %79 = arith.subf %77, %78 : vector<8x128xf32>
    %c0_33 = arith.constant 0 : index
    %c0_34 = arith.constant 0 : index
    %c0_35 = arith.constant 0 : index
    %80 = vector.load %arg10[%c0_33, %c0_34, %c0_35] : memref<1x8x128xf32, #tpu.memory_space<vmem>>, vector<1x8x128xf32>
    %81 = vector.shape_cast %80 : vector<1x8x128xf32> to vector<8x128xf32>
    %82 = vector.shape_cast %79 : vector<8x128xf32> to vector<1x8x128xf32>
    tpu.vector_store %arg10[%c0_33, %c0_34, %c0_35], %82 {strides = array<i32>} : memref<1x8x128xf32, #tpu.memory_space<vmem>>, vector<1x8x128xf32>,
    return
  }
  func.func @transform_0(%arg0: i32) -> (i32, i32, i32) {
    %c0_i32 = arith.constant 0 : i32
    %c0_i32_0 = arith.constant 0 : i32
    %c0_i32_1 = arith.constant 0 : i32
    return %arg0, %c0_i32, %c0_i32_0 : i32, i32, i32
  }
  func.func @transform_1(%arg0: i32) -> (i32, i32) {
    %c0_i32 = arith.constant 0 : i32
    %c0_i32_0 = arith.constant 0 : i32
    %c0_i32_1 = arith.constant 0 : i32
    return %c0_i32, %c0_i32_0 : i32, i32
  }
  func.func @transform_2(%arg0: i32) -> (i32, i32) {
    %c0_i32 = arith.constant 0 : i32
    %c0_i32_0 = arith.constant 0 : i32
    %c0_i32_1 = arith.constant 0 : i32
    return %c0_i32, %c0_i32_0 : i32, i32
  }
  func.func @transform_3(%arg0: i32) -> (i32, i32, i32) {
    %c0_i32 = arith.constant 0 : i32
    %c0_i32_0 = arith.constant 0 : i32
    %c0_i32_1 = arith.constant 0 : i32
    %c0_i32_2 = arith.constant 0 : i32
    return %c0_i32, %c0_i32_0, %c0_i32_1 : i32, i32, i32
  }
  func.func @transform_4(%arg0: i32) -> (i32, i32) {
    %c0_i32 = arith.constant 0 : i32
    %c0_i32_0 = arith.constant 0 : i32
    %c0_i32_1 = arith.constant 0 : i32
    return %c0_i32, %c0_i32_0 : i32, i32
  }
  func.func @transform_5(%arg0: i32) -> (i32, i32) {
    %c0_i32 = arith.constant 0 : i32
    %c0_i32_0 = arith.constant 0 : i32
    %c0_i32_1 = arith.constant 0 : i32
    return %c0_i32, %c0_i32_0 : i32, i32
  }
  func.func @transform_6(%arg0: i32) -> (i32, i32) {
    %c0_i32 = arith.constant 0 : i32
    %c0_i32_0 = arith.constant 0 : i32
    %c0_i32_1 = arith.constant 0 : i32
    return %c0_i32, %c0_i32_0 : i32, i32
  }
  func.func @transform_7(%arg0: i32) -> (i32, i32) {
    %c0_i32 = arith.constant 0 : i32
    %c0_i32_0 = arith.constant 0 : i32
    %c0_i32_1 = arith.constant 0 : i32
    return %c0_i32, %c0_i32_0 : i32, i32
  }
  func.func @transform_8(%arg0: i32) -> (i32, i32) {
    %c0_i32 = arith.constant 0 : i32
    %c0_i32_0 = arith.constant 0 : i32
    %c0_i32_1 = arith.constant 0 : i32
    return %c0_i32, %c0_i32_0 : i32, i32
  }
  func.func @transform_9(%arg0: i32) -> (i32, i32, i32) {
    %c0_i32 = arith.constant 0 : i32
    %c0_i32_0 = arith.constant 0 : i32
    %c0_i32_1 = arith.constant 0 : i32
    return %arg0, %c0_i32, %c0_i32_0 : i32, i32, i32
  }
}

</mosaic_0001>

<bundles_post_ra>
// kernel: cnn_fashion_forward.1
= control target key start
LH: loop header
LB: loop body
LE: loop exit
PB: predicated region body
PF: predicated region fallthrough
CT: control target
= control target key end

     0   :  { %14 = vsyncpa [#allocation3], 0  ;;  %s11375_s0 = inlined_call_operand.vmem [shape: f32[2,224,28], index: 0, kind: input, shape index: {}]   ;;  %s11376_s1 = inlined_call_operand.vmem [shape: bf16[84,416], index: 1, kind: input, shape index: {}]   ;;  %s11377_s2 = inlined_call_operand.vmem [shape: f32[1,416], index: 2, kind: input, shape index: {}]   ;;  %s11378_s3 = inlined_call_operand.vmem [shape: bf16[3,400,352], index: 3, kind: input, shape index: {}]   ;;  %s11379_s4 = inlined_call_operand.vmem [shape: f32[1,352], index: 4, kind: input, shape index: {}]   ;;  %s11380_s5 = inlined_call_operand.hbm [shape: bf16[1600,64], index: 5, kind: input, shape index: {}]   ;;  %s11381_s6 = inlined_call_operand.vmem [shape: f32[1,64], index: 6, kind: input, shape index: {}]   ;;  %s11382_s7 = inlined_call_operand.vmem [shape: bf16[64,128], index: 7, kind: input, shape index: {}]   ;;  %s11383_s8 = inlined_call_operand.vmem [shape: f32[1,128], index: 8, kind: input, shape index: {}]   ;;  %s11384_s9 = inlined_call_operand.hbm [shape: f32[2,8,128], index: 9, kind: output, shape index: {}]  }
   0x1   :  { %15 = vsyncpa [#allocation4], 0 }
   0x2   :  { %17 = vsyncpa [#allocation4 + $0x1], 0  ;;  %s8595_s30 = smov 0   ;;  %s8597_s10 = smov 0  }
   0x3   :  { %s8599_s11 = smov 0   ;;  %s8601_s12 = smov 0  }
   0x4 LB: > { %s8616_s13 = sadd.s32 4294967295, %s8531_s12   ;;  %s6436_s14 = sadd.s32 4294967294, %s8531_s12   ;;  %s8531_s12 = sphi %s8601_s12, %s11728_s12   ;;  %s8527_s11 = sphi %s8599_s11, %s11727_s11   ;;  %s8523_s10 = sphi %s8597_s10, %s11726_s10   ;;  %s8519_s30 = sphi %s8595_s30, %s11725_s30  }
   0x5   : > { %s8620_s15 = sadd.s32 1, %s8531_s12   ;;  %s224_s16 = sadd.s32 1, %s8527_s11 }
   0x6   : > { %s221_s17 = ssub.s32 %s8531_s12, %s8620_s15  ;;  %p234_p0 = scmp.ne.s32.totalorder %s8527_s11, %s8523_s10 }
   0x7   : > { %p222_p1 = scmp.eq.s32.totalorder %s221_s17, 0  ;;  %p235_p2 = scmp.eq.s32.totalorder %s8616_s13, 1 }
   0x8   : > { %p240_p3 = scmp.ne.s32.totalorder %s8523_s10, %s8519_s30  ;;  %p241_p4 = scmp.eq.s32.totalorder %s6436_s14, 1 }
   0x9   : > { %s8631_s18 = scalar_select %p222_p1, %s8527_s11, %s224_s16  }
   0xa   : > { %p8633_p5 = por %p235_p2, %p234_p0  ;;  %p8637_p6 = por %p241_p4, %p240_p3 }
   0xb   : > { %p6437_p7 = scmp.ge.s32.totalorder %s8531_s12, 1  ;;  %p248_p8 = scmp.lt.s32.totalorder %s8531_s12, 3 }
   0xc   : > { %s11481_s20 = scalar_select %p8637_p6, 1, 0 }
   0xd   : > { %p7526_p9 = scmp.eq.s32.totalorder %s8616_s13, 0  ;;  %p8644_p10 = pnand %p6437_p7, %p248_p8 }
   0xe   : > { %s8533_s22 = smov [#allocation2]  }
   0xf   : > { %s272_s23 = sshll.u32 %s8533_s22, 4  ;;  %p7518_p11 = pneg %p8644_p10  ;;  %s273_s23 = int_to_ptr.vmem [resolvable:$true] %s272_s23 }
  0x10   : > { %s8452_s24 = scalar_lea.vmem %s273_s23, 12800  ;;  %p8460_p3 = scmp.lt.s32.totalorder %s273_s23, %s273_s23 }
  0x11   : > { %p7519_p12 = pnand %p7526_p9, %p7518_p11  ;;  %p8453_p0 = scmp.ne.s32.totalorder %s273_s23, %s8452_s24 }
  0x12   : > { %p8461_p4 = scmp.lt.s32.totalorder %s8452_s24, %s8452_s24 }
  0x13   : > { %p8443_p13 = pneg %p7519_p12 }
  0x14   : > { %p8462_p6 = por %p8461_p4, %p8460_p3 }
  0x15   : > { %p8455_p1 = pnand %p8453_p0, %p8443_p13 }
  0x17   : > { %p8456_p2 = pneg %p8455_p1 }
  0x19   : > { %p8463_p7 = pnand %p8462_p6, %p8456_p2 }
  0x1b   : > { %8466 = shalt.err (!%p8463_p7)
}
  0x1c   : > { %s8534_s25 = smov 64   ;;  %s8535_s26 = smov 4  }
  0x1d   : > { %7521 = dma.hbm_to_vmem [thread:$0]  (!%p7519_p12), %s11380_s5, 12800, %s273_s23, [#allocation3], %s8534_s25, %s8534_s25, %s8535_s26  }
  0x1e   : > { %305 = sbr.rel (%p8644_p10) target bundleno = 2215 (0x8a7), region = 56 }
  0x23   : > { %8510 = dma.done.wait (%p7526_p9), [#allocation3], 12800  }
  0x24   : > { %8512 = vsyncadd (%p7526_p9), [#allocation3], 4294954496  ;;  %p341_p8 = scmp.lt.s32.totalorder %s8616_s13, 1  ;;  %v11388_v0 = vmov 0   ;;  %s8537_s22 = smov 28   ;;  %vm819_vm0 = vcmask 1041408  }
  0x25   : > { %864 = vmatprep.mubr.bf16.mxu0 %v11388_v0  ;;  %1027 = vmatprep.mubr.bf16.mxu1 %v11388_v0  ;;  %s8538_s23 = smov 56   ;;  %v645_v15 = vld [vmem:[%s11376_s1 + $0xa0] sm:$0x33]  ;;  %v646_v18 = vld [vmem:[%s11376_s1 + $0xa8] sm:$0x33]  ;;  %vm558_vm1 = vcmask 228352  }
  0x26   : > { %s342_s29 = scalar_select %p341_p8, %s8616_s13, 1  ;;  %v6465_v17 = vcombine.high %v645_v15, %v645_v15  ;;  %v6464_v19 = vcombine.low %v645_v15, %v645_v15  ;;  %v6467_v21 = vcombine.high %v646_v18, %v646_v18  ;;  %v6466_v22 = vcombine.low %v646_v18, %v646_v18  ;;  %v7981_v23 = vld [vmem:[%s11376_s1 + $0x84] ss:$16 sps:$4 sm:$0xff]   ;;  %v7983_v27 = vld [vmem:[%s11376_s1 + $0x8c] ss:$16 sps:$4 sm:$0xff]  }
  0x27   : > { %v7985_v30 = vld [vmem:[%s11376_s1 + $0x80] ss:$16 sps:$4 sm:$0xff]   ;;  %v7986_v31 = vld [vmem:[%s11376_s1 + $0x88] ss:$16 sps:$4 sm:$0xff]   ;;  %v7987_v32 = vld [vmem:[%s11376_s1 + $0x64] ss:$16 sps:$4 sm:$0xff]  }
  0x28   : > { %s7511_s14 = smul.u32 224, %s342_s29  ;;  %6468 = vmatprep.subr.msk.bf16.mxu0 %vm819_vm0, %v6465_v17  ;;  %v821_v26 = vsel %vm819_vm0, %v6464_v19, 0  ;;  %6482 = vmatprep.subr.msk.bf16.mxu1 %vm819_vm0, %v6467_v21  ;;  %v827_v29 = vsel %vm819_vm0, %v6466_v22, 0  ;;  %v7989_v33 = vld [vmem:[%s11376_s1 + $0x6c] ss:$16 sps:$4 sm:$0xff]   ;;  %vm585_vm2 = vcmask 457728  }
  0x29   : > { %837 = vmatpush1.bf16.msra.mxu0 %v821_v26  ;;  %1000 = vmatpush1.bf16.msra.mxu1 %v827_v29  ;;  %v7991_v38 = vld [vmem:[%s11376_s1 + $0x60] ss:$16 sps:$4 sm:$0xff]   ;;  %v7992_v39 = vld [vmem:[%s11376_s1 + $0x68] ss:$16 sps:$4 sm:$0xff]   ;;  %v7993_v40 = vld [vmem:[%s11376_s1 + $0x44] ss:$16 sps:$4 sm:$0xff]  }
  0x2a   : > { %s8668_s21 = scalar_lea.vmem %s11375_s0, %s7511_s14  ;;  %838 = vmatprep.subr.bf16.mxu0 %v7981_v23  ;;  %1001 = vmatprep.subr.bf16.mxu1 %v7983_v27  ;;  %v7995_v41 = vld [vmem:[%s11376_s1 + $0x4c] ss:$16 sps:$4 sm:$0xff]   ;;  %v7997_v46 = vld [vmem:[%s11376_s1 + $0x40] ss:$16 sps:$4 sm:$0xff]   ;;  %v7998_v47 = vld [vmem:[%s11376_s1 + $0x48] ss:$16 sps:$4 sm:$0xff]  }
  0x2b   : > { %v8671_v1 = vld [vmem:[%s8668_s21 + $0x8] sm:$0xff]  ;;  %v8674_v2 = vld [vmem:[%s8668_s21 + $0x10] sm:$0xff]  ;;  %v8677_v3 = vld [vmem:[%s8668_s21 + $0x18] sm:$0xff]  ;;  %vm779_vm3 = vcmask 687104   ;;  %s8539_s26 = smov 112   ;;  %vm1662_vm4 = vcmask 916480  }
  0x2c   : > { %v7572_v4 = vpack.i.bf16 %v8674_v2, %v8671_v1  ;;  %v351_v5 = vld [vmem:[%s8668_s21 + $0x20] sm:$0xff]  ;;  %v352_v6 = vld [vmem:[%s8668_s21 + $0x28] sm:$0xff]  ;;  %v7577_v8 = vpack.i.bf16 %v8677_v3, %v8674_v2  ;;  %v353_v10 = vld [vmem:[%s8668_s21 + $0x30] sm:$0xff]  ;;  %vm2591_vm5 = vcmask 130048   ;;  %s8540_s16 = smov 96   ;;  %vm5081_vm6 = vcmask 785408  }
  0x2d   : > { %v7582_v7 = vpack.i.bf16 %v351_v5, %v8677_v3  ;;  %v7587_v9 = vpack.i.bf16 %v352_v6, %v351_v5  ;;  %v354_v11 = vld [vmem:[%s8668_s21 + $0x38] sm:$0xff]  ;;  %v7592_v12 = vpack.i.bf16 %v353_v10, %v352_v6  ;;  %v355_v14 = vld [vmem:[%s8668_s21 + $0x40] sm:$0xff]  ;;  %v356_v16 = vld [vmem:[%s8668_s21 + $0x48] sm:$0xff]  ;;  %839 = vmatpush1.bf16.msra.mxu0 %v7985_v30  ;;  %1002 = vmatpush1.bf16.msra.mxu1 %v7986_v31  ;;  %vm5131_vm7 = vcmask 523264   ;;  %s7096_s17 = sshll.u32 %s8616_s13, 7 }
  0x2e   : > { %7573 = vrot.lane.b32.xlu0 %v7572_v4, %s8537_s22  ;;  %v7597_v13 = vpack.i.bf16 %v354_v11, %v353_v10  ;;  %v357_v20 = vld [vmem:[%s8668_s21 + $0x50] sm:$0xff]  ;;  %v7602_v24 = vpack.i.bf16 %v355_v14, %v354_v11  ;;  %v358_v25 = vld [vmem:[%s8668_s21 + $0x58] sm:$0xff]  ;;  %v7607_v28 = vpack.i.bf16 %v356_v16, %v355_v14  ;;  %v359_v35 = vld [vmem:[%s8668_s21 + $0x60] sm:$0xff]  ;;  %840 = vmatprep.subr.bf16.mxu0 %v7987_v32  ;;  %vm8543_vm8 = vmmov 0   ;;  %s6363_s28 = scalar_lea.hbm %s11384_s9, %s7096_s17 }
  0x2f   : > { %7583 = vrot.lane.b32.xlu1 %v7582_v7, %s8537_s22  ;;  %v7612_v34 = vpack.i.bf16 %v357_v20, %v356_v16  ;;  %v7617_v36 = vpack.i.bf16 %v358_v25, %v357_v20  ;;  %v360_v37 = vld [vmem:[%s8668_s21 + $0x68] sm:$0xff]  ;;  %1003 = vmatprep.subr.bf16.mxu1 %v7989_v33  ;;  %v7622_v42 = vpack.i.bf16 %v359_v35, %v358_v25  ;;  %v361_v43 = vld [vmem:[%s8668_s21 + $0x70] sm:$0xff]  ;;  %v362_v45 = vld [vmem:[%s8668_s21 + $0x78] sm:$0xff] }
  0x30   : > { %v7627_v44 = vpack.i.bf16 %v360_v37, %v359_v35  ;;  %v363_v48 = vld [vmem:[%s8668_s21 + $0x80] sm:$0xff]  ;;  %v8001_v50 = vld [vmem:[%s11376_s1 + $0x2c] ss:$16 sps:$4 sm:$0xff]   ;;  %v7632_v51 = vpack.i.bf16 %v361_v43, %v360_v37  ;;  %v8004_v54 = vld [vmem:[%s11376_s1 + $0x28] ss:$16 sps:$4 sm:$0xff]   ;;  %v7637_v55 = vpack.i.bf16 %v362_v45, %v361_v43 }
  0x31   : > { %841 = vmatpush1.bf16.msra.mxu0 %v7991_v38  ;;  %1004 = vmatpush1.bf16.msra.mxu1 %v7992_v39  ;;  %v7999_v49 = vld [vmem:[%s11376_s1 + $0x24] ss:$16 sps:$4 sm:$0xff]   ;;  %v364_v52 = vld [vmem:[%s8668_s21 + $0x88] sm:$0xff]  ;;  %v8003_v53 = vld [vmem:[%s11376_s1 + $0x20] ss:$16 sps:$4 sm:$0xff]   ;;  %v7642_v59 = vpack.i.bf16 %v363_v48, %v362_v45 }
  0x32   : > { %7578 = vrot.lane.b32.xlu0 %v7577_v8, %s8538_s23  ;;  %842 = vmatprep.subr.bf16.mxu0 %v7993_v40  ;;  %v8005_v56 = vld [vmem:[%s11376_s1 + $0x4] ss:$16 sps:$4 sm:$0xff]   ;;  %v8007_v57 = vld [vmem:[%s11376_s1 + $0xc] ss:$16 sps:$4 sm:$0xff]   ;;  %v8009_v61 = vld [vmem:[%s11376_s1] ss:$16 sps:$4 sm:$0xff]   ;;  %v7647_v63 = vpack.i.bf16 %v364_v52, %v363_v48 }
  0x33   : > { %7588 = vrot.lane.b32.xlu1 %v7587_v9, %s8538_s23  ;;  %1005 = vmatprep.subr.bf16.mxu1 %v7995_v41  ;;  %v365_v58 = vld [vmem:[%s8668_s21 + $0x90] sm:$0xff]  ;;  %v366_v60 = vld [vmem:[%s8668_s21 + $0x98] sm:$0xff]  ;;  %v367_v4 = vld [vmem:[%s8668_s21 + $0xa0] sm:$0xff] }
  0x34   : > { %v8010_v62 = vld [vmem:[%s11376_s1 + $0x8] ss:$16 sps:$4 sm:$0xff]   ;;  %v7652_v5 = vpack.i.bf16 %v365_v58, %v364_v52  ;;  %v7657_v7 = vpack.i.bf16 %v366_v60, %v365_v58  ;;  %v369_v8 = vld [vmem:[%s8668_s21 + $0xb0] sm:$0xff]  ;;  %v7662_v9 = vpack.i.bf16 %v367_v4, %v366_v60  ;;  %v347_v23 = vld [vmem:[%s8668_s21] sm:$0xff] }
  0x35   : > { %843 = vmatpush1.bf16.msra.mxu0 %v7997_v46  ;;  %1006 = vmatpush1.bf16.msra.mxu1 %v7998_v47  ;;  %v368_v6 = vld [vmem:[%s8668_s21 + $0xa8] sm:$0xff]  ;;  %v370_v10 = vld [vmem:[%s8668_s21 + $0xb8] sm:$0xff]  ;;  %v373_v16 = vld [vmem:[%s8668_s21 + $0xd0] sm:$0xff] }
  0x36   : > { %7593 = vrot.lane.b32.xlu0 %v7592_v12, %s8537_s22  ;;  %844 = vmatprep.subr.bf16.mxu0 %v7999_v49  ;;  %v7667_v11 = vpack.i.bf16 %v368_v6, %v367_v4  ;;  %v371_v12 = vld [vmem:[%s8668_s21 + $0xc0] sm:$0xff]  ;;  %v372_v14 = vld [vmem:[%s8668_s21 + $0xc8] sm:$0xff]  ;;  %v7677_v15 = vpack.i.bf16 %v370_v10, %v369_v8  ;;  %v374_v18 = vld [vmem:[%s8668_s21 + $0xd8] sm:$0xff] }
  0x37   : > { %7598 = vrot.lane.b32.xlu1 %v7597_v13, %s8538_s23  ;;  %1007 = vmatprep.subr.bf16.mxu1 %v8001_v50  ;;  %v7672_v13 = vpack.i.bf16 %v369_v8, %v368_v6  ;;  %v7682_v17 = vpack.i.bf16 %v371_v12, %v370_v10  ;;  %v7687_v19 = vpack.i.bf16 %v372_v14, %v371_v12  ;;  %v8419_v50 = vld [vmem:[%s8668_s21 + $0x28] sm:$0xff]  ;;  %v8420_v52 = vld [vmem:[%s8668_s21 + $0x20] sm:$0xff] }
  0x38   : > { %v7692_v20 = vpack.i.bf16 %v373_v16, %v372_v14  ;;  %v7697_v21 = vpack.i.bf16 %v374_v18, %v373_v16 }
  0x39   : > { %845 = vmatpush1.bf16.msra.mxu0 %v8003_v53  ;;  %1008 = vmatpush1.bf16.msra.mxu1 %v8004_v54 }
  0x3a   : > { %7603 = vrot.lane.b32.xlu0 %v7602_v24, %s8537_s22  ;;  %846 = vmatprep.subr.bf16.mxu0 %v8005_v56 }
  0x3b   : > { %7608 = vrot.lane.b32.xlu1 %v7607_v28, %s8538_s23  ;;  %1009 = vmatprep.subr.bf16.mxu1 %v8007_v57 }
  0x3d   : > { %847 = vmatpush1.bf16.msra.mxu0 %v8009_v61  ;;  %1010 = vmatpush1.bf16.msra.mxu1 %v8010_v62 }
  0x3e   : > { %7613 = vrot.lane.b32.xlu0 %v7612_v34, %s8537_s22 }
  0x3f   : > { %7618 = vrot.lane.b32.xlu1 %v7617_v36, %s8538_s23 }
  0x42   : > { %7623 = vrot.lane.b32.xlu0 %v7622_v42, %s8537_s22 }
  0x43   : > { %7628 = vrot.lane.b32.xlu1 %v7627_v44, %s8538_s23 }
  0x46   : > { %7633 = vrot.lane.b32.xlu0 %v7632_v51, %s8537_s22 }
  0x47   : > { %7638 = vrot.lane.b32.xlu1 %v7637_v55, %s8538_s23 }
  0x4a   : > { %7643 = vrot.lane.b32.xlu0 %v7642_v59, %s8537_s22 }
  0x4b   : > { %7648 = vrot.lane.b32.xlu1 %v7647_v63, %s8538_s23 }
  0x4e   : > { %7653 = vrot.lane.b32.xlu0 %v7652_v5, %s8537_s22  ;;  %v8421_v5 = vld [vmem:[%s8668_s21 + $0x38] sm:$0xff] }
  0x4f   : > { %7658 = vrot.lane.b32.xlu1 %v7657_v7, %s8538_s23  ;;  %v8422_v7 = vld [vmem:[%s8668_s21 + $0x30] sm:$0xff] }
  0x52   : > { %7663 = vrot.lane.b32.xlu0 %v7662_v9, %s8537_s22 }
  0x53   : > { %7668 = vrot.lane.b32.xlu1 %v7667_v11, %s8538_s23 }
  0x56   : > { %7673 = vrot.lane.b32.xlu0 %v7672_v13, %s8537_s22 }
  0x57   : > { %7678 = vrot.lane.b32.xlu1 %v7677_v15, %s8538_s23 }
  0x5a   : > { %7683 = vrot.lane.b32.xlu0 %v7682_v17, %s8537_s22 }
  0x5b   : > { %7688 = vrot.lane.b32.xlu1 %v7687_v19, %s8538_s23  ;;  %v8423_v19 = vld [vmem:[%s8668_s21 + $0x40] sm:$0xff] }
  0x5e   : > { %7693 = vrot.lane.b32.xlu0 %v7692_v20, %s8537_s22  ;;  %s338_s22 = sand.u32 1, %s8523_s10  }
  0x5f   : > { %7698 = vrot.lane.b32.xlu1 %v7697_v21, %s8538_s23  ;;  %s6442_s23 = sshll.u32 %s338_s22, 3  ;;  %s6352_s29 = scalar_lea.sflag [#allocation4], %s338_s22 }
  0x60   : > { %s340_s24 = scalar_lea.vmem [#allocation5], %s6442_s23 }
  0x61   : > { %s6365_s25 = sshll.u32 %s340_s24, 4  ;;  %s6366_s25 = int_to_ptr.vmem [resolvable:$true] %s6365_s25 }
  0x62   : > { %s8467_s14 = scalar_lea.vmem %s6366_s25, 128 }
  0x63   : > { %p8468_p6 = scmp.ne.s32.totalorder %s6366_s25, %s8467_s14 }
  0x65   : > { %p8469_p9 = pnand %p8468_p6, %p8633_p5 }
  0x67   : > { %p8470_p10 = pneg %p8469_p9 }
  0xa0   : > { %v7574_v22 = vpop.permute.xlu0 %7573 }
  0xa1   : > { %v7584_v24 = vpop.permute.xlu1 %7583  ;;  %v7576_v25 = vunpack.i.h.bf16 %v7574_v22  ;;  %v7575_v26 = vunpack.i.l.bf16 %v7574_v22  ;;  %v8424_v22 = vld [vmem:[%s8668_s21 + $0x48] sm:$0xff] }
  0xa2   : > { %v7586_v33 = vunpack.i.h.bf16 %v7584_v24  ;;  %v7585_v34 = vunpack.i.l.bf16 %v7584_v24 }
  0xa3   : > { %v560_v31 = vsel %vm558_vm1, %v8671_v1, %v7576_v25  ;;  %v559_v32 = vsel %vm558_vm1, %v347_v23, %v7575_v26 }
  0xa4   : > { %v7579_v27 = vpop.permute.xlu0 %7578  ;;  %v562_v42 = vsel %vm558_vm1, %v8677_v3, %v7586_v33  ;;  %v561_v1 = vsel %vm558_vm1, %v8674_v2, %v7585_v34  ;;  %v8425_v33 = vld [vmem:[%s8668_s21 + $0x88] sm:$0xff] }
  0xa5   : > { %v7581_v28 = vunpack.i.h.bf16 %v7579_v27  ;;  %v7580_v29 = vunpack.i.l.bf16 %v7579_v27  ;;  %v7589_v30 = vpop.permute.xlu1 %7588 }
  0xa6   : > { %v7591_v39 = vunpack.i.h.bf16 %v7589_v30  ;;  %v7590_v40 = vunpack.i.l.bf16 %v7589_v30 }
  0xa7   : > { %v586_v35 = vsel %vm585_vm2, %v559_v32, %v7580_v29  ;;  %v587_v36 = vsel %vm585_vm2, %v560_v31, %v7581_v28 }
  0xa8   : > { %v612_v37 = vpack.c.bf16 %v587_v36, %v586_v35  ;;  %v7594_v38 = vpop.permute.xlu0 %7593  ;;  %v588_v46 = vsel %vm585_vm2, %v561_v1, %v7590_v40  ;;  %v589_v47 = vsel %vm585_vm2, %v562_v42, %v7591_v39  ;;  %v8426_v35 = vld [vmem:[%s8668_s21 + $0x80] sm:$0xff] }
  0xa9   : > { %v7599_v41 = vpop.permute.xlu1 %7598  ;;  %v7596_v43 = vunpack.i.h.bf16 %v7594_v38  ;;  %v7595_v44 = vunpack.i.l.bf16 %v7594_v38  ;;  %v613_v2 = vpack.c.bf16 %v589_v47, %v588_v46 }
  0xaa   : > { %6469 = vmatmul.mubr.msk.bf16.vlgmr.msra.gmra.mxu0 %vm779_vm3, %v612_v37  ;;  %6483 = vmatmul.mubr.msk.bf16.vlgmr.msra.gmra.mxu1 %vm779_vm3, %v612_v37  ;;  %v7601_v48 = vunpack.i.h.bf16 %v7599_v41  ;;  %v7600_v49 = vunpack.i.l.bf16 %v7599_v41 }
  0xab   : > { %874 = vmatprep.mubr.bf16.mxu0 %v11388_v0  ;;  %1037 = vmatprep.mubr.bf16.mxu1 %v11388_v0  ;;  %v564_v51 = vsel %vm558_vm1, %v8419_v50, %v7596_v43  ;;  %v563_v53 = vsel %vm558_vm1, %v8420_v52, %v7595_v44 }
  0xac   : > { %v7604_v45 = vpop.permute.xlu0 %7603  ;;  %v590_v56 = vsel %vm585_vm2, %v563_v53, %v7600_v49  ;;  %v591_v57 = vsel %vm585_vm2, %v564_v51, %v7601_v48  ;;  %v8429_v51 = vld [vmem:[%s8668_s21 + $0x90] sm:$0xff]  ;;  %v8430_v53 = vld [vmem:[%s8668_s21 + $0x58] sm:$0xff] }
  0xad   : > { %v7609_v3 = vpop.permute.xlu1 %7608  ;;  %v7606_v58 = vunpack.i.h.bf16 %v7604_v45  ;;  %v7605_v59 = vunpack.i.l.bf16 %v7604_v45  ;;  %v614_v62 = vpack.c.bf16 %v591_v57, %v590_v56 }
  0xae   : > { %v7611_v63 = vunpack.i.h.bf16 %v7609_v3  ;;  %v7610_v4 = vunpack.i.l.bf16 %v7609_v3  ;;  %v8427_v3 = vld [vmem:[%s8668_s21 + $0x50] sm:$0xff] }
  0xaf   : > { %v566_v6 = vsel %vm558_vm1, %v8421_v5, %v7606_v58  ;;  %v565_v8 = vsel %vm558_vm1, %v8422_v7, %v7605_v59  ;;  %v8431_v7 = vld [vmem:[%s8668_s21 + $0xa8] sm:$0xff] }
  0xb0   : > { %v7614_v54 = vpop.permute.xlu0 %7613  ;;  %v592_v11 = vsel %vm585_vm2, %v565_v8, %v7610_v4  ;;  %v593_v12 = vsel %vm585_vm2, %v566_v6, %v7611_v63 }
  0xb1   : > { %v7619_v55 = vpop.permute.xlu1 %7618  ;;  %v7615_v13 = vunpack.i.l.bf16 %v7614_v54  ;;  %v7616_v14 = vunpack.i.h.bf16 %v7614_v54  ;;  %v615_v17 = vpack.c.bf16 %v593_v12, %v592_v11  ;;  %v8432_v11 = vld [vmem:[%s8668_s21 + $0xa0] sm:$0xff] }
  0xb2   : > { %6470 = vmatmul.mubr.msk.bf16.gmra.mxu0 %vm779_vm3, %v613_v2  ;;  %6484 = vmatmul.mubr.msk.bf16.gmra.mxu1 %vm779_vm3, %v613_v2  ;;  %v7620_v18 = vunpack.i.l.bf16 %v7619_v55  ;;  %v7621_v21 = vunpack.i.h.bf16 %v7619_v55  ;;  %v8428_v2 = vld [vmem:[%s8668_s21 + $0x98] sm:$0xff] }
  0xb3   : > { %884 = vmatprep.mubr.bf16.mxu0 %v11388_v0  ;;  %1047 = vmatprep.mubr.bf16.mxu1 %v11388_v0  ;;  %v567_v20 = vsel %vm558_vm1, %v8423_v19, %v7615_v13  ;;  %v568_v23 = vsel %vm558_vm1, %v8424_v22, %v7616_v14 }
  0xb4   : > { %v8830_v60 = vpop.permute.xlu0 %7623  ;;  %v594_v28 = vsel %vm585_vm2, %v567_v20, %v7620_v18  ;;  %v595_v31 = vsel %vm585_vm2, %v568_v23, %v7621_v21 }
  0xb5   : > { %v8832_v61 = vpop.permute.xlu1 %7628  ;;  %v7625_v32 = vunpack.i.l.bf16 %v8830_v60  ;;  %v7626_v37 = vunpack.i.h.bf16 %v8830_v60  ;;  %v616_v44 = vpack.c.bf16 %v595_v31, %v594_v28  ;;  %v8435_v31 = vld [vmem:[%s8668_s21 + $0xb0] sm:$0xff] }
  0xb6   : > { %v7630_v45 = vunpack.i.l.bf16 %v8832_v61  ;;  %v7631_v49 = vunpack.i.h.bf16 %v8832_v61 }
  0xb7   : > { %v569_v48 = vsel %vm558_vm1, %v8427_v3, %v7625_v32  ;;  %v570_v54 = vsel %vm558_vm1, %v8430_v53, %v7626_v37 }
  0xb8   : > { %v8838_v9 = vpop.permute.xlu0 %7633  ;;  %v597_v5 = vsel %vm585_vm2, %v570_v54, %v7631_v49 }
  0xb9   : > { %v8840_v10 = vpop.permute.xlu1 %7638  ;;  %v7635_v6 = vunpack.i.l.bf16 %v8838_v9  ;;  %v7636_v13 = vunpack.i.h.bf16 %v8838_v9 }
  0xba   : > { %6471 = vmatmul.mubr.msk.bf16.gmra.mxu0 %vm779_vm3, %v614_v62  ;;  %6485 = vmatmul.mubr.msk.bf16.gmra.mxu1 %vm779_vm3, %v614_v62  ;;  %v596_v62 = vsel %vm585_vm2, %v569_v48, %v7630_v45  ;;  %v7641_v28 = vunpack.i.h.bf16 %v8840_v10  ;;  %v8437_v45 = vld [vmem:[%s8668_s21 + $0xc8] sm:$0xff] }
  0xbb   : > { %894 = vmatprep.mubr.bf16.mxu0 %v11388_v0  ;;  %1057 = vmatprep.mubr.bf16.mxu1 %v11388_v0  ;;  %v617_v23 = vpack.c.bf16 %v597_v5, %v596_v62  ;;  %v8016_v62 = vld [vmem:[%s11378_s3 + $0x484] ss:$12 sps:$4 sm:$0xff]  }
  0xbc   : > { %v8848_v15 = vpop.permute.xlu0 %7643  ;;  %2744 = vmatprep.subr.bf16.mxu1 %v8016_v62  ;;  %v8020_v5 = vld [vmem:[%s11378_s3 + $0x2d0] ss:$12 sps:$4 sm:$0xff]  }
  0xbd   : > { %v8850_v16 = vpop.permute.xlu1 %7648  ;;  %v7646_v48 = vunpack.i.h.bf16 %v8848_v15  ;;  %v7645_v49 = vunpack.i.l.bf16 %v8848_v15 }
  0xbe   : > { %v7651_v53 = vunpack.i.h.bf16 %v8850_v16  ;;  %v7650_v54 = vunpack.i.l.bf16 %v8850_v16  ;;  %v8011_v16 = vld [vmem:[%s11378_s3 + $0x300] ss:$12 sps:$4 sm:$0xff]  }
  0xc0   : > { %v7654_v24 = vpop.permute.xlu0 %7653 }
  0xc1   : > { %v7656_v25 = vunpack.i.h.bf16 %v7654_v24  ;;  %v7655_v26 = vunpack.i.l.bf16 %v7654_v24  ;;  %v7659_v27 = vpop.permute.xlu1 %7658  ;;  %v7640_v24 = vunpack.i.l.bf16 %v8840_v10 }
  0xc2   : > { %6472 = vmatmul.mubr.msk.bf16.gmra.mxu0 %vm779_vm3, %v615_v17  ;;  %6486 = vmatmul.mubr.msk.bf16.gmra.mxu1 %vm779_vm3, %v615_v17  ;;  %v7661_v29 = vunpack.i.h.bf16 %v7659_v27  ;;  %v7660_v30 = vunpack.i.l.bf16 %v7659_v27  ;;  %v8433_v27 = vld [vmem:[%s8668_s21 + $0x60] sm:$0xff] }
  0xc3   : > { %904 = vmatprep.mubr.bf16.mxu0 %v11388_v0  ;;  %1067 = vmatprep.mubr.bf16.mxu1 %v11388_v0  ;;  %v576_v34 = vsel %vm558_vm1, %v8425_v33, %v7656_v25  ;;  %v575_v36 = vsel %vm558_vm1, %v8426_v35, %v7655_v26  ;;  %v571_v9 = vsel %vm558_vm1, %v8433_v27, %v7635_v6  ;;  %v8436_v33 = vld [vmem:[%s8668_s21 + $0x68] sm:$0xff]  ;;  %v8022_v6 = vld [vmem:[%s11378_s3 + $0x2d4] ss:$12 sps:$4 sm:$0xff]  }
  0xc4   : > { %v602_v38 = vsel %vm585_vm2, %v575_v36, %v7660_v30  ;;  %v603_v39 = vsel %vm585_vm2, %v576_v34, %v7661_v29  ;;  %v7664_v40 = vpop.permute.xlu0 %7663  ;;  %v8434_v29 = vld [vmem:[%s8668_s21 + $0xb8] sm:$0xff]  ;;  %v572_v34 = vsel %vm558_vm1, %v8436_v33, %v7636_v13  ;;  %v8029_v13 = vld [vmem:[%s11378_s3 + $0x2a0] ss:$12 sps:$4 sm:$0xff]  }
  0xc5   : > { %v8870_v41 = vpack.c.bf16 %v603_v39, %v602_v38  ;;  %v7666_v42 = vunpack.i.h.bf16 %v7664_v40  ;;  %v7665_v1 = vunpack.i.l.bf16 %v7664_v40  ;;  %v7669_v43 = vpop.permute.xlu1 %7668  ;;  %v8047_v27 = vld [vmem:[%s11378_s3 + $0x420] ss:$12 sps:$4 sm:$0xff]  }
  0xc6   : > { %v7671_v46 = vunpack.i.h.bf16 %v7669_v43  ;;  %v7670_v47 = vunpack.i.l.bf16 %v7669_v43  ;;  %v8058_v33 = vld [vmem:[%s11378_s3 + $0x40c] ss:$12 sps:$4 sm:$0xff]  }
  0xc7   : > { %v578_v50 = vsel %vm558_vm1, %v8428_v2, %v7666_v42  ;;  %v577_v52 = vsel %vm558_vm1, %v8429_v51, %v7665_v1  ;;  %v598_v42 = vsel %vm585_vm2, %v571_v9, %v7640_v24  ;;  %v8043_v24 = vld [vmem:[%s11378_s3 + $0x43c] ss:$12 sps:$4 sm:$0xff]   ;;  %v8049_v9 = vld [vmem:[%s11378_s3 + $0x424] ss:$12 sps:$4 sm:$0xff]  }
  0xc8   : > { %v604_v55 = vsel %vm585_vm2, %v577_v52, %v7670_v47  ;;  %v605_v56 = vsel %vm585_vm2, %v578_v50, %v7671_v46  ;;  %v7674_v57 = vpop.permute.xlu0 %7673  ;;  %v8438_v47 = vld [vmem:[%s8668_s21 + $0xc0] sm:$0xff] }
  0xc9   : > { %v8884_v58 = vpack.c.bf16 %v605_v56, %v604_v55  ;;  %v7676_v59 = vunpack.i.h.bf16 %v7674_v57  ;;  %v7675_v60 = vunpack.i.l.bf16 %v7674_v57  ;;  %v7679_v61 = vpop.permute.xlu1 %7678  ;;  %v8439_v55 = vld [vmem:[%s8668_s21 + $0x78] sm:$0xff]  ;;  %v8440_v57 = vld [vmem:[%s8668_s21 + $0x70] sm:$0xff]  ;;  %s8541_s21 = smov 64  }
  0xca   : > { %6473 = vmatmul.mubr.msk.bf16.gmra.mxu0 %vm779_vm3, %v616_v44  ;;  %6487 = vmatmul.mubr.msk.bf16.gmra.mxu1 %vm779_vm3, %v616_v44  ;;  %v7681_v63 = vunpack.i.h.bf16 %v7679_v61  ;;  %v7680_v4 = vunpack.i.l.bf16 %v7679_v61  ;;  %v599_v44 = vsel %vm585_vm2, %v572_v34, %v7641_v28  ;;  %v574_v56 = vsel %vm558_vm1, %v8439_v55, %v7646_v48  ;;  %v8050_v28 = vld [vmem:[%s11378_s3 + $0x3c0] ss:$12 sps:$4 sm:$0xff]   ;;  %v8076_v48 = vld [vmem:[%s11378_s3 + $0x3dc] ss:$12 sps:$4 sm:$0xff]  }
  0xcb   : > { %914 = vmatprep.mubr.bf16.mxu0 %v11388_v0  ;;  %1077 = vmatprep.mubr.bf16.mxu1 %v11388_v0  ;;  %v580_v8 = vsel %vm558_vm1, %v8431_v7, %v7676_v59  ;;  %v579_v12 = vsel %vm558_vm1, %v8432_v11, %v7675_v60  ;;  %v618_v52 = vpack.c.bf16 %v599_v44, %v598_v42  ;;  %v8023_v7 = vld [vmem:[%s11378_s3 + $0x468] ss:$12 sps:$4 sm:$0xff]   ;;  %v8026_v11 = vld [vmem:[%s11378_s3 + $0x2b8] ss:$12 sps:$4 sm:$0xff]   ;;  %v8068_v42 = vld [vmem:[%s11378_s3 + $0x360] ss:$12 sps:$4 sm:$0xff]  }
  0xcc   : > { %v606_v14 = vsel %vm585_vm2, %v579_v12, %v7680_v4  ;;  %v607_v17 = vsel %vm585_vm2, %v580_v8, %v7681_v63  ;;  %v7684_v18 = vpop.permute.xlu0 %7683  ;;  %v573_v59 = vsel %vm558_vm1, %v8440_v57, %v7645_v49  ;;  %v601_v60 = vsel %vm585_vm2, %v574_v56, %v7651_v53  ;;  %v8017_v63 = vld [vmem:[%s11378_s3 + $0x2e8] ss:$12 sps:$4 sm:$0xff]   ;;  %v8019_v4 = vld [vmem:[%s11378_s3 + $0x2ec] ss:$12 sps:$4 sm:$0xff]  }
  0xcd   : > { %v8900_v19 = vpack.c.bf16 %v607_v17, %v606_v14  ;;  %v7686_v20 = vunpack.i.h.bf16 %v7684_v18  ;;  %v7685_v21 = vunpack.i.l.bf16 %v7684_v18  ;;  %v7689_v22 = vpop.permute.xlu1 %7688  ;;  %v600_v15 = vsel %vm585_vm2, %v573_v59, %v7650_v54  ;;  %v8025_v8 = vld [vmem:[%s11378_s3 + $0x46c] ss:$12 sps:$4 sm:$0xff]   ;;  %v8028_v12 = vld [vmem:[%s11378_s3 + $0x2bc] ss:$12 sps:$4 sm:$0xff]   ;;  %v8031_v14 = vld [vmem:[%s11378_s3 + $0x2a4] ss:$12 sps:$4 sm:$0xff]  }
  0xce   : > { %v7691_v25 = vunpack.i.h.bf16 %v7689_v22  ;;  %v7690_v26 = vunpack.i.l.bf16 %v7689_v22  ;;  %v619_v61 = vpack.c.bf16 %v601_v60, %v600_v15  ;;  %v8032_v17 = vld [vmem:[%s11378_s3 + $0x450] ss:$12 sps:$4 sm:$0xff]   ;;  %v8034_v18 = vld [vmem:[%s11378_s3 + $0x454] ss:$12 sps:$4 sm:$0xff]  }
  0xcf   : > { %v582_v30 = vsel %vm558_vm1, %v8434_v29, %v7686_v20  ;;  %v581_v32 = vsel %vm558_vm1, %v8435_v31, %v7685_v21  ;;  %v8037_v20 = vld [vmem:[%s11378_s3 + $0x28c] ss:$12 sps:$4 sm:$0xff]   ;;  %v8038_v21 = vld [vmem:[%s11378_s3 + $0x270] ss:$12 sps:$4 sm:$0xff]   ;;  %v8040_v22 = vld [vmem:[%s11378_s3 + $0x274] ss:$12 sps:$4 sm:$0xff]  }
  0xd0   : > { %v608_v35 = vsel %vm585_vm2, %v581_v32, %v7690_v26  ;;  %v609_v36 = vsel %vm585_vm2, %v582_v30, %v7691_v25  ;;  %v7694_v37 = vpop.permute.xlu0 %7693  ;;  %v8044_v25 = vld [vmem:[%s11378_s3 + $0x258] ss:$12 sps:$4 sm:$0xff]   ;;  %v8046_v26 = vld [vmem:[%s11378_s3 + $0x25c] ss:$12 sps:$4 sm:$0xff]   ;;  %v8061_v34 = vld [vmem:[%s11378_s3 + $0x394] ss:$12 sps:$4 sm:$0xff]  }
  0xd1   : > { %v623_v38 = vpack.c.bf16 %v609_v36, %v608_v35  ;;  %v7696_v39 = vunpack.i.h.bf16 %v7694_v37  ;;  %v7695_v40 = vunpack.i.l.bf16 %v7694_v37  ;;  %v7699_v10 = vpop.permute.xlu1 %7698  ;;  %v8052_v29 = vld [vmem:[%s11378_s3 + $0x3c4] ss:$12 sps:$4 sm:$0xff]   ;;  %v8053_v30 = vld [vmem:[%s11378_s3 + $0x3a8] ss:$12 sps:$4 sm:$0xff]   ;;  %v8055_v31 = vld [vmem:[%s11378_s3 + $0x3ac] ss:$12 sps:$4 sm:$0xff]   ;;  %v649_v36 = vlaneseq }
  0xd2   : > { %6474 = vmatmul.mubr.msk.bf16.gmra.mxu0 %vm779_vm3, %v617_v23  ;;  %6488 = vmatmul.mubr.msk.bf16.gmra.mxu1 %vm779_vm3, %v617_v23  ;;  %v7701_v1 = vunpack.i.h.bf16 %v7699_v10  ;;  %v7700_v43 = vunpack.i.l.bf16 %v7699_v10  ;;  %v8041_v23 = vld [vmem:[%s11378_s3 + $0x438] ss:$12 sps:$4 sm:$0xff]   ;;  %v8056_v32 = vld [vmem:[%s11378_s3 + $0x408] ss:$12 sps:$4 sm:$0xff]   ;;  %v8059_v35 = vld [vmem:[%s11378_s3 + $0x390] ss:$12 sps:$4 sm:$0xff]  }
  0xd3   : > { %924 = vmatprep.mubr.bf16.mxu0 %v11388_v0  ;;  %1087 = vmatprep.mubr.bf16.mxu1 %v11388_v0  ;;  %v584_v46 = vsel %vm558_vm1, %v8437_v45, %v7696_v39  ;;  %v583_v3 = vsel %vm558_vm1, %v8438_v47, %v7695_v40  ;;  %v8062_v37 = vld [vmem:[%s11378_s3 + $0x378] ss:$12 sps:$4 sm:$0xff]   ;;  %v8065_v39 = vld [vmem:[%s11378_s3 + $0x3f0] ss:$12 sps:$4 sm:$0xff]   ;;  %v8067_v40 = vld [vmem:[%s11378_s3 + $0x3f4] ss:$12 sps:$4 sm:$0xff]  }
  0xd4   : > { %v610_v2 = vsel %vm585_vm2, %v583_v3, %v7700_v43  ;;  %v611_v50 = vsel %vm585_vm2, %v584_v46, %v7701_v1  ;;  %v9082_v10 = vshrl.u32 %v649_v36, 7  ;;  %v8070_v1 = vld [vmem:[%s11378_s3 + $0x364] ss:$12 sps:$4 sm:$0xff]   ;;  %v647_v43 = vld [vmem:[%s11377_s2] sm:$0xf] }
  0xd5   : > { %v624_v51 = vpack.c.bf16 %v611_v50, %v610_v2  ;;  %v8071_v46 = vld [vmem:[%s11378_s3 + $0x348] ss:$12 sps:$4 sm:$0xff]   ;;  %v8073_v47 = vld [vmem:[%s11378_s3 + $0x34c] ss:$12 sps:$4 sm:$0xff]  }
  0xd6   : > { %11483 = vst [vmem:[#allocation8_spill] sm:$0xff] %v9082_v10  ;;  %v11387_v44 = vsub.s32 0, %v9082_v10  ;;  %v11385_v45 = vsub.s32 2, %v9082_v10  ;;  %v8074_v3 = vld [vmem:[%s11378_s3 + $0x3d8] ss:$12 sps:$4 sm:$0xff]  }
  0xd7   : > { %v8079_v49 = vld [vmem:[%s11378_s3 + $0x334] ss:$12 sps:$4 sm:$0xff]  }
  0xd8   : > { %v9112_v2 = vrot.slane %v647_v43, %v11387_v44  ;;  %v9116_v50 = vrot.slane %v647_v43, %v11385_v45 }
  0xda   : > { %6475 = vmatmul.mubr.msk.bf16.gmra.mxu0 %vm779_vm3, %v618_v52  ;;  %6489 = vmatmul.mubr.msk.bf16.gmra.mxu1 %vm779_vm3, %v618_v52 }
  0xdb   : > { %934 = vmatprep.mubr.bf16.mxu0 %v11388_v0  ;;  %1097 = vmatprep.mubr.bf16.mxu1 %v11388_v0 }
  0xe2   : > { %6476 = vmatmul.mubr.msk.bf16.gmra.mxu0 %vm779_vm3, %v619_v61  ;;  %6490 = vmatmul.mubr.msk.bf16.gmra.mxu1 %vm779_vm3, %v619_v61 }
  0xe3   : > { %944 = vmatprep.mubr.bf16.mxu0 %v11388_v0  ;;  %1107 = vmatprep.mubr.bf16.mxu1 %v11388_v0 }
  0xea   : > { %6477 = vmatmul.mubr.msk.bf16.gmra.mxu0 %vm779_vm3, %v8870_v41  ;;  %6491 = vmatmul.mubr.msk.bf16.gmra.mxu1 %vm779_vm3, %v8870_v41  ;;  %v8013_v41 = vld [vmem:[%s11378_s3 + $0x304] ss:$12 sps:$4 sm:$0xff]  }
  0xeb   : > { %954 = vmatprep.mubr.bf16.mxu0 %v11388_v0  ;;  %1117 = vmatprep.mubr.bf16.mxu1 %v11388_v0 }
  0xec   : > { %2625 = vmatprep.subr.bf16.mxu0 %v8013_v41 }
  0xed   : > { %2626 = vmatpush1.bf16.msra.mxu0 %v8011_v16 }
  0xee   : > { %2627 = vmatprep.subr.bf16.mxu0 %v8019_v4 }
  0xf1   : > { %2628 = vmatpush1.bf16.msra.mxu0 %v8017_v63 }
  0xf2   : > { %6478 = vmatmul.mubr.msk.bf16.gmra.mxu0 %vm779_vm3, %v8884_v58  ;;  %6492 = vmatmul.mubr.msk.bf16.gmra.mxu1 %vm779_vm3, %v8884_v58  ;;  %v8014_v58 = vld [vmem:[%s11378_s3 + $0x480] ss:$12 sps:$4 sm:$0xff]  }
  0xf3   : > { %964 = vmatprep.mubr.bf16.mxu0 %v11388_v0  ;;  %1127 = vmatprep.mubr.bf16.mxu1 %v11388_v0 }
  0xf4   : > { %2745 = vmatpush1.bf16.msra.mxu1 %v8014_v58  ;;  %2629 = vmatprep.subr.bf16.mxu0 %v8022_v6 }
  0xf5   : > { %2630 = vmatpush1.bf16.msra.mxu0 %v8020_v5  ;;  %2746 = vmatprep.subr.bf16.mxu1 %v8025_v8  ;;  %v11386_v5 = vsub.s32 1, %v9082_v10 }
  0xf6   : > { %2631 = vmatprep.subr.bf16.mxu0 %v8028_v12 }
  0xf8   : > { %2747 = vmatpush1.bf16.msra.mxu1 %v8023_v7 }
  0xf9   : > { %2632 = vmatpush1.bf16.msra.mxu0 %v8026_v11  ;;  %2748 = vmatprep.subr.bf16.mxu1 %v8034_v18  ;;  %v9142_v18 = vrot.slane %v647_v43, %v11386_v5 }
  0xfa   : > { %6479 = vmatmul.mubr.msk.bf16.gmra.mxu0 %vm779_vm3, %v8900_v19  ;;  %6493 = vmatmul.mubr.msk.bf16.gmra.mxu1 %vm779_vm3, %v8900_v19  ;;  %v8035_v19 = vld [vmem:[%s11378_s3 + $0x288] ss:$12 sps:$4 sm:$0xff]  }
  0xfb   : > { %974 = vmatprep.mubr.bf16.mxu0 %v11388_v0  ;;  %1137 = vmatprep.mubr.bf16.mxu1 %v11388_v0 }
  0xfc   : > { %2633 = vmatprep.subr.bf16.mxu0 %v8031_v14  ;;  %2749 = vmatpush1.bf16.msra.mxu1 %v8032_v17 }
  0xfd   : > { %2634 = vmatpush1.bf16.msra.mxu0 %v8029_v13  ;;  %2750 = vmatprep.subr.bf16.mxu1 %v8043_v24 }
  0xfe   : > { %2635 = vmatprep.subr.bf16.mxu0 %v8037_v20 }
 0x100   : > { %2751 = vmatpush1.bf16.msra.mxu1 %v8041_v23 }
 0x101   : > { %2636 = vmatpush1.bf16.msra.mxu0 %v8035_v19  ;;  %2752 = vmatprep.subr.bf16.mxu1 %v8049_v9  ;;  %v663_v19 = vsub.s32 3, %v9082_v10 }
 0x102   : > { %6480 = vmatmul.mubr.msk.bf16.gmra.mxu0 %vm779_vm3, %v623_v38  ;;  %6494 = vmatmul.mubr.msk.bf16.gmra.mxu1 %vm779_vm3, %v623_v38  ;;  %v8064_v38 = vld [vmem:[%s11378_s3 + $0x37c] ss:$12 sps:$4 sm:$0xff]  }
 0x103   : > { %984 = vmatprep.mubr.bf16.mxu0 %v11388_v0  ;;  %1147 = vmatprep.mubr.bf16.mxu1 %v11388_v0 }
 0x104   : > { %2637 = vmatprep.subr.bf16.mxu0 %v8040_v22  ;;  %2753 = vmatpush1.bf16.msra.mxu1 %v8047_v27 }
 0x105   : > { %2638 = vmatpush1.bf16.msra.mxu0 %v8038_v21  ;;  %2754 = vmatprep.subr.bf16.mxu1 %v8058_v33 }
 0x106   : > { %2639 = vmatprep.subr.bf16.mxu0 %v8046_v26 }
 0x108   : > { %2755 = vmatpush1.bf16.msra.mxu1 %v8056_v32 }
 0x109   : > { %2640 = vmatpush1.bf16.msra.mxu0 %v8044_v25  ;;  %2756 = vmatprep.subr.bf16.mxu1 %v8067_v40 }
 0x10a   : > { %6481 = vmatmul.mubr.msk.bf16.gmra.mxu0 %vm779_vm3, %v624_v51  ;;  %6495 = vmatmul.mubr.msk.bf16.gmra.mxu1 %vm779_vm3, %v624_v51  ;;  %v8077_v51 = vld [vmem:[%s11378_s3 + $0x330] ss:$12 sps:$4 sm:$0xff]  }
 0x10b   : > { %2641 = vmatprep.subr.bf16.mxu0 %v8052_v29  ;;  %v9153_v29 = vrot.slane %v647_v43, %v663_v19  ;;  %v8083_v43 = vld [vmem:[%s11378_s3 + $0x318] ss:$12 sps:$4 sm:$0xff]  }
 0x10c   : > { %2757 = vmatpush1.bf16.msra.mxu1 %v8065_v39 }
 0x10d   : > { %2642 = vmatpush2.bf16.msra.mxu0 %v8050_v28  ;;  %2758 = vmatprep.subr.bf16.mxu1 %v8076_v48 }
 0x10e   : > { %2643 = vmatprep.subr.bf16.mxu0 %v8055_v31 }
 0x110   : > { %2759 = vmatpush1.bf16.msra.mxu1 %v8074_v3 }
 0x111   : > { %2644 = vmatpush2.bf16.msra.mxu0 %v8053_v30 }
 0x112   : > { %2645 = vmatprep.subr.bf16.mxu0 %v8061_v34 }
 0x115   : > { %2646 = vmatpush2.bf16.msra.mxu0 %v8059_v35 }
 0x116   : > { %2647 = vmatprep.subr.bf16.mxu0 %v8064_v38 }
 0x119   : > { %2648 = vmatpush2.bf16.msra.mxu0 %v8062_v37  ;;  %v8085_v37 = vld [vmem:[%s11378_s3 + $0x31c] ss:$12 sps:$4 sm:$0xff]  }
 0x11a   : > { %2649 = vmatprep.subr.bf16.mxu0 %v8070_v1 }
 0x11d   : > { %2650 = vmatpush2.bf16.msra.mxu0 %v8068_v42 }
 0x11e   : > { %2651 = vmatprep.subr.bf16.mxu0 %v8073_v47 }
 0x121   : > { %2652 = vmatpush2.bf16.msra.mxu0 %v8071_v46 }
 0x122   : > { %2653 = vmatprep.subr.bf16.mxu0 %v8079_v49 }
 0x125   : > { %2654 = vmatpush2.bf16.msra.mxu0 %v8077_v51 }
 0x126   : > { %2655 = vmatprep.subr.bf16.mxu0 %v8085_v37 }
 0x129   : > { %2656 = vmatpush2.bf16.msra.mxu0 %v8083_v43 }
 0x16a   : > { %v866_v52 = vpop.f32.mrf.mxu0  ;;  %v1029_v53 = vpop.f32.mrf.mxu1 }
 0x16b   : > { %v867_v56 = vadd.f32 %v866_v52, %v9112_v2  ;;  %v1030_v57 = vadd.f32 %v1029_v53, %v9116_v50 }
 0x16c   : > { %v9121_v54 = vpop.f32.mrf.mxu0  ;;  %v9123_v55 = vpop.f32.mrf.mxu1 }
 0x16d   : > { %v1158_v58 = vmax.f32 %v867_v56, 0.0  ;;  %v1160_v62 = vmax.f32 %v1030_v57, 0.0 }
 0x16e   : > { %v870_v59 = vpop.f32.mrf.mxu0  ;;  %v1033_v15 = vpop.f32.mrf.mxu1 }
 0x16f   : > { %v871_v60 = vadd.f32 %v870_v59, %v9112_v2  ;;  %v1034_v61 = vadd.f32 %v1033_v15, %v9116_v50  ;;  %v8080_v59 = vld [vmem:[%s11378_s3 + $0x498] ss:$12 sps:$4 sm:$0xff]   ;;  %v8082_v15 = vld [vmem:[%s11378_s3 + $0x49c] ss:$12 sps:$4 sm:$0xff]  }
 0x170   : > { %v9129_v16 = vpop.f32.mrf.mxu0  ;;  %v9131_v41 = vpop.f32.mrf.mxu1  ;;  %2774 = vmatprep.subr.bf16.mxu1 %v8082_v15 }
 0x171   : > { %v1162_v63 = vmax.f32 %v871_v60, 0.0  ;;  %v1164_v4 = vmax.f32 %v1034_v61, 0.0  ;;  %2775 = vmatpush2.bf16.msra.mxu1 %v8080_v59 }
 0x172   : > { %v876_v6 = vpop.f32.mrf.mxu0  ;;  %v1039_v7 = vpop.f32.mrf.mxu1  ;;  %2972 = vmatprep.subr.bf16.mxu1 %v11388_v0 }
 0x173   : > { %v9134_v8 = vmax.f32 %v1158_v58, %v1162_v63  ;;  %v9136_v11 = vmax.f32 %v1160_v62, %v1164_v4  ;;  %v877_v12 = vadd.f32 %v876_v6, %v9112_v2  ;;  %v1040_v13 = vadd.f32 %v1039_v7, %v9116_v50 }
 0x174   : > { %v878_v14 = vpop.f32.mrf.mxu0  ;;  %v1041_v17 = vpop.f32.mrf.mxu1 }
 0x175   : > { %11484 = vst [vmem:[#allocation9_spill] sm:$0xff] %v9134_v8  ;;  %11485 = vst [vmem:[#allocation10_spill] sm:$0xff] %v9136_v11  ;;  %v1166_v20 = vmax.f32 %v877_v12, 0.0  ;;  %v1168_v21 = vmax.f32 %v1040_v13, 0.0  ;;  %v9151_v27 = vadd.f32 %v878_v14, %v9142_v18  ;;  %v9170_v46 = vadd.f32 %v1041_v17, %v9153_v29 }
 0x176   : > { %v880_v22 = vpop.f32.mrf.mxu0  ;;  %v1043_v23 = vpop.f32.mrf.mxu1 }
 0x177   : > { %v1044_v24 = vadd.f32 %v1043_v23, %v9116_v50  ;;  %v9146_v25 = vmax.f32 %v1162_v63, %v1166_v20  ;;  %v9148_v26 = vmax.f32 %v1164_v4, %v1168_v21  ;;  %v881_v30 = vadd.f32 %v880_v22, %v9112_v2 }
 0x178   : > { %v882_v9 = vpop.f32.mrf.mxu0  ;;  %v1045_v28 = vpop.f32.mrf.mxu1  ;;  %v11391_v38 = vmax.f32 %v9151_v27, 0.0  ;;  %v11390_v17 = vmax.f32 %v9170_v46, 0.0 }
 0x179   : > { %11486 = vst [vmem:[#allocation11_spill] sm:$0xff] %v9146_v25  ;;  %11487 = vst [vmem:[#allocation12_spill] sm:$0xff] %v9148_v26  ;;  %v1172_v31 = vmax.f32 %v1044_v24, 0.0  ;;  %v883_v32 = vadd.f32 %v882_v9, %v9142_v18  ;;  %v1046_v40 = vadd.f32 %v1045_v28, %v9153_v29  ;;  %v1170_v49 = vmax.f32 %v881_v30, 0.0  ;;  %v8086_v9 = vld [vmem:[%s11378_s3 + $0x3c8] ss:$12 sps:$4 sm:$0xff]  }
 0x17a   : > { %v886_v33 = vpop.f32.mrf.mxu0  ;;  %v1049_v34 = vpop.f32.mrf.mxu1  ;;  %7099 = vmatprep.subr.bf16.mxu0 %v8086_v9 }
 0x17b   : > { %v9158_v35 = vadd.f32 %v886_v33, %v9112_v2  ;;  %v1050_v36 = vadd.f32 %v1049_v34, %v9116_v50  ;;  %v1171_v39 = vmax.f32 %v883_v32, 0.0  ;;  %v9177_v51 = vmax.f32 %v1168_v21, %v1172_v31 }
 0x17c   : > { %v888_v42 = vpop.f32.mrf.mxu0  ;;  %v1051_v1 = vpop.f32.mrf.mxu1  ;;  %v1173_v58 = vmax.f32 %v1046_v40, 0.0  ;;  %v9202_v19 = vmax.f32 %v1166_v20, %v1170_v49 }
 0x17d   : > { %v1174_v47 = vmax.f32 %v9158_v35, 0.0  ;;  %v889_v3 = vadd.f32 %v888_v42, %v9142_v18  ;;  %v9175_v48 = vadd.f32 %v1051_v1, %v9153_v29  ;;  %v9181_v52 = vmax.f32 %v11391_v38, %v1171_v39 }
 0x17e   : > { %v1176_v53 = vmax.f32 %v1050_v36, 0.0  ;;  %v890_v56 = vpop.f32.mrf.mxu0  ;;  %v1053_v57 = vpop.f32.mrf.mxu1  ;;  %v9221_v32 = vmax.f32 %v11390_v17, %v1173_v58 }
 0x17f   : > { %v1175_v60 = vmax.f32 %v889_v3, 0.0  ;;  %v1177_v61 = vmax.f32 %v9175_v48, 0.0  ;;  %v9192_v62 = vmax.f32 %v1170_v49, %v1174_v47  ;;  %v1054_v63 = vadd.f32 %v1053_v57, %v9116_v50 }
 0x180   : > { %v892_v4 = vpop.f32.mrf.mxu0  ;;  %v1055_v6 = vpop.f32.mrf.mxu1  ;;  %v7702_v7 = vpack.i.bf16 %v9177_v51, %v9181_v52  ;;  %v891_v13 = vadd.f32 %v890_v56, %v9112_v2  ;;  %v9204_v21 = vmax.f32 %v1172_v31, %v1176_v53 }
 0x181   : > { %v9197_v12 = vmax.f32 %v1171_v39, %v1175_v60  ;;  %v893_v14 = vadd.f32 %v892_v4, %v9142_v18  ;;  %v1180_v22 = vmax.f32 %v1054_v63, 0.0  ;;  %v9213_v28 = vmax.f32 %v1173_v58, %v1177_v61 }
 0x182   : > { %7703 = vrot.lane.b32.xlu0 %v7702_v7, %s8539_s26  ;;  %v896_v23 = vpop.f32.mrf.mxu0  ;;  %v1059_v24 = vpop.f32.mrf.mxu1  ;;  %v7707_v37 = vpack.i.bf16 %v9192_v62, %v9202_v19  ;;  %v1178_v39 = vmax.f32 %v891_v13, 0.0  ;;  %v1056_v42 = vadd.f32 %v1055_v6, %v9153_v29 }
 0x183   : > { %v1179_v20 = vmax.f32 %v893_v14, 0.0  ;;  %v9216_v30 = vadd.f32 %v896_v23, %v9112_v2  ;;  %v1060_v31 = vadd.f32 %v1059_v24, %v9116_v50  ;;  %v7712_v36 = vpack.i.bf16 %v9204_v21, %v9197_v12 }
 0x184   : > { %v898_v33 = vpop.f32.mrf.mxu0  ;;  %v1061_v34 = vpop.f32.mrf.mxu1  ;;  %v9231_v43 = vmax.f32 %v1176_v53, %v1180_v22  ;;  %v7717_v53 = vpack.i.bf16 %v9213_v28, %v9221_v32  ;;  %v1181_v14 = vmax.f32 %v1056_v42, 0.0  ;;  %v9251_v24 = vmax.f32 %v1174_v47, %v1178_v39 }
 0x185   : > { %v9227_v40 = vmax.f32 %v1175_v60, %v1179_v20  ;;  %v1182_v1 = vmax.f32 %v9216_v30, 0.0  ;;  %v1184_v3 = vmax.f32 %v1060_v31, 0.0  ;;  %v899_v49 = vadd.f32 %v898_v33, %v9142_v18  ;;  %7713 = vrot.lane.b32.xlu1 %v7712_v36, %s8539_s26 }
 0x186   : > { %v9235_v56 = vadd.f32 %v1061_v34, %v9153_v29  ;;  %7708 = vrot.lane.b32.xlu0 %v7707_v37, %s8539_s26  ;;  %v900_v57 = vpop.f32.mrf.mxu0  ;;  %v1063_v59 = vpop.f32.mrf.mxu1 }
 0x187   : > { %v901_v15 = vadd.f32 %v900_v57, %v9112_v2  ;;  %v1064_v60 = vadd.f32 %v1063_v59, %v9116_v50  ;;  %v9243_v58 = vmax.f32 %v1178_v39, %v1182_v1  ;;  %v1183_v63 = vmax.f32 %v899_v49, 0.0 }
 0x188   : > { %v1185_v4 = vmax.f32 %v9235_v56, 0.0  ;;  %v902_v6 = vpop.f32.mrf.mxu0  ;;  %v1065_v7 = vpop.f32.mrf.mxu1  ;;  %v7722_v13 = vpack.i.bf16 %v9231_v43, %v9227_v40  ;;  %v9253_v9 = vmax.f32 %v1180_v22, %v1184_v3 }
 0x189   : > { %v903_v23 = vadd.f32 %v902_v6, %v9142_v18  ;;  %v9255_v30 = vmax.f32 %v1179_v20, %v1183_v63  ;;  %v1188_v31 = vmax.f32 %v1064_v60, 0.0  ;;  %7718 = vrot.lane.b32.xlu1 %v7717_v53, %s8539_s26  ;;  %v1186_v37 = vmax.f32 %v901_v15, 0.0 }
 0x18a   : > { %7723 = vrot.lane.b32.xlu0 %v7722_v13, %s8539_s26  ;;  %v906_v33 = vpop.f32.mrf.mxu0  ;;  %v1069_v34 = vpop.f32.mrf.mxu1  ;;  %v9261_v36 = vmax.f32 %v1181_v14, %v1185_v4  ;;  %v7727_v49 = vpack.i.bf16 %v9243_v58, %v9251_v24  ;;  %v1066_v59 = vadd.f32 %v1065_v7, %v9153_v29  ;;  %v9280_v53 = vmax.f32 %v1177_v61, %v1181_v14 }
 0x18b   : > { %v1187_v42 = vmax.f32 %v903_v23, 0.0  ;;  %v9264_v35 = vadd.f32 %v906_v33, %v9112_v2  ;;  %v1070_v47 = vadd.f32 %v1069_v34, %v9116_v50  ;;  %v7732_v39 = vpack.i.bf16 %v9253_v9, %v9255_v30 }
 0x18c   : > { %v908_v22 = vpop.f32.mrf.mxu0  ;;  %v1071_v20 = vpop.f32.mrf.mxu1  ;;  %v9282_v6 = vmax.f32 %v1184_v3, %v1188_v31  ;;  %v7737_v3 = vpack.i.bf16 %v9261_v36, %v9280_v53 }
 0x18d   : > { %v9271_v57 = vmax.f32 %v1183_v63, %v1187_v42  ;;  %v909_v15 = vadd.f32 %v908_v22, %v9142_v18  ;;  %v9276_v60 = vadd.f32 %v1071_v20, %v9153_v29  ;;  %v1190_v13 = vmax.f32 %v9264_v35, 0.0  ;;  %7733 = vrot.lane.b32.xlu1 %v7732_v39, %s8539_s26 }
 0x18e   : > { %11488 = vst [vmem:[#allocation13_spill] sm:$0xff] %v9282_v6  ;;  %v1192_v23 = vmax.f32 %v1070_v47, 0.0  ;;  %7728 = vrot.lane.b32.xlu0 %v7727_v49, %s8539_s26  ;;  %v910_v63 = vpop.f32.mrf.mxu0  ;;  %v1073_v7 = vpop.f32.mrf.mxu1  ;;  %v9295_v47 = vmax.f32 %v1182_v1, %v1186_v37  ;;  %v1189_v20 = vmax.f32 %v1066_v59, 0.0 }
 0x18f   : > { %v1191_v33 = vmax.f32 %v909_v15, 0.0  ;;  %v1074_v34 = vadd.f32 %v1073_v7, %v9116_v50  ;;  %v9288_v22 = vmax.f32 %v1186_v37, %v1190_v13  ;;  %v1193_v48 = vmax.f32 %v9276_v60, 0.0 }
 0x190   : > { %v912_v61 = vpop.f32.mrf.mxu0  ;;  %v1075_v14 = vpop.f32.mrf.mxu1  ;;  %v7742_v35 = vpack.i.bf16 %v9282_v6, %v9271_v57  ;;  %v9299_v49 = vmax.f32 %v1188_v31, %v1192_v23  ;;  %v911_v15 = vadd.f32 %v910_v63, %v9112_v2 }
 0x191   : > { %v9297_v39 = vmax.f32 %v1187_v42, %v1191_v33  ;;  %v1196_v7 = vmax.f32 %v1074_v34, 0.0  ;;  %v913_v60 = vadd.f32 %v912_v61, %v9142_v18  ;;  %7738 = vrot.lane.b32.xlu1 %v7737_v3, %s8539_s26  ;;  %v1076_v44 = vadd.f32 %v1075_v14, %v9153_v29 }
 0x192   : > { %11489 = vst [vmem:[#allocation14_spill] sm:$0xff] %v9299_v49  ;;  %7743 = vrot.lane.b32.xlu0 %v7742_v35, %s8539_s26  ;;  %v916_v45 = vpop.f32.mrf.mxu0  ;;  %v1079_v5 = vpop.f32.mrf.mxu1  ;;  %v9310_v31 = vmax.f32 %v1189_v20, %v1193_v48  ;;  %v7747_v61 = vpack.i.bf16 %v9288_v22, %v9295_v47  ;;  %v9318_v3 = vmax.f32 %v1185_v4, %v1189_v20  ;;  %v1194_v35 = vmax.f32 %v911_v15, 0.0 }
 0x193   : > { %v9307_v1 = vadd.f32 %v916_v45, %v9112_v2  ;;  %v1080_v37 = vadd.f32 %v1079_v5, %v9116_v50  ;;  %v1195_v42 = vmax.f32 %v913_v60, 0.0  ;;  %v7752_v34 = vpack.i.bf16 %v9299_v49, %v9297_v39 }
 0x194   : > { %v918_v59 = vpop.f32.mrf.mxu0  ;;  %v1081_v63 = vpop.f32.mrf.mxu1  ;;  %11490 = vst [vmem:[#allocation15_spill] sm:$0xff] %v9318_v3  ;;  %v9325_v60 = vmax.f32 %v1192_v23, %v1196_v7  ;;  %v1197_v20 = vmax.f32 %v1076_v44, 0.0 }
 0x195   : > { %v1198_v45 = vmax.f32 %v9307_v1, 0.0  ;;  %v919_v14 = vadd.f32 %v918_v59, %v9142_v18  ;;  %v9323_v5 = vadd.f32 %v1081_v63, %v9153_v29  ;;  %v9327_v0 = vmax.f32 %v1191_v33, %v1195_v42  ;;  %7753 = vrot.lane.b32.xlu1 %v7752_v34, %s8539_s26 }
 0x196   : > { %11491 = vst [vmem:[#allocation16_spill] sm:$0xff] %v9325_v60  ;;  %v1200_v17 = vmax.f32 %v1080_v37, 0.0  ;;  %7748 = vrot.lane.b32.xlu0 %v7747_v61, %s8539_s26  ;;  %v920_v56 = vpop.f32.mrf.mxu0  ;;  %v1083_v4 = vpop.f32.mrf.mxu1  ;;  %v7757_v33 = vpack.i.bf16 %v9310_v31, %v9318_v3 }
 0x197   : > { %11492 = vst [vmem:[#allocation17_spill] sm:$0xff] %v9327_v0  ;;  %v1199_v38 = vmax.f32 %v919_v14, 0.0  ;;  %v9332_v59 = vmax.f32 %v1194_v35, %v1198_v45  ;;  %v1084_v63 = vadd.f32 %v1083_v4, %v9116_v50  ;;  %v7762_v37 = vpack.i.bf16 %v9325_v60, %v9327_v0 }
 0x198   : > { %v922_v15 = vpop.f32.mrf.mxu0  ;;  %v1085_v23 = vpop.f32.mrf.mxu1  ;;  %v921_v61 = vadd.f32 %v920_v56, %v9112_v2  ;;  %v9343_v14 = vmax.f32 %v1190_v13, %v1194_v35  ;;  %v9345_v1 = vmax.f32 %v1196_v7, %v1200_v17  ;;  %v11497_v3 = vmax.f32 %v9323_v5, 0.0 }
 0x199   : > { %11493 = vst [vmem:[#allocation18_spill] sm:$0xff] %v9332_v59  ;;  %v9339_v34 = vmax.f32 %v1195_v42, %v1199_v38  ;;  %v923_v44 = vadd.f32 %v922_v15, %v9142_v18  ;;  %v1204_v10 = vmax.f32 %v1084_v63, 0.0  ;;  %7758 = vrot.lane.b32.xlu1 %v7757_v33, %s8539_s26  ;;  %v9357_v35 = vmax.f32 %v1193_v48, %v1197_v20 }
 0x19a   : > { %11495 = vst [vmem:[#allocation20_spill] sm:$0xff] %v9343_v14  ;;  %11496 = vst [vmem:[#allocation21_spill] sm:$0xff] %v9345_v1  ;;  %7763 = vrot.lane.b32.xlu0 %v7762_v37, %s8539_s26  ;;  %v926_v4 = vpop.f32.mrf.mxu0  ;;  %v1089_v49 = vpop.f32.mrf.mxu1  ;;  %v9351_v60 = vmax.f32 %v1197_v20, %v11497_v3  ;;  %v7767_v33 = vpack.i.bf16 %v9332_v59, %v9343_v14  ;;  %v1202_v37 = vmax.f32 %v921_v61, 0.0 }
 0x19b   : > { %11494 = vst [vmem:[#allocation19_spill] sm:$0xff] %v9339_v34  ;;  %v1203_v42 = vmax.f32 %v923_v44, 0.0  ;;  %v9354_v56 = vadd.f32 %v926_v4, %v9112_v2  ;;  %v1090_v13 = vadd.f32 %v1089_v49, %v9116_v50  ;;  %11499 = vst [vmem:[#allocation23_spill] sm:$0xff] %v9357_v35  ;;  %v7772_v15 = vpack.i.bf16 %v9345_v1, %v9339_v34 }
 0x19c   : > { %11498 = vst [vmem:[#allocation22_spill] sm:$0xff] %v9351_v60  ;;  %v928_v7 = vpop.f32.mrf.mxu0  ;;  %v1091_v63 = vpop.f32.mrf.mxu1  ;;  %v1086_v3 = vadd.f32 %v1085_v23, %v9153_v29  ;;  %v9367_v4 = vmax.f32 %v1200_v17, %v1204_v10  ;;  %v7777_v17 = vpack.i.bf16 %v9351_v60, %v9357_v35  ;;  %v9385_v34 = vmax.f32 %v1198_v45, %v1202_v37 }
 0x19d   : > { %v9363_v0 = vmax.f32 %v1199_v38, %v1203_v42  ;;  %v1206_v44 = vmax.f32 %v9354_v56, 0.0  ;;  %v1208_v49 = vmax.f32 %v1090_v13, 0.0  ;;  %v929_v48 = vadd.f32 %v928_v7, %v9142_v18  ;;  %7773 = vrot.lane.b32.xlu1 %v7772_v15, %s8539_s26 }
 0x19e   : > { %11501 = vst [vmem:[#allocation25_spill] sm:$0xff] %v9367_v4  ;;  %v9371_v20 = vadd.f32 %v1091_v63, %v9153_v29  ;;  %7768 = vrot.lane.b32.xlu0 %v7767_v33, %s8539_s26  ;;  %v930_v1 = vpop.f32.mrf.mxu0  ;;  %v1093_v61 = vpop.f32.mrf.mxu1  ;;  %v1205_v33 = vmax.f32 %v1086_v3, 0.0  ;;  %11503 = vst [vmem:[#allocation27_spill] sm:$0xff] %v9385_v34 }
 0x19f   : > { %11500 = vst [vmem:[#allocation24_spill] sm:$0xff] %v9363_v0  ;;  %v931_v38 = vadd.f32 %v930_v1, %v9112_v2  ;;  %v1094_v23 = vadd.f32 %v1093_v61, %v9116_v50  ;;  %v9379_v56 = vmax.f32 %v1202_v37, %v1206_v44  ;;  %v1207_v13 = vmax.f32 %v929_v48, 0.0 }
 0x1a0   : > { %v932_v63 = vpop.f32.mrf.mxu0  ;;  %v1095_v14 = vpop.f32.mrf.mxu1  ;;  %v7782_v15 = vpack.i.bf16 %v9367_v4, %v9363_v0  ;;  %v9387_v1 = vmax.f32 %v1204_v10, %v1208_v49  ;;  %v11506_v60 = vmax.f32 %v9371_v20, 0.0 }
 0x1a1   : > { %11502 = vst [vmem:[#allocation26_spill] sm:$0xff] %v9379_v56  ;;  %v933_v59 = vadd.f32 %v932_v63, %v9142_v18  ;;  %v9389_v61 = vmax.f32 %v1203_v42, %v1207_v13  ;;  %v1212_v35 = vmax.f32 %v1094_v23, 0.0  ;;  %7778 = vrot.lane.b32.xlu1 %v7777_v17, %s8539_s26  ;;  %v1210_v3 = vmax.f32 %v931_v38, 0.0 }
 0x1a2   : > { %11504 = vst [vmem:[#allocation28_spill] sm:$0xff] %v9387_v1  ;;  %7783 = vrot.lane.b32.xlu0 %v7782_v15, %s8539_s26  ;;  %v936_v48 = vpop.f32.mrf.mxu0  ;;  %v1099_v7 = vpop.f32.mrf.mxu1  ;;  %v9395_v6 = vmax.f32 %v1205_v33, %v11506_v60  ;;  %v7787_v17 = vpack.i.bf16 %v9379_v56, %v9385_v34  ;;  %v1096_v60 = vadd.f32 %v1095_v14, %v9153_v29  ;;  %v11509_v15 = vmax.f32 %v9323_v5, 0.0 }
 0x1a3   : > { %11505 = vst [vmem:[#allocation29_spill] sm:$0xff] %v9389_v61  ;;  %v1211_v4 = vmax.f32 %v933_v59, 0.0  ;;  %v9398_v45 = vadd.f32 %v936_v48, %v9112_v2  ;;  %v1100_v10 = vadd.f32 %v1099_v7, %v9116_v50  ;;  %v7792_v23 = vpack.i.bf16 %v9387_v1, %v9389_v61 }
 0x1a4   : > { %11507 = vst [vmem:[#allocation30_spill] sm:$0xff] %v9395_v6  ;;  %v938_v42 = vpop.f32.mrf.mxu0  ;;  %v1101_v37 = vpop.f32.mrf.mxu1  ;;  %v9414_v7 = vmax.f32 %v11509_v15, %v1205_v33  ;;  %v9416_v48 = vmax.f32 %v1208_v49, %v1212_v35 }
 0x1a5   : > { %v9405_v63 = vmax.f32 %v1207_v13, %v1211_v4  ;;  %v939_v38 = vadd.f32 %v938_v42, %v9142_v18  ;;  %v9410_v59 = vadd.f32 %v1101_v37, %v9153_v29  ;;  %v1214_v1 = vmax.f32 %v9398_v45, 0.0  ;;  %7793 = vrot.lane.b32.xlu1 %v7792_v23, %s8539_s26 }
 0x1a6   : > { %11510 = vst [vmem:[#allocation32_spill] sm:$0xff] %v9414_v7  ;;  %11511 = vst [vmem:[#allocation33_spill] sm:$0xff] %v9416_v48  ;;  %v1216_v61 = vmax.f32 %v1100_v10, 0.0  ;;  %7788 = vrot.lane.b32.xlu0 %v7787_v17, %s8539_s26  ;;  %v940_v13 = vpop.f32.mrf.mxu0  ;;  %v1103_v14 = vpop.f32.mrf.mxu1  ;;  %v7797_v49 = vpack.i.bf16 %v9395_v6, %v9414_v7  ;;  %v9429_v10 = vmax.f32 %v1206_v44, %v1210_v3  ;;  %v1213_v23 = vmax.f32 %v1096_v60, 0.0 }
 0x1a7   : > { %11508 = vst [vmem:[#allocation31_spill] sm:$0xff] %v9405_v63  ;;  %v1215_v34 = vmax.f32 %v939_v38, 0.0  ;;  %v1104_v42 = vadd.f32 %v1103_v14, %v9116_v50  ;;  %v9422_v37 = vmax.f32 %v1210_v3, %v1214_v1  ;;  %v1217_v5 = vmax.f32 %v9410_v59, 0.0 }
 0x1a8   : > { %v942_v33 = vpop.f32.mrf.mxu0  ;;  %v1105_v15 = vpop.f32.mrf.mxu1  ;;  %v7802_v45 = vpack.i.bf16 %v9416_v48, %v9405_v63  ;;  %11513 = vst [vmem:[#allocation35_spill] sm:$0xff] %v9429_v10  ;;  %v9433_v38 = vmax.f32 %v1212_v35, %v1216_v61  ;;  %v941_v14 = vadd.f32 %v940_v13, %v9112_v2 }
 0x1a9   : > { %11512 = vst [vmem:[#allocation34_spill] sm:$0xff] %v9422_v37  ;;  %v9431_v17 = vmax.f32 %v1211_v4, %v1215_v34  ;;  %v1220_v56 = vmax.f32 %v1104_v42, 0.0  ;;  %v943_v59 = vadd.f32 %v942_v33, %v9142_v18  ;;  %7798 = vrot.lane.b32.xlu1 %v7797_v49, %s8539_s26  ;;  %v1106_v48 = vadd.f32 %v1105_v15, %v9153_v29 }
 0x1aa   : > { %11515 = vst [vmem:[#allocation37_spill] sm:$0xff] %v9433_v38  ;;  %7803 = vrot.lane.b32.xlu0 %v7802_v45, %s8539_s26  ;;  %v946_v7 = vpop.f32.mrf.mxu0  ;;  %v1109_v6 = vpop.f32.mrf.mxu1  ;;  %v9444_v35 = vmax.f32 %v1213_v23, %v1217_v5  ;;  %v7807_v33 = vpack.i.bf16 %v9422_v37, %v9429_v10  ;;  %v11517_v49 = vmax.f32 %v9371_v20, 0.0 }
 0x1ab   : > { %11514 = vst [vmem:[#allocation36_spill] sm:$0xff] %v9431_v17  ;;  %v9441_v44 = vadd.f32 %v946_v7, %v9112_v2  ;;  %v1110_v4 = vadd.f32 %v1109_v6, %v9116_v50  ;;  %v1219_v3 = vmax.f32 %v943_v59, 0.0  ;;  %v7812_v42 = vpack.i.bf16 %v9433_v38, %v9431_v17 }
 0x1ac   : > { %11516 = vst [vmem:[#allocation38_spill] sm:$0xff] %v9444_v35  ;;  %v948_v60 = vpop.f32.mrf.mxu0  ;;  %v1111_v13 = vpop.f32.mrf.mxu1  ;;  %v9452_v45 = vmax.f32 %v11517_v49, %v1213_v23  ;;  %v1218_v59 = vmax.f32 %v941_v14, 0.0  ;;  %v9459_v63 = vmax.f32 %v1216_v61, %v1220_v56  ;;  %v1221_v49 = vmax.f32 %v1106_v48, 0.0 }
 0x1ad   : > { %v1222_v7 = vmax.f32 %v9441_v44, 0.0  ;;  %v949_v15 = vadd.f32 %v948_v60, %v9142_v18  ;;  %v9457_v6 = vadd.f32 %v1111_v13, %v9153_v29  ;;  %v9461_v0 = vmax.f32 %v1215_v34, %v1219_v3  ;;  %7813 = vrot.lane.b32.xlu1 %v7812_v42, %s8539_s26 }
 0x1ae   : > { %11518 = vst [vmem:[#allocation39_spill] sm:$0xff] %v9452_v45  ;;  %11519 = vst [vmem:[#allocation40_spill] sm:$0xff] %v9459_v63  ;;  %v1224_v38 = vmax.f32 %v1110_v4, 0.0  ;;  %7808 = vrot.lane.b32.xlu0 %v7807_v33, %s8539_s26  ;;  %v950_v20 = vpop.f32.mrf.mxu0  ;;  %v1113_v23 = vpop.f32.mrf.mxu1  ;;  %v7817_v34 = vpack.i.bf16 %v9444_v35, %v9452_v45 }
 0x1af   : > { %11520 = vst [vmem:[#allocation41_spill] sm:$0xff] %v9461_v0  ;;  %v1223_v10 = vmax.f32 %v949_v15, 0.0  ;;  %v9466_v60 = vmax.f32 %v1218_v59, %v1222_v7  ;;  %v1114_v13 = vadd.f32 %v1113_v23, %v9116_v50  ;;  %v7822_v4 = vpack.i.bf16 %v9459_v63, %v9461_v0 }
 0x1b0   : > { %v952_v14 = vpop.f32.mrf.mxu0  ;;  %v1115_v61 = vpop.f32.mrf.mxu1  ;;  %v951_v33 = vadd.f32 %v950_v20, %v9112_v2  ;;  %v9477_v15 = vmax.f32 %v1214_v1, %v1218_v59  ;;  %v9479_v44 = vmax.f32 %v1220_v56, %v1224_v38  ;;  %v11525_v35 = vmax.f32 %v9457_v6, 0.0 }
 0x1b1   : > { %11521 = vst [vmem:[#allocation42_spill] sm:$0xff] %v9466_v60  ;;  %v9473_v42 = vmax.f32 %v1219_v3, %v1223_v10  ;;  %v953_v48 = vadd.f32 %v952_v14, %v9142_v18  ;;  %v1228_v37 = vmax.f32 %v1114_v13, 0.0  ;;  %7818 = vrot.lane.b32.xlu1 %v7817_v34, %s8539_s26  ;;  %v9491_v59 = vmax.f32 %v1217_v5, %v1221_v49 }
 0x1b2   : > { %11523 = vst [vmem:[#allocation44_spill] sm:$0xff] %v9477_v15  ;;  %11524 = vst [vmem:[#allocation45_spill] sm:$0xff] %v9479_v44  ;;  %7823 = vrot.lane.b32.xlu0 %v7822_v4, %s8539_s26  ;;  %v956_v23 = vpop.f32.mrf.mxu0  ;;  %v1119_v45 = vpop.f32.mrf.mxu1  ;;  %v9485_v63 = vmax.f32 %v1221_v49, %v11525_v35  ;;  %v7827_v34 = vpack.i.bf16 %v9466_v60, %v9477_v15  ;;  %v1226_v4 = vmax.f32 %v951_v33, 0.0 }
 0x1b3   : > { %11522 = vst [vmem:[#allocation43_spill] sm:$0xff] %v9473_v42  ;;  %v1227_v3 = vmax.f32 %v953_v48, 0.0  ;;  %v9488_v20 = vadd.f32 %v956_v23, %v9112_v2  ;;  %v1120_v1 = vadd.f32 %v1119_v45, %v9116_v50  ;;  %11527 = vst [vmem:[#allocation47_spill] sm:$0xff] %v9491_v59  ;;  %v7832_v14 = vpack.i.bf16 %v9479_v44, %v9473_v42 }
 0x1b4   : > { %11526 = vst [vmem:[#allocation46_spill] sm:$0xff] %v9485_v63  ;;  %v958_v56 = vpop.f32.mrf.mxu0  ;;  %v1121_v13 = vpop.f32.mrf.mxu1  ;;  %v1116_v35 = vadd.f32 %v1115_v61, %v9153_v29  ;;  %v9501_v23 = vmax.f32 %v1224_v38, %v1228_v37  ;;  %v7837_v61 = vpack.i.bf16 %v9485_v63, %v9491_v59 }
 0x1b5   : > { %v9497_v0 = vmax.f32 %v1223_v10, %v1227_v3  ;;  %v1230_v48 = vmax.f32 %v9488_v20, 0.0  ;;  %v1232_v45 = vmax.f32 %v1120_v1, 0.0  ;;  %v959_v5 = vadd.f32 %v958_v56, %v9142_v18  ;;  %7833 = vrot.lane.b32.xlu1 %v7832_v14, %s8539_s26 }
 0x1b6   : > { %11529 = vst [vmem:[#allocation49_spill] sm:$0xff] %v9501_v23  ;;  %v9505_v49 = vadd.f32 %v1121_v13, %v9153_v29  ;;  %7828 = vrot.lane.b32.xlu0 %v7827_v34, %s8539_s26  ;;  %v960_v44 = vpop.f32.mrf.mxu0  ;;  %v1123_v33 = vpop.f32.mrf.mxu1  ;;  %v9517_v14 = vmax.f32 %v1222_v7, %v1226_v4  ;;  %v1229_v34 = vmax.f32 %v1116_v35, 0.0 }
 0x1b7   : > { %11528 = vst [vmem:[#allocation48_spill] sm:$0xff] %v9497_v0  ;;  %v1124_v10 = vadd.f32 %v1123_v33, %v9116_v50  ;;  %v9512_v20 = vmax.f32 %v1226_v4, %v1230_v48  ;;  %v1231_v38 = vmax.f32 %v959_v5, 0.0  ;;  %v7842_v13 = vpack.i.bf16 %v9501_v23, %v9497_v0 }
 0x1b8   : > { %v1233_v1 = vmax.f32 %v9505_v49, 0.0  ;;  %v962_v56 = vpop.f32.mrf.mxu0  ;;  %v1125_v15 = vpop.f32.mrf.mxu1  ;;  %11531 = vst [vmem:[#allocation51_spill] sm:$0xff] %v9517_v14  ;;  %v9520_v42 = vmax.f32 %v1228_v37, %v1232_v45  ;;  %v961_v59 = vadd.f32 %v960_v44, %v9112_v2 }
 0x1b9   : > { %11530 = vst [vmem:[#allocation50_spill] sm:$0xff] %v9512_v20  ;;  %v963_v60 = vadd.f32 %v962_v56, %v9142_v18  ;;  %v9522_v33 = vmax.f32 %v1227_v3, %v1231_v38  ;;  %v1236_v63 = vmax.f32 %v1124_v10, 0.0  ;;  %7838 = vrot.lane.b32.xlu1 %v7837_v61, %s8539_s26  ;;  %v1126_v4 = vadd.f32 %v1125_v15, %v9153_v29 }
 0x1ba   : > { %11532 = vst [vmem:[#allocation52_spill] sm:$0xff] %v9520_v42  ;;  %7843 = vrot.lane.b32.xlu0 %v7842_v13, %s8539_s26  ;;  %v966_v5 = vpop.f32.mrf.mxu0  ;;  %v1129_v49 = vpop.f32.mrf.mxu1  ;;  %v9527_v17 = vmax.f32 %v1229_v34, %v1233_v1  ;;  %v7847_v10 = vpack.i.bf16 %v9512_v20, %v9517_v14  ;;  %v11535_v61 = vmax.f32 %v9457_v6, 0.0 }
 0x1bb   : > { %11533 = vst [vmem:[#allocation53_spill] sm:$0xff] %v9522_v33  ;;  %v1235_v7 = vmax.f32 %v963_v60, 0.0  ;;  %v9531_v35 = vadd.f32 %v966_v5, %v9112_v2  ;;  %v1130_v37 = vadd.f32 %v1129_v49, %v9116_v50  ;;  %v7852_v44 = vpack.i.bf16 %v9520_v42, %v9522_v33 }
 0x1bc   : > { %11534 = vst [vmem:[#allocation54_spill] sm:$0xff] %v9527_v17  ;;  %v968_v3 = vpop.f32.mrf.mxu0  ;;  %v1131_v56 = vpop.f32.mrf.mxu1  ;;  %v9540_v13 = vmax.f32 %v11535_v61, %v1229_v34  ;;  %v1234_v49 = vmax.f32 %v961_v59, 0.0  ;;  %v9548_v23 = vmax.f32 %v1232_v45, %v1236_v63  ;;  %v1237_v14 = vmax.f32 %v1126_v4, 0.0 }
 0x1bd   : > { %v9542_v60 = vmax.f32 %v1231_v38, %v1235_v7  ;;  %v969_v15 = vadd.f32 %v968_v3, %v9142_v18  ;;  %v9546_v5 = vadd.f32 %v1131_v56, %v9153_v29  ;;  %v1238_v0 = vmax.f32 %v9531_v35, 0.0  ;;  %7853 = vrot.lane.b32.xlu1 %v7852_v44, %s8539_s26 }
 0x1be   : > { %11536 = vst [vmem:[#allocation55_spill] sm:$0xff] %v9540_v13  ;;  %11538 = vst [vmem:[#allocation57_spill] sm:$0xff] %v9548_v23  ;;  %v1240_v42 = vmax.f32 %v1130_v37, 0.0  ;;  %7848 = vrot.lane.b32.xlu0 %v7847_v10, %s8539_s26  ;;  %v970_v6 = vpop.f32.mrf.mxu0  ;;  %v1133_v34 = vpop.f32.mrf.mxu1  ;;  %v7857_v35 = vpack.i.bf16 %v9527_v17, %v9540_v13 }
 0x1bf   : > { %11537 = vst [vmem:[#allocation56_spill] sm:$0xff] %v9542_v60  ;;  %v1239_v61 = vmax.f32 %v969_v15, 0.0  ;;  %v1134_v3 = vadd.f32 %v1133_v34, %v9116_v50  ;;  %v9555_v56 = vmax.f32 %v1234_v49, %v1238_v0  ;;  %v7862_v37 = vpack.i.bf16 %v9548_v23, %v9542_v60 }
 0x1c0   : > { %v972_v59 = vpop.f32.mrf.mxu0  ;;  %v1135_v45 = vpop.f32.mrf.mxu1  ;;  %v971_v10 = vadd.f32 %v970_v6, %v9112_v2  ;;  %v9564_v15 = vmax.f32 %v1230_v48, %v1234_v49  ;;  %v9566_v38 = vmax.f32 %v1236_v63, %v1240_v42  ;;  %v11541_v17 = vmax.f32 %v9546_v5, 0.0 }
 0x1c1   : > { %v9561_v44 = vmax.f32 %v1235_v7, %v1239_v61  ;;  %v1244_v34 = vmax.f32 %v1134_v3, 0.0  ;;  %v973_v4 = vadd.f32 %v972_v59, %v9142_v18  ;;  %7858 = vrot.lane.b32.xlu1 %v7857_v35, %s8539_s26  ;;  %v9579_v63 = vmax.f32 %v1233_v1, %v1237_v14 }
 0x1c2   : > { %11539 = vst [vmem:[#allocation58_spill] sm:$0xff] %v9564_v15  ;;  %11540 = vst [vmem:[#allocation59_spill] sm:$0xff] %v9566_v38  ;;  %7863 = vrot.lane.b32.xlu0 %v7862_v37, %s8539_s26  ;;  %v976_v20 = vpop.f32.mrf.mxu0  ;;  %v1139_v13 = vpop.f32.mrf.mxu1  ;;  %v9573_v23 = vmax.f32 %v1237_v14, %v11541_v17  ;;  %v7867_v35 = vpack.i.bf16 %v9555_v56, %v9564_v15  ;;  %v1242_v37 = vmax.f32 %v971_v10, 0.0 }
 0x1c3   : > { %v9576_v7 = vadd.f32 %v976_v20, %v9112_v2  ;;  %v1140_v48 = vadd.f32 %v1139_v13, %v9116_v50  ;;  %11542 = vst [vmem:[#allocation60_spill] sm:$0xff] %v9579_v63  ;;  %v1243_v49 = vmax.f32 %v973_v4, 0.0  ;;  %v7872_v59 = vpack.i.bf16 %v9566_v38, %v9561_v44 }
 0x1c4   : > { %v978_v6 = vpop.f32.mrf.mxu0  ;;  %v1141_v3 = vpop.f32.mrf.mxu1  ;;  %v9588_v33 = vmax.f32 %v1240_v42, %v1244_v34  ;;  %v1136_v14 = vadd.f32 %v1135_v45, %v9153_v29 }
 0x1c5   : > { %v1246_v17 = vmax.f32 %v9576_v7, 0.0  ;;  %v979_v60 = vadd.f32 %v978_v6, %v9142_v18  ;;  %v1142_v20 = vadd.f32 %v1141_v3, %v9153_v29  ;;  %v9590_v1 = vmax.f32 %v1239_v61, %v1243_v49  ;;  %7873 = vrot.lane.b32.xlu1 %v7872_v59, %s8539_s26 }
 0x1c6   : > { %11543 = vst [vmem:[#allocation61_spill] sm:$0xff] %v9588_v33  ;;  %v1248_v13 = vmax.f32 %v1140_v48, 0.0  ;;  %7868 = vrot.lane.b32.xlu0 %v7867_v35, %s8539_s26  ;;  %v980_v4 = vpop.f32.mrf.mxu0  ;;  %v1143_v38 = vpop.f32.mrf.mxu1  ;;  %v7877_v7 = vpack.i.bf16 %v9573_v23, %v9579_v63  ;;  %v1245_v15 = vmax.f32 %v1136_v14, 0.0 }
 0x1c7   : > { %11544 = vst [vmem:[#allocation62_spill] sm:$0xff] %v9590_v1  ;;  %v1247_v10 = vmax.f32 %v979_v60, 0.0  ;;  %v9597_v6 = vmax.f32 %v1242_v37, %v1246_v17  ;;  %v1249_v3 = vmax.f32 %v1142_v20, 0.0  ;;  %v9600_v42 = vadd.f32 %v1143_v38, %v9116_v50 }
 0x1c8   : > { %v982_v61 = vpop.f32.mrf.mxu0  ;;  %v7882_v45 = vpack.i.bf16 %v9588_v33, %v9590_v1  ;;  %v1145_v35 = vpop.f32.mrf.mxu1  ;;  %v9609_v60 = vmax.f32 %v1238_v0, %v1242_v37  ;;  %v9611_v63 = vmax.f32 %v1244_v34, %v1248_v13  ;;  %v9619_v33 = vadd.f32 %v980_v4, %v9112_v2 }
 0x1c9   : > { %v9604_v48 = vmax.f32 %v1243_v49, %v1247_v10  ;;  %v9607_v59 = vadd.f32 %v982_v61, %v9142_v18  ;;  %7878 = vrot.lane.b32.xlu1 %v7877_v7, %s8539_s26  ;;  %v873_v49 = vadd.f32 %v9129_v16, %v9142_v18  ;;  %v9622_v0 = vmax.f32 %v1245_v15, %v1249_v3 }
 0x1ca   : > { %11545 = vst [vmem:[#allocation63_spill] sm:$0xff] %v9609_v60  ;;  %11546 = vst [vmem:[#allocation64_spill] sm:$0xff] %v9611_v63  ;;  %7883 = vrot.lane.b32.xlu0 %v7882_v45, %s8539_s26  ;;  %v986_v38 = vpop.f32.mrf.mxu0  ;;  %v9625_v34 = vadd.f32 %v1145_v35, %v9153_v29  ;;  %v7892_v14 = vpack.i.bf16 %v9597_v6, %v9609_v60  ;;  %v869_v7 = vadd.f32 %v9121_v54, %v9142_v18  ;;  %v1149_v4 = vpop.f32.mrf.mxu1 }
 0x1cb   : > { %v1251_v61 = vmax.f32 %v9607_v59, 0.0  ;;  %v7887_v37 = vpack.i.bf16 %v9611_v63, %v9604_v48  ;;  %v11548_v59 = vmax.f32 %v9546_v5, 0.0  ;;  %v11550_v35 = vmax.f32 %v9600_v42, 0.0 }
 0x1cc   : > { %v988_v45 = vpop.f32.mrf.mxu0  ;;  %v1163_v63 = vmax.f32 %v873_v49, 0.0  ;;  %v1250_v60 = vmax.f32 %v9619_v33, 0.0  ;;  %v1253_v54 = vmax.f32 %v9625_v34, 0.0  ;;  %v1032_v33 = vadd.f32 %v9123_v55, %v9153_v29 }
 0x1cd   : > { %v9633_v16 = vmax.f32 %v1247_v10, %v1251_v61  ;;  %v9637_v20 = vmax.f32 %v11548_v59, %v1245_v15  ;;  %v9641_v1 = vmax.f32 %v1248_v13, %v11550_v35  ;;  %7888 = vrot.lane.b32.xlu1 %v7887_v37, %s8539_s26  ;;  %v1159_v15 = vmax.f32 %v869_v7, 0.0  ;;  %v1151_v59 = vpop.f32.mrf.mxu1 }
 0x1ce   : > { %7893 = vrot.lane.b32.xlu0 %v7892_v14, %s8539_s26  ;;  %v1036_v13 = vadd.f32 %v9131_v41, %v9153_v29  ;;  %v990_v35 = vpop.f32.mrf.mxu0  ;;  %v11552_v37 = vmax.f32 %v9151_v27, 0.0  ;;  %v9663_v7 = vmax.f32 %v1246_v17, %v1250_v60  ;;  %v989_v41 = vadd.f32 %v988_v45, %v9142_v18 }
 0x1cf   : > { %11547 = vst [vmem:[#allocation65_spill] sm:$0xff] %v9633_v16  ;;  %11549 = vst [vmem:[#allocation66_spill] sm:$0xff] %v9637_v20  ;;  %v7897_v10 = vpack.i.bf16 %v9622_v0, %v9637_v20  ;;  %v7902_v5 = vpack.i.bf16 %v9641_v1, %v9633_v16  ;;  %v9657_v49 = vmax.f32 %v1159_v15, %v1163_v63  ;;  %v1153_v34 = vpop.f32.mrf.mxu1  ;;  %v1161_v27 = vmax.f32 %v1032_v33, 0.0 }
 0x1d0   : > { %11551 = vst [vmem:[#allocation67_spill] sm:$0xff] %v9641_v1  ;;  %v9661_v14 = vmax.f32 %v1163_v63, %v11552_v37  ;;  %v9666_v1 = vmax.f32 %v1249_v3, %v1253_v54  ;;  %v1165_v16 = vmax.f32 %v1036_v13, 0.0  ;;  %v991_v20 = vadd.f32 %v990_v35, %v9112_v2 }
 0x1d1   : > { %7898 = vrot.lane.b32.xlu1 %v7897_v10, %s8539_s26  ;;  %v1150_v10 = vadd.f32 %v1149_v4, %v9116_v50  ;;  %v1154_v55 = vadd.f32 %v1153_v34, %v9116_v50  ;;  %v11554_v63 = vmax.f32 %v9170_v46, 0.0  ;;  %v7907_v3 = vpack.i.bf16 %v9136_v11, %v9657_v49 }
 0x1d2   : > { %7903 = vrot.lane.b32.xlu0 %v7902_v5, %s8539_s26  ;;  %11553 = vst [vmem:[#allocation68_spill] sm:$0xff] %v9661_v14  ;;  %v992_v5 = vpop.f32.mrf.mxu0  ;;  %v987_v4 = vadd.f32 %v986_v38, %v9112_v2  ;;  %v1255_v45 = vmax.f32 %v989_v41, 0.0  ;;  %v7912_v13 = vpack.i.bf16 %v9148_v26, %v9661_v14  ;;  %v9685_v37 = vmax.f32 %v1161_v27, %v1165_v16  ;;  %v1155_v38 = vpop.f32.mrf.mxu1 }
 0x1d3   : > { %v9677_v17 = vmax.f32 %v1165_v16, %v11554_v63  ;;  %v993_v15 = vadd.f32 %v992_v5, %v9142_v18  ;;  %v1256_v35 = vmax.f32 %v1150_v10, 0.0  ;;  %v1152_v50 = vadd.f32 %v1151_v59, %v9153_v29 }
 0x1d4   : > { %11556 = vst [vmem:[#allocation70_spill] sm:$0xff] %v9685_v37  ;;  %v1258_v33 = vmax.f32 %v991_v20, 0.0  ;;  %v1260_v46 = vmax.f32 %v1154_v55, 0.0  ;;  %v7917_v2 = vpack.i.bf16 %v9146_v25, %v9134_v8  ;;  %v1254_v34 = vmax.f32 %v987_v4, 0.0 }
 0x1d5   : > { %1638 = vrot.lane.b32.xlu1 %v9663_v7, %s8539_s26  ;;  %11555 = vst [vmem:[#allocation69_spill] sm:$0xff] %v9677_v17  ;;  %v9692_v18 = vmax.f32 %v1251_v61, %v1255_v45  ;;  %v1259_v41 = vmax.f32 %v993_v15, 0.0  ;;  %v7922_v16 = vpack.i.bf16 %v9677_v17, %v9685_v37  ;;  %v11558_v10 = vmax.f32 %v9600_v42, 0.0 }
 0x1d6   : > { %1644 = vrot.lane.b32.xlu0 %v9666_v1, %s8539_s26  ;;  %v1257_v20 = vmax.f32 %v1152_v50, 0.0  ;;  %v9700_v5 = vmax.f32 %v1254_v34, %v1258_v33  ;;  %v9702_v27 = vmax.f32 %v1256_v35, %v1260_v46  ;;  %v1156_v61 = vadd.f32 %v1155_v38, %v9153_v29 }
 0x1d7   : > { %11557 = vst [vmem:[#allocation71_spill] sm:$0xff] %v9692_v18  ;;  %v9698_v59 = vmax.f32 %v11558_v10, %v1256_v35  ;;  %v9707_v55 = vmax.f32 %v1250_v60, %v1254_v34  ;;  %v9709_v63 = vmax.f32 %v1255_v45, %v1259_v41 }
 0x1d8   : > { %11560 = vst [vmem:[#allocation73_spill] sm:$0xff] %v9700_v5  ;;  %11561 = vst [vmem:[#allocation74_spill] sm:$0xff] %v9702_v27  ;;  %v7937_v4 = vpack.i.bf16 %v9700_v5, %v9702_v27  ;;  %v1261_v15 = vmax.f32 %v1156_v61, 0.0 }
 0x1d9   : > { %7908 = vrot.lane.b32.xlu1 %v7907_v3, %s8539_s26  ;;  %11559 = vst [vmem:[#allocation72_spill] sm:$0xff] %v9698_v59  ;;  %11562 = vst [vmem:[#allocation75_spill] sm:$0xff] %v9707_v55  ;;  %v7927_v42 = vpack.i.bf16 %v9698_v59, %v9692_v18  ;;  %v9713_v3 = vmax.f32 %v1253_v54, %v1257_v20 }
 0x1da   : > { %7913 = vrot.lane.b32.xlu0 %v7912_v13, %s8539_s26  ;;  %11563 = vst [vmem:[#allocation76_spill] sm:$0xff] %v9709_v63  ;;  %v9724_v60 = vmax.f32 %v1257_v20, %v1261_v15 }
 0x1db   : > { %11564 = vst [vmem:[#allocation77_spill] sm:$0xff] %v9713_v3  ;;  %v7932_v29 = vpack.i.bf16 %v9709_v63, %v9713_v3 }
 0x1dc   : > { %11565 = vst [vmem:[#allocation78_spill] sm:$0xff] %v9724_v60 }
 0x1dd   : > { %7918 = vrot.lane.b32.xlu1 %v7917_v2, %s8539_s26 }
 0x1de   : > { %7923 = vrot.lane.b32.xlu0 %v7922_v16, %s8539_s26 }
 0x1e1   : > { %7928 = vrot.lane.b32.xlu1 %v7927_v42, %s8539_s26 }
 0x1e2   : > { %1646 = vrot.lane.b32.xlu0 %v9707_v55, %s8539_s26 }
 0x1e5   : > { %7933 = vrot.lane.b32.xlu1 %v7932_v29, %s8539_s26 }
 0x1e6   : > { %7938 = vrot.lane.b32.xlu0 %v7937_v4, %s8539_s26 }
 0x1e9   : > { %1660 = vrot.lane.b32.xlu1 %v9724_v60, %s8539_s26 }
 0x1f4   : > { %v7704_v54 = vpop.permute.xlu0 %7703 }
 0x1f5   : > { %v7706_v45 = vunpack.i.h.bf16 %v7704_v54  ;;  %v7705_v13 = vunpack.i.l.bf16 %v7704_v54 }
 0x1f7   : > { %v1670_v35 = vsel %vm1662_vm4, %v7705_v13, %v7706_v45  ;;  %v7714_v50 = vpop.permute.xlu1 %7713 }
 0x1f8   : > { %v7709_v33 = vpop.permute.xlu0 %7708  ;;  %v7716_v46 = vunpack.i.h.bf16 %v7714_v50  ;;  %v7715_v2 = vunpack.i.l.bf16 %v7714_v50  ;;  %v1847_v20 = vmax.f32 %v9181_v52, %v1670_v35  ;;  %v8087_v52 = vld [vmem:[%s11378_s3 + $0x308] ss:$12 sps:$4 sm:$0xff]   ;;  %v8089_v35 = vld [vmem:[%s11378_s3 + $0x3b0] ss:$12 sps:$4 sm:$0xff]  }
 0x1f9   : > { %v7711_v38 = vunpack.i.h.bf16 %v7709_v33  ;;  %v7710_v34 = vunpack.i.l.bf16 %v7709_v33 }
 0x1fa   : > { %v1673_v41 = vsel %vm1662_vm4, %v7715_v2, %v7716_v46 }
 0x1fb   : > { %v1672_v16 = vsel %vm1662_vm4, %v7711_v38, %v7715_v2  ;;  %v1669_v10 = vsel %vm1662_vm4, %v7710_v34, %v7705_v13  ;;  %v1851_v61 = vmax.f32 %v9197_v12, %v1673_v41  ;;  %v7719_v15 = vpop.permute.xlu1 %7718 }
 0x1fc   : > { %v1850_v42 = vmax.f32 %v9192_v62, %v1672_v16  ;;  %v1846_v4 = vmax.f32 %v9202_v19, %v1669_v10  ;;  %v7724_v29 = vpop.permute.xlu0 %7723  ;;  %v7721_v54 = vunpack.i.h.bf16 %v7719_v15  ;;  %v7720_v50 = vunpack.i.l.bf16 %v7719_v15 }
 0x1fd   : > { %v7726_v27 = vunpack.i.h.bf16 %v7724_v29  ;;  %v7725_v33 = vunpack.i.l.bf16 %v7724_v29  ;;  %v9738_v60 = vpack.c.bf16 %v1851_v61, %v1847_v20  ;;  %v8090_v20 = vld [vmem:[%s11378_s3 + $0x2f0] ss:$12 sps:$4 sm:$0xff]  }
 0x1fe   : > { %v9736_v5 = vpack.c.bf16 %v1850_v42, %v1846_v4  ;;  %v1853_v12 = vmax.f32 %v9213_v28, %v7721_v54  ;;  %v1671_v62 = vsel %vm1662_vm4, %v7706_v45, %v7720_v50  ;;  %v1674_v19 = vsel %vm1662_vm4, %v7716_v46, %v7721_v54  ;;  %v8092_v42 = vld [vmem:[%s11378_s3 + $0x398] ss:$12 sps:$4 sm:$0xff]  }
 0x1ff   : > { %v1849_v13 = vmax.f32 %v9221_v32, %v7720_v50  ;;  %v1848_v2 = vmax.f32 %v9177_v51, %v1671_v62  ;;  %v1852_v38 = vmax.f32 %v9204_v21, %v1674_v19  ;;  %v7734_v34 = vpop.permute.xlu1 %7733  ;;  %2657 = vmatprep.mubr.bf16.mxu0 %v9738_v60  ;;  %v1676_v45 = vsel %vm1662_vm4, %v7725_v33, %v7726_v27  ;;  %v8088_v32 = vld [vmem:[%s11378_s3 + $0x488] ss:$12 sps:$4 sm:$0xff]  }
 0x200   : > { %v7729_v41 = vpop.permute.xlu0 %7728  ;;  %v7736_v46 = vunpack.i.h.bf16 %v7734_v34  ;;  %v7735_v16 = vunpack.i.l.bf16 %v7734_v34  ;;  %2658 = vmatmul.mubr.bf16.vlgmr.msra.gmra.mxu0 %v9736_v5  ;;  %v1855_v4 = vmax.f32 %v9227_v40, %v1676_v45  ;;  %v8091_v40 = vld [vmem:[%s11378_s3 + $0x470] ss:$12 sps:$4 sm:$0xff]   ;;  %v8095_v45 = vld [vmem:[%s11378_s3 + $0x380] ss:$12 sps:$4 sm:$0xff]  }
 0x201   : > { %v9753_v28 = vpack.c.bf16 %v1853_v12, %v1849_v13  ;;  %v9760_v51 = vpack.c.bf16 %v1852_v38, %v1848_v2  ;;  %v7731_v21 = vunpack.i.h.bf16 %v7729_v41  ;;  %v7730_v10 = vunpack.i.l.bf16 %v7729_v41  ;;  %7100 = vmatpush3.bf16.msra.mxu0 %v8087_v52 }
 0x202   : > { %v1679_v61 = vsel %vm1662_vm4, %v7735_v16, %v7736_v46  ;;  %7101 = vmatprep.subr.bf16.mxu0 %v8089_v35  ;;  %v11566_v2 = vmov 0  }
 0x203   : > { %6671 = vmatprep.mubr.msk.bf16.mxu1 %vm2591_vm5, %v9753_v28  ;;  %v1859_v15 = vmax.f32 %v9255_v30, %v1679_v61  ;;  %v1678_v29 = vsel %vm1662_vm4, %v7731_v21, %v7735_v16  ;;  %v1675_v54 = vsel %vm1662_vm4, %v7730_v10, %v7725_v33  ;;  %v7739_v50 = vpop.permute.xlu1 %7738 }
 0x204   : > { %2777 = vmatmul.mubr.bf16.vlgmr.msra.gmra.mxu1 %v9760_v51  ;;  %v9776_v52 = vpop.permute.xlu0 %7743  ;;  %v1858_v12 = vmax.f32 %v9243_v58, %v1678_v29  ;;  %v1854_v62 = vmax.f32 %v9251_v24, %v1675_v54  ;;  %v7741_v19 = vunpack.i.h.bf16 %v7739_v50  ;;  %v7740_v13 = vunpack.i.l.bf16 %v7739_v50  ;;  %v8093_v58 = vld [vmem:[%s11378_s3 + $0x2d8] ss:$12 sps:$4 sm:$0xff]  }
 0x205   : > { %2973 = vmatpush1.bf16.msra.mxu1 %v8088_v32  ;;  %v9783_v30 = vpack.c.bf16 %v1859_v15, %v1855_v4  ;;  %v7746_v33 = vunpack.i.h.bf16 %v9776_v52  ;;  %v7745_v35 = vunpack.i.l.bf16 %v9776_v52  ;;  %7102 = vmatpush3.bf16.msra.mxu0 %v8090_v20 }
 0x206   : > { %2974 = vmatprep.subr.bf16.mxu1 %v11566_v2  ;;  %v9791_v24 = vpack.c.bf16 %v1858_v12, %v1854_v62  ;;  %v1861_v38 = vmax.f32 %v9261_v36, %v7741_v19  ;;  %v1677_v34 = vsel %vm1662_vm4, %v7726_v27, %v7740_v13  ;;  %v1680_v41 = vsel %vm1662_vm4, %v7736_v46, %v7741_v19 }
 0x207   : > { %7103 = vmatprep.subr.bf16.mxu0 %v8092_v42  ;;  %v1856_v16 = vmax.f32 %v9231_v43, %v1677_v34  ;;  %v1857_v32 = vmax.f32 %v9280_v53, %v7740_v13  ;;  %v1860_v21 = vmax.f32 %v9253_v9, %v1680_v41  ;;  %v7754_v10 = vpop.permute.xlu1 %7753  ;;  %2665 = vmatprep.mubr.bf16.mxu0 %v9783_v30  ;;  %v8094_v9 = vld [vmem:[%s11378_s3 + $0x458] ss:$12 sps:$4 sm:$0xff]   ;;  %v8096_v53 = vld [vmem:[%s11378_s3 + $0x2c0] ss:$12 sps:$4 sm:$0xff]  }
 0x208   : > { %v7749_v20 = vpop.permute.xlu0 %7748  ;;  %v1682_v36 = vsel %vm1662_vm4, %v7745_v35, %v7746_v33  ;;  %v7756_v27 = vunpack.i.h.bf16 %v7754_v10  ;;  %v7755_v61 = vunpack.i.l.bf16 %v7754_v10  ;;  %2666 = vmatmul.mubr.bf16.gmra.mxu0 %v9791_v24 }
 0x209   : > { %v7751_v46 = vunpack.i.h.bf16 %v7749_v20  ;;  %2975 = vmatpush1.bf16.msra.mxu1 %v8091_v40  ;;  %v9805_v42 = vpack.c.bf16 %v1860_v21, %v1856_v16  ;;  %v9807_v4 = vpack.c.bf16 %v1861_v38, %v1857_v32  ;;  %v7750_v43 = vunpack.i.l.bf16 %v7749_v20  ;;  %7104 = vmatpush3.bf16.msra.mxu0 %v8093_v58  ;;  %v8102_v32 = vld [vmem:[%s11378_s3 + $0x350] ss:$12 sps:$4 sm:$0xff]   ;;  %v11568_v20 = vld [vmem:[#allocation15_spill] sm:$0xff] }
 0x20a   : > { %2976 = vmatprep.subr.bf16.mxu1 %v11566_v2  ;;  %v1685_v15 = vsel %vm1662_vm4, %v7755_v61, %v7756_v27  ;;  %7105 = vmatprep.subr.bf16.mxu0 %v8095_v45  ;;  %v1863_v54 = vmax.f32 %v9271_v57, %v1682_v36  ;;  %v8098_v57 = vld [vmem:[%s11378_s3 + $0x368] ss:$12 sps:$4 sm:$0xff]   ;;  %v11567_v21 = vld [vmem:[#allocation13_spill] sm:$0xff] }
 0x20b   : > { %v1684_v29 = vsel %vm1662_vm4, %v7751_v46, %v7755_v61  ;;  %v1867_v50 = vmax.f32 %v9297_v39, %v1685_v15  ;;  %v1681_v12 = vsel %vm1662_vm4, %v7750_v43, %v7745_v35  ;;  %6672 = vmatprep.mubr.msk.bf16.mxu1 %vm2591_vm5, %v9807_v4  ;;  %v7759_v62 = vpop.permute.xlu1 %7758  ;;  %v8099_v35 = vld [vmem:[%s11378_s3 + $0x2a8] ss:$12 sps:$4 sm:$0xff]   ;;  %v11569_v61 = vld [vmem:[#allocation14_spill] sm:$0xff] }
 0x20c   : > { %v1866_v52 = vmax.f32 %v9288_v22, %v1684_v29  ;;  %v9824_v19 = vpop.permute.xlu0 %7763  ;;  %v1862_v13 = vmax.f32 %v9295_v47, %v1681_v12  ;;  %v7761_v40 = vunpack.i.h.bf16 %v7759_v62  ;;  %v7760_v58 = vunpack.i.l.bf16 %v7759_v62  ;;  %2785 = vmatmul.mubr.bf16.gmra.mxu1 %v9805_v42  ;;  %v8097_v47 = vld [vmem:[%s11378_s3 + $0x440] ss:$12 sps:$4 sm:$0xff]  }
 0x20d   : > { %v7766_v38 = vunpack.i.h.bf16 %v9824_v19  ;;  %v9832_v22 = vpack.c.bf16 %v1867_v50, %v1863_v54  ;;  %v7765_v39 = vunpack.i.l.bf16 %v9824_v19  ;;  %2977 = vmatpush1.bf16.msra.mxu1 %v8094_v9  ;;  %7106 = vmatpush3.bf16.msra.mxu0 %v8096_v53  ;;  %v8100_v50 = vld [vmem:[%s11378_s3 + $0x428] ss:$12 sps:$4 sm:$0xff]   ;;  %v11570_v19 = vld [vmem:[#allocation17_spill] sm:$0xff] }
 0x20e   : > { %v9841_v34 = vpack.c.bf16 %v1866_v52, %v1862_v13  ;;  %v1869_v41 = vmax.f32 %v9310_v31, %v7761_v40  ;;  %v1683_v45 = vsel %vm1662_vm4, %v7746_v33, %v7760_v58  ;;  %v1686_v16 = vsel %vm1662_vm4, %v7756_v27, %v7761_v40  ;;  %2978 = vmatprep.subr.bf16.mxu1 %v11566_v2  ;;  %v8103_v52 = vld [vmem:[%s11378_s3 + $0x290] ss:$12 sps:$4 sm:$0xff]   ;;  %v11571_v40 = vld [vmem:[#allocation19_spill] sm:$0xff] }
 0x20f   : > { %v1864_v10 = vmax.f32 %v11567_v21, %v1683_v45  ;;  %v1865_v36 = vmax.f32 %v11568_v20, %v7760_v58  ;;  %v1868_v46 = vmax.f32 %v11569_v61, %v1686_v16  ;;  %v7774_v43 = vpop.permute.xlu1 %7773  ;;  %2673 = vmatprep.mubr.bf16.mxu0 %v9832_v22  ;;  %v1688_v31 = vsel %vm1662_vm4, %v7765_v39, %v7766_v38  ;;  %v11573_v16 = vld [vmem:[#allocation20_spill] sm:$0xff] }
 0x210   : > { %v7769_v9 = vpop.permute.xlu0 %7768  ;;  %v7776_v33 = vunpack.i.h.bf16 %v7774_v43  ;;  %v7775_v27 = vunpack.i.l.bf16 %v7774_v43  ;;  %2674 = vmatmul.mubr.bf16.gmra.mxu0 %v9841_v34  ;;  %7107 = vmatprep.subr.bf16.mxu0 %v8098_v57  ;;  %v1871_v13 = vmax.f32 %v11570_v19, %v1688_v31  ;;  %v11572_v57 = vld [vmem:[#allocation18_spill] sm:$0xff] }
 0x211   : > { %v7771_v53 = vunpack.i.h.bf16 %v7769_v9  ;;  %v9856_v15 = vpack.c.bf16 %v1868_v46, %v1864_v10  ;;  %v9858_v29 = vpack.c.bf16 %v1869_v41, %v1865_v36  ;;  %v7770_v54 = vunpack.i.l.bf16 %v7769_v9  ;;  %2979 = vmatpush1.bf16.msra.mxu1 %v8097_v47  ;;  %7108 = vmatpush3.bf16.msra.mxu0 %v8099_v35  ;;  %v8105_v36 = vld [vmem:[%s11378_s3 + $0x338] ss:$12 sps:$4 sm:$0xff]   ;;  %v8101_v46 = vld [vmem:[%s11378_s3 + $0x410] ss:$12 sps:$4 sm:$0xff]  }
 0x212   : > { %v1691_v12 = vsel %vm1662_vm4, %v7775_v27, %v7776_v33  ;;  %2980 = vmatprep.subr.bf16.mxu1 %v11566_v2  ;;  %7109 = vmatprep.subr.bf16.mxu0 %v8102_v32  ;;  %v8106_v43 = vld [vmem:[%s11378_s3 + $0x278] ss:$12 sps:$4 sm:$0xff]  }
 0x213   : > { %v1690_v62 = vsel %vm1662_vm4, %v7771_v53, %v7775_v27  ;;  %v1875_v58 = vmax.f32 %v11571_v40, %v1691_v12  ;;  %v1687_v35 = vsel %vm1662_vm4, %v7770_v54, %v7765_v39  ;;  %6673 = vmatprep.mubr.msk.bf16.mxu1 %vm2591_vm5, %v9858_v29  ;;  %v7779_v41 = vpop.permute.xlu1 %7778  ;;  %v11574_v31 = vld [vmem:[#allocation22_spill] sm:$0xff]  ;;  %v11575_v12 = vld [vmem:[#allocation16_spill] sm:$0xff] }
 0x214   : > { %v1874_v47 = vmax.f32 %v11572_v57, %v1690_v62  ;;  %v9875_v45 = vpop.permute.xlu0 %7783  ;;  %v1870_v21 = vmax.f32 %v11573_v16, %v1687_v35  ;;  %v7781_v10 = vunpack.i.h.bf16 %v7779_v41  ;;  %v7780_v20 = vunpack.i.l.bf16 %v7779_v41  ;;  %2793 = vmatmul.mubr.bf16.gmra.mxu1 %v9856_v15  ;;  %v11576_v62 = vld [vmem:[#allocation23_spill] sm:$0xff] }
 0x215   : > { %v7786_v32 = vunpack.i.h.bf16 %v9875_v45  ;;  %v9883_v61 = vpack.c.bf16 %v1875_v58, %v1871_v13  ;;  %v7785_v39 = vunpack.i.l.bf16 %v9875_v45  ;;  %2981 = vmatpush1.bf16.msra.mxu1 %v8100_v50  ;;  %7110 = vmatpush3.bf16.msra.mxu0 %v8103_v52  ;;  %v8108_v50 = vld [vmem:[%s11378_s3 + $0x320] ss:$12 sps:$4 sm:$0xff]   ;;  %v11577_v13 = vld [vmem:[#allocation21_spill] sm:$0xff] }
 0x216   : > { %v9892_v9 = vpack.c.bf16 %v1874_v47, %v1870_v21  ;;  %v1877_v27 = vmax.f32 %v11574_v31, %v7781_v10  ;;  %v1689_v53 = vsel %vm1662_vm4, %v7766_v38, %v7780_v20  ;;  %v1692_v54 = vsel %vm1662_vm4, %v7776_v33, %v7781_v10  ;;  %2982 = vmatprep.subr.bf16.mxu1 %v11566_v2  ;;  %v8104_v21 = vld [vmem:[%s11378_s3 + $0x3f8] ss:$12 sps:$4 sm:$0xff]   ;;  %v8109_v10 = vld [vmem:[%s11378_s3 + $0x260] ss:$12 sps:$4 sm:$0xff]  }
 0x217   : > { %v1872_v52 = vmax.f32 %v11575_v12, %v1689_v53  ;;  %v1873_v19 = vmax.f32 %v11576_v62, %v7780_v20  ;;  %v1876_v40 = vmax.f32 %v11577_v13, %v1692_v54  ;;  %v7794_v58 = vpop.permute.xlu1 %7793  ;;  %2681 = vmatprep.mubr.bf16.mxu0 %v9883_v61  ;;  %v1694_v38 = vsel %vm1662_vm4, %v7785_v39, %v7786_v32  ;;  %v11579_v53 = vld [vmem:[#allocation29_spill] sm:$0xff]  ;;  %v11580_v54 = vld [vmem:[#allocation26_spill] sm:$0xff] }
 0x218   : > { %v7789_v57 = vpop.permute.xlu0 %7788  ;;  %v7796_v47 = vunpack.i.h.bf16 %v7794_v58  ;;  %v7795_v33 = vunpack.i.l.bf16 %v7794_v58  ;;  %2682 = vmatmul.mubr.bf16.gmra.mxu0 %v9892_v9  ;;  %7111 = vmatprep.subr.bf16.mxu0 %v8105_v36  ;;  %v11578_v36 = vld [vmem:[#allocation24_spill] sm:$0xff] }
 0x219   : > { %v7791_v35 = vunpack.i.h.bf16 %v7789_v57  ;;  %v9907_v41 = vpack.c.bf16 %v1876_v40, %v1872_v52  ;;  %v9909_v45 = vpack.c.bf16 %v1877_v27, %v1873_v19  ;;  %v7790_v16 = vunpack.i.l.bf16 %v7789_v57  ;;  %2983 = vmatpush1.bf16.msra.mxu1 %v8101_v46  ;;  %7112 = vmatpush3.bf16.msra.mxu0 %v8106_v43  ;;  %v11581_v19 = vld [vmem:[#allocation27_spill] sm:$0xff] }
 0x21a   : > { %v1697_v20 = vsel %vm1662_vm4, %v7795_v33, %v7796_v47  ;;  %2984 = vmatprep.subr.bf16.mxu1 %v11566_v2  ;;  %7113 = vmatprep.subr.bf16.mxu0 %v8108_v50  ;;  %v1879_v27 = vmax.f32 %v11578_v36, %v1694_v38  ;;  %v8113_v50 = vld [vmem:[%s11378_s3 + $0xac] ss:$12 sps:$4 sm:$0xff]  }
 0x21b   : > { %v1696_v31 = vsel %vm1662_vm4, %v7791_v35, %v7795_v33  ;;  %v1883_v46 = vmax.f32 %v11579_v53, %v1697_v20  ;;  %v1693_v52 = vsel %vm1662_vm4, %v7790_v16, %v7785_v39  ;;  %6674 = vmatprep.mubr.msk.bf16.mxu1 %vm2591_vm5, %v9909_v45  ;;  %v7799_v43 = vpop.permute.xlu1 %7798  ;;  %v8107_v39 = vld [vmem:[%s11378_s3 + $0x3e0] ss:$12 sps:$4 sm:$0xff]   ;;  %v11583_v53 = vld [vmem:[#allocation25_spill] sm:$0xff] }
 0x21c   : > { %v1882_v12 = vmax.f32 %v11580_v54, %v1696_v31  ;;  %v7804_v62 = vpop.permute.xlu0 %7803  ;;  %v1878_v13 = vmax.f32 %v11581_v19, %v1693_v52  ;;  %v7801_v40 = vunpack.i.h.bf16 %v7799_v43  ;;  %v7800_v58 = vunpack.i.l.bf16 %v7799_v43  ;;  %2801 = vmatmul.mubr.bf16.gmra.mxu1 %v9907_v41  ;;  %v11582_v16 = vld [vmem:[#allocation30_spill] sm:$0xff] }
 0x21d   : > { %v7806_v57 = vunpack.i.h.bf16 %v7804_v62  ;;  %v9931_v38 = vpack.c.bf16 %v1883_v46, %v1879_v27  ;;  %v7805_v33 = vunpack.i.l.bf16 %v7804_v62  ;;  %2985 = vmatpush1.bf16.msra.mxu1 %v8104_v21  ;;  %7114 = vmatpush3.bf16.msra.mxu0 %v8109_v10  ;;  %v11584_v46 = vld [vmem:[#allocation32_spill] sm:$0xff] }
 0x21e   : > { %v9936_v35 = vpack.c.bf16 %v1882_v12, %v1878_v13  ;;  %v1885_v20 = vmax.f32 %v11582_v16, %v7801_v40  ;;  %v1695_v31 = vsel %vm1662_vm4, %v7786_v32, %v7800_v58  ;;  %v1698_v36 = vsel %vm1662_vm4, %v7796_v47, %v7801_v40  ;;  %2986 = vmatprep.subr.bf16.mxu1 %v11566_v2  ;;  %v11585_v21 = vld [vmem:[#allocation28_spill] sm:$0xff] }
 0x21f   : > { %v1880_v27 = vmax.f32 %v11583_v53, %v1695_v31  ;;  %v1881_v54 = vmax.f32 %v11584_v46, %v7800_v58  ;;  %v1884_v52 = vmax.f32 %v11585_v21, %v1698_v36  ;;  %v7814_v43 = vpop.permute.xlu1 %7813  ;;  %2689 = vmatprep.mubr.bf16.mxu0 %v9931_v38  ;;  %v1700_v10 = vsel %vm1662_vm4, %v7805_v33, %v7806_v57  ;;  %v8110_v58 = vld [vmem:[%s11378_s3 + $0x4a0] ss:$12 sps:$4 sm:$0xff]  }
 0x220   : > { %v7809_v62 = vpop.permute.xlu0 %7808  ;;  %v7816_v12 = vunpack.i.h.bf16 %v7814_v43  ;;  %v7815_v19 = vunpack.i.l.bf16 %v7814_v43  ;;  %2690 = vmatmul.mubr.bf16.gmra.mxu0 %v9936_v35  ;;  %3487 = vmatprep.subr.bf16.mxu0 %v8113_v50  ;;  %v8116_v50 = vld [vmem:[%s11378_s3 + $0x22c] ss:$12 sps:$4 sm:$0xff]   ;;  %v11588_v46 = vld [vmem:[#allocation34_spill] sm:$0xff] }
 0x221   : > { %v7811_v13 = vunpack.i.h.bf16 %v7809_v62  ;;  %v9948_v32 = vpack.c.bf16 %v1884_v52, %v1880_v27  ;;  %v9950_v47 = vpack.c.bf16 %v1885_v20, %v1881_v54  ;;  %v7810_v40 = vunpack.i.l.bf16 %v7809_v62  ;;  %2987 = vmatpush1.bf16.msra.mxu1 %v8107_v39  ;;  %v11586_v36 = vld [vmem:[#allocation31_spill] sm:$0xff]  ;;  %v11587_v20 = vld [vmem:[#allocation36_spill] sm:$0xff] }
 0x222   : > { %v1703_v16 = vsel %vm1662_vm4, %v7815_v19, %v7816_v12  ;;  %3002 = vmatprep.subr.bf16.mxu1 %v11566_v2  ;;  %v1887_v53 = vmax.f32 %v11586_v36, %v1700_v10  ;;  %v11589_v43 = vld [vmem:[#allocation35_spill] sm:$0xff] }
 0x223   : > { %v1702_v31 = vsel %vm1662_vm4, %v7811_v13, %v7815_v19  ;;  %v1891_v27 = vmax.f32 %v11587_v20, %v1703_v16  ;;  %v1699_v54 = vsel %vm1662_vm4, %v7810_v40, %v7805_v33  ;;  %6675 = vmatprep.mubr.msk.bf16.mxu1 %vm2591_vm5, %v9950_v47  ;;  %v7819_v21 = vpop.permute.xlu1 %7818  ;;  %v11591_v20 = vld [vmem:[#allocation33_spill] sm:$0xff] }
 0x224   : > { %v1890_v39 = vmax.f32 %v11588_v46, %v1702_v31  ;;  %v7824_v52 = vpop.permute.xlu0 %7823  ;;  %v1886_v62 = vmax.f32 %v11589_v43, %v1699_v54  ;;  %v7821_v19 = vunpack.i.h.bf16 %v7819_v21  ;;  %v7820_v13 = vunpack.i.l.bf16 %v7819_v21  ;;  %2809 = vmatmul.mubr.bf16.gmra.mxu1 %v9948_v32  ;;  %v11590_v31 = vld [vmem:[#allocation38_spill] sm:$0xff]  ;;  %v11592_v54 = vld [vmem:[#allocation39_spill] sm:$0xff]  ;;  %v11593_v43 = vld [vmem:[#allocation37_spill] sm:$0xff] }
 0x225   : > { %v7826_v59 = vunpack.i.h.bf16 %v7824_v52  ;;  %v9969_v63 = vpack.c.bf16 %v1891_v27, %v1887_v53  ;;  %v7825_v10 = vunpack.i.l.bf16 %v7824_v52  ;;  %3003 = vmatpush2.bf16.msra.mxu1 %v8110_v58 }
 0x226   : > { %v9971_v16 = vpack.c.bf16 %v1890_v39, %v1886_v62  ;;  %v1893_v33 = vmax.f32 %v11590_v31, %v7821_v19  ;;  %v1701_v40 = vsel %vm1662_vm4, %v7806_v57, %v7820_v13  ;;  %v1704_v36 = vsel %vm1662_vm4, %v7816_v12, %v7821_v19  ;;  %3606 = vmatprep.subr.bf16.mxu1 %v8116_v50 }
 0x227   : > { %v1888_v46 = vmax.f32 %v11591_v20, %v1701_v40  ;;  %v1889_v21 = vmax.f32 %v11592_v54, %v7820_v13  ;;  %v1892_v55 = vmax.f32 %v11593_v43, %v1704_v36  ;;  %v7834_v3 = vpop.permute.xlu1 %7833  ;;  %2697 = vmatprep.mubr.bf16.mxu0 %v9969_v63  ;;  %v1706_v58 = vsel %vm1662_vm4, %v7825_v10, %v7826_v59  ;;  %v11594_v13 = vld [vmem:[#allocation41_spill] sm:$0xff]  ;;  %v11595_v40 = vld [vmem:[#allocation43_spill] sm:$0xff]  ;;  %v11596_v20 = vld [vmem:[#allocation42_spill] sm:$0xff] }
 0x228   : > { %v7829_v53 = vpop.permute.xlu0 %7828  ;;  %v7836_v27 = vunpack.i.h.bf16 %v7834_v3  ;;  %v7835_v39 = vunpack.i.l.bf16 %v7834_v3  ;;  %2698 = vmatmul.mubr.bf16.gmra.mxu0 %v9971_v16  ;;  %v1895_v31 = vmax.f32 %v11594_v13, %v1706_v58  ;;  %v11599_v13 = vld [vmem:[#allocation40_spill] sm:$0xff] }
 0x229   : > { %v7831_v52 = vunpack.i.h.bf16 %v7829_v53  ;;  %v9982_v57 = vpack.c.bf16 %v1892_v55, %v1888_v46  ;;  %v9984_v12 = vpack.c.bf16 %v1893_v33, %v1889_v21  ;;  %v7830_v50 = vunpack.i.l.bf16 %v7829_v53  ;;  %v11597_v33 = vld [vmem:[#allocation44_spill] sm:$0xff] }
 0x22a   : > { %v1709_v62 = vsel %vm1662_vm4, %v7835_v39, %v7836_v27 }
 0x22b   : > { %v1708_v19 = vsel %vm1662_vm4, %v7831_v52, %v7835_v39  ;;  %v1899_v36 = vmax.f32 %v11595_v40, %v1709_v62  ;;  %v1705_v3 = vsel %vm1662_vm4, %v7830_v50, %v7825_v10  ;;  %6676 = vmatprep.mubr.msk.bf16.mxu1 %vm2591_vm5, %v9984_v12  ;;  %v7839_v55 = vpop.permute.xlu1 %7838  ;;  %v11598_v62 = vld [vmem:[#allocation46_spill] sm:$0xff] }
 0x22c   : > { %v1898_v54 = vmax.f32 %v11596_v20, %v1708_v19  ;;  %v7844_v46 = vpop.permute.xlu0 %7843  ;;  %v1894_v21 = vmax.f32 %v11597_v33, %v1705_v3  ;;  %v7841_v43 = vunpack.i.h.bf16 %v7839_v55  ;;  %v7840_v53 = vunpack.i.l.bf16 %v7839_v55  ;;  %2817 = vmatmul.mubr.bf16.gmra.mxu1 %v9982_v57  ;;  %v11600_v20 = vld [vmem:[#allocation47_spill] sm:$0xff]  ;;  %v11601_v33 = vld [vmem:[#allocation45_spill] sm:$0xff] }
 0x22d   : > { %v7846_v18 = vunpack.i.h.bf16 %v7844_v46  ;;  %v9996_v39 = vpack.c.bf16 %v1899_v36, %v1895_v31  ;;  %v7845_v58 = vunpack.i.l.bf16 %v7844_v46 }
 0x22e   : > { %v9998_v52 = vpack.c.bf16 %v1898_v54, %v1894_v21  ;;  %v1901_v19 = vmax.f32 %v11598_v62, %v7841_v43  ;;  %v1707_v10 = vsel %vm1662_vm4, %v7826_v59, %v7840_v53  ;;  %v1710_v50 = vsel %vm1662_vm4, %v7836_v27, %v7841_v43  ;;  %v11602_v62 = vld [vmem:[#allocation48_spill] sm:$0xff] }
 0x22f   : > { %v1896_v40 = vmax.f32 %v11599_v13, %v1707_v10  ;;  %v1897_v3 = vmax.f32 %v11600_v20, %v7840_v53  ;;  %v1900_v55 = vmax.f32 %v11601_v33, %v1710_v50  ;;  %v7854_v26 = vpop.permute.xlu1 %7853  ;;  %2705 = vmatprep.mubr.bf16.mxu0 %v9996_v39  ;;  %v1712_v31 = vsel %vm1662_vm4, %v7845_v58, %v7846_v18  ;;  %v11603_v50 = vld [vmem:[#allocation53_spill] sm:$0xff]  ;;  %v11604_v20 = vld [vmem:[#allocation50_spill] sm:$0xff] }
 0x230   : > { %v7849_v11 = vpop.permute.xlu0 %7848  ;;  %v7856_v36 = vunpack.i.h.bf16 %v7854_v26  ;;  %v7855_v54 = vunpack.i.l.bf16 %v7854_v26  ;;  %2706 = vmatmul.mubr.bf16.gmra.mxu0 %v9998_v52  ;;  %v1903_v10 = vmax.f32 %v11602_v62, %v1712_v31  ;;  %v11607_v62 = vld [vmem:[#allocation49_spill] sm:$0xff] }
 0x231   : > { %v7851_v46 = vunpack.i.h.bf16 %v7849_v11  ;;  %v10009_v59 = vpack.c.bf16 %v1900_v55, %v1896_v40  ;;  %v10011_v27 = vpack.c.bf16 %v1901_v19, %v1897_v3  ;;  %v7850_v21 = vunpack.i.l.bf16 %v7849_v11  ;;  %v11605_v19 = vld [vmem:[#allocation51_spill] sm:$0xff] }
 0x232   : > { %v1715_v43 = vsel %vm1662_vm4, %v7855_v54, %v7856_v36 }
 0x233   : > { %v1714_v53 = vsel %vm1662_vm4, %v7851_v46, %v7855_v54  ;;  %v1907_v13 = vmax.f32 %v11603_v50, %v1715_v43  ;;  %v1711_v26 = vsel %vm1662_vm4, %v7850_v21, %v7845_v58  ;;  %6677 = vmatprep.mubr.msk.bf16.mxu1 %vm2591_vm5, %v10011_v27  ;;  %v7859_v40 = vpop.permute.xlu1 %7858  ;;  %v11606_v43 = vld [vmem:[#allocation54_spill] sm:$0xff] }
 0x234   : > { %v1906_v33 = vmax.f32 %v11604_v20, %v1714_v53  ;;  %v7864_v55 = vpop.permute.xlu0 %7863  ;;  %v1902_v3 = vmax.f32 %v11605_v19, %v1711_v26  ;;  %v7861_v11 = vunpack.i.h.bf16 %v7859_v40  ;;  %v7860_v8 = vunpack.i.l.bf16 %v7859_v40  ;;  %2825 = vmatmul.mubr.bf16.gmra.mxu1 %v10009_v59  ;;  %v11608_v20 = vld [vmem:[#allocation55_spill] sm:$0xff]  ;;  %v11609_v19 = vld [vmem:[#allocation52_spill] sm:$0xff] }
 0x235   : > { %v7866_v25 = vunpack.i.h.bf16 %v7864_v55  ;;  %v10023_v54 = vpack.c.bf16 %v1907_v13, %v1903_v10  ;;  %v7865_v31 = vunpack.i.l.bf16 %v7864_v55 }
 0x236   : > { %v10025_v46 = vpack.c.bf16 %v1906_v33, %v1902_v3  ;;  %v1909_v53 = vmax.f32 %v11606_v43, %v7861_v11  ;;  %v1713_v58 = vsel %vm1662_vm4, %v7846_v18, %v7860_v8  ;;  %v1716_v21 = vsel %vm1662_vm4, %v7856_v36, %v7861_v11  ;;  %v11610_v43 = vld [vmem:[#allocation56_spill] sm:$0xff] }
 0x237   : > { %v1904_v50 = vmax.f32 %v11607_v62, %v1713_v58  ;;  %v1905_v26 = vmax.f32 %v11608_v20, %v7860_v8  ;;  %v1908_v40 = vmax.f32 %v11609_v19, %v1716_v21  ;;  %v7874_v37 = vpop.permute.xlu1 %7873  ;;  %2713 = vmatprep.mubr.bf16.mxu0 %v10023_v54  ;;  %v1718_v10 = vsel %vm1662_vm4, %v7865_v31, %v7866_v25 }
 0x238   : > { %v7869_v17 = vpop.permute.xlu0 %7868  ;;  %v7876_v13 = vunpack.i.h.bf16 %v7874_v37  ;;  %v7875_v33 = vunpack.i.l.bf16 %v7874_v37  ;;  %2714 = vmatmul.mubr.bf16.gmra.mxu0 %v10025_v46  ;;  %v1911_v58 = vmax.f32 %v11610_v43, %v1718_v10 }
 0x239   : > { %v7871_v55 = vunpack.i.h.bf16 %v7869_v17  ;;  %v10036_v18 = vpack.c.bf16 %v1908_v40, %v1904_v50  ;;  %v10038_v36 = vpack.c.bf16 %v1909_v53, %v1905_v26  ;;  %v7870_v3 = vunpack.i.l.bf16 %v7869_v17  ;;  %v11611_v53 = vld [vmem:[#allocation58_spill] sm:$0xff] }
 0x23a   : > { %v1721_v8 = vsel %vm1662_vm4, %v7875_v33, %v7876_v13 }
 0x23b   : > { %v1720_v11 = vsel %vm1662_vm4, %v7871_v55, %v7875_v33  ;;  %v1915_v21 = vmax.f32 %v9561_v44, %v1721_v8  ;;  %v1717_v37 = vsel %vm1662_vm4, %v7870_v3, %v7865_v31  ;;  %6678 = vmatprep.mubr.msk.bf16.mxu1 %vm2591_vm5, %v10038_v36  ;;  %v7879_v50 = vpop.permute.xlu1 %7878  ;;  %v11612_v3 = vld [vmem:[#allocation57_spill] sm:$0xff] }
 0x23c   : > { %v1914_v62 = vmax.f32 %v9555_v56, %v1720_v11  ;;  %v7884_v20 = vpop.permute.xlu0 %7883  ;;  %v1910_v26 = vmax.f32 %v11611_v53, %v1717_v37  ;;  %v7881_v17 = vunpack.i.h.bf16 %v7879_v50  ;;  %v7880_v19 = vunpack.i.l.bf16 %v7879_v50  ;;  %2833 = vmatmul.mubr.bf16.gmra.mxu1 %v10036_v18  ;;  %v11613_v11 = vld [vmem:[#allocation60_spill] sm:$0xff]  ;;  %v11614_v37 = vld [vmem:[#allocation59_spill] sm:$0xff] }
 0x23d   : > { %v7886_v40 = vunpack.i.h.bf16 %v7884_v20  ;;  %v10050_v33 = vpack.c.bf16 %v1915_v21, %v1911_v58  ;;  %v7885_v10 = vunpack.i.l.bf16 %v7884_v20 }
 0x23e   : > { %v10052_v44 = vpack.c.bf16 %v1914_v62, %v1910_v26  ;;  %v1917_v56 = vmax.f32 %v9573_v23, %v7881_v17  ;;  %v1719_v31 = vsel %vm1662_vm4, %v7866_v25, %v7880_v19  ;;  %v1722_v55 = vsel %vm1662_vm4, %v7876_v13, %v7881_v17 }
 0x23f   : > { %v1912_v8 = vmax.f32 %v11612_v3, %v1719_v31  ;;  %v1913_v43 = vmax.f32 %v11613_v11, %v7880_v19  ;;  %v1916_v50 = vmax.f32 %v11614_v37, %v1722_v55  ;;  %v7889_v53 = vpop.permute.xlu1 %7888  ;;  %2721 = vmatprep.mubr.bf16.mxu0 %v10050_v33  ;;  %v1724_v58 = vsel %vm1662_vm4, %v7885_v10, %v7886_v40  ;;  %v11616_v19 = vld [vmem:[#allocation62_spill] sm:$0xff] }
 0x240   : > { %v7894_v14 = vpop.permute.xlu0 %7893  ;;  %v7891_v21 = vunpack.i.h.bf16 %v7889_v53  ;;  %v7890_v62 = vunpack.i.l.bf16 %v7889_v53  ;;  %2722 = vmatmul.mubr.bf16.gmra.mxu0 %v10052_v44  ;;  %v10070_v31 = vmax.f32 %v11616_v19, %v1724_v58  ;;  %v11623_v19 = vld [vmem:[#allocation64_spill] sm:$0xff] }
 0x241   : > { %v7896_v20 = vunpack.i.h.bf16 %v7894_v14  ;;  %v10063_v25 = vpack.c.bf16 %v1916_v50, %v1912_v8  ;;  %v10065_v23 = vpack.c.bf16 %v1917_v56, %v1913_v43  ;;  %v7895_v13 = vunpack.i.l.bf16 %v7894_v14  ;;  %v11617_v43 = vld [vmem:[#allocation63_spill] sm:$0xff] }
 0x242   : > { %v1727_v26 = vsel %vm1662_vm4, %v7890_v62, %v7891_v21 }
 0x243   : > { %11615 = vst [vmem:[#allocation13_spill] sm:$0xff] %v10063_v25  ;;  %v1726_v17 = vsel %vm1662_vm4, %v7896_v20, %v7890_v62  ;;  %v1923_v55 = vmax.f32 %v9604_v48, %v1727_v26  ;;  %v1723_v11 = vsel %vm1662_vm4, %v7895_v13, %v7885_v10  ;;  %6679 = vmatprep.mubr.msk.bf16.mxu1 %vm2591_vm5, %v10065_v23  ;;  %v7899_v8 = vpop.permute.xlu1 %7898  ;;  %v11620_v20 = vld [vmem:[#allocation66_spill] sm:$0xff]  ;;  %v11621_v26 = vld [vmem:[#allocation61_spill] sm:$0xff] }
 0x244   : > { %v1922_v3 = vmax.f32 %v9597_v6, %v1726_v17  ;;  %v7904_v56 = vpop.permute.xlu0 %7903  ;;  %v10078_v14 = vmax.f32 %v11617_v43, %v1723_v11  ;;  %v7901_v37 = vunpack.i.h.bf16 %v7899_v8  ;;  %v7900_v50 = vunpack.i.l.bf16 %v7899_v8  ;;  %2841 = vmatmul.mubr.bf16.gmra.mxu1 %v10063_v25 }
 0x245   : > { %v7906_v53 = vunpack.i.h.bf16 %v7904_v56  ;;  %v7905_v58 = vunpack.i.l.bf16 %v7904_v56  ;;  %v10082_v48 = vpack.c.bf16 %v1923_v55, %v10070_v31 }
 0x246   : > { %11618 = vst [vmem:[#allocation15_spill] sm:$0xff] %v10078_v14  ;;  %v1925_v6 = vmax.f32 %v9622_v0, %v7901_v37  ;;  %v1725_v10 = vsel %vm1662_vm4, %v7886_v40, %v7900_v50  ;;  %v1728_v62 = vsel %vm1662_vm4, %v7891_v21, %v7901_v37  ;;  %v10088_v13 = vmax.f32 %v11620_v20, %v7900_v50  ;;  %v11627_v37 = vld [vmem:[#allocation65_spill] sm:$0xff] }
 0x247   : > { %11619 = vst [vmem:[#allocation14_spill] sm:$0xff] %v10082_v48  ;;  %v10091_v17 = vmax.f32 %v11621_v26, %v1725_v10  ;;  %v1924_v11 = vmax.f32 %v11623_v19, %v1728_v62  ;;  %v1730_v8 = vsel %vm1662_vm4, %v7905_v58, %v7906_v53  ;;  %v1639_v56 = vpop.permute.xlu1 %1638  ;;  %2729 = vmatprep.mubr.bf16.mxu0 %v10082_v48  ;;  %v11631_v62 = vld [vmem:[#allocation67_spill] sm:$0xff]  ;;  %v8119_v19 = vld [vmem:[%s11378_s3 + $0x94] ss:$12 sps:$4 sm:$0xff]  }
 0x248   : > { %v1645_v43 = vpop.permute.xlu0 %1644  ;;  %v10097_v0 = vpack.c.bf16 %v1922_v3, %v10078_v14  ;;  %v10100_v40 = vpack.c.bf16 %v1925_v6, %v10088_v13  ;;  %v1729_v21 = vsel %vm1662_vm4, %v1639_v56, %v7905_v58  ;;  %v10108_v50 = vmax.f32 %v11627_v37, %v1730_v8  ;;  %v8111_v26 = vld [vmem:[%s11378_s3 + $0xa8] ss:$12 sps:$4 sm:$0xff]   ;;  %v8117_v8 = vld [vmem:[%s11378_s3 + $0x90] ss:$12 sps:$4 sm:$0xff]   ;;  %v8120_v37 = vld [vmem:[%s11378_s3 + $0x78] ss:$12 sps:$4 sm:$0xff]  }
 0x249   : > { %11622 = vst [vmem:[#allocation17_spill] sm:$0xff] %v10091_v17  ;;  %v10104_v55 = vmax.f32 %v9666_v1, %v1645_v43  ;;  %v10113_v10 = vpack.c.bf16 %v1924_v11, %v10091_v17  ;;  %v10116_v3 = vmax.f32 %v9663_v7, %v1729_v21  ;;  %v1731_v6 = vsel %vm1662_vm4, %v7906_v53, %v1645_v43  ;;  %v8114_v11 = vld [vmem:[%s11378_s3 + $0x228] ss:$12 sps:$4 sm:$0xff]   ;;  %v8123_v21 = vld [vmem:[%s11378_s3 + $0x210] ss:$12 sps:$4 sm:$0xff]   ;;  %v11635_v14 = vld [vmem:[#allocation70_spill] sm:$0xff] }
 0x24a   : > { %11624 = vst [vmem:[#allocation19_spill] sm:$0xff] %v10097_v0  ;;  %11625 = vst [vmem:[#allocation18_spill] sm:$0xff] %v10100_v40  ;;  %2730 = vmatmul.mubr.bf16.gmra.mxu0 %v10097_v0  ;;  %6680 = vmatprep.mubr.msk.bf16.mxu1 %vm2591_vm5, %v10100_v40  ;;  %v10125_v58 = vpack.c.bf16 %v10108_v50, %v10108_v50  ;;  %v10132_v7 = vmax.f32 %v11631_v62, %v1731_v6  ;;  %v8125_v56 = vld [vmem:[%s11378_s3 + $0x214] ss:$12 sps:$4 sm:$0xff]   ;;  %v8122_v43 = vld [vmem:[%s11378_s3 + $0x7c] ss:$12 sps:$4 sm:$0xff]  }
 0x24b   : > { %11626 = vst [vmem:[#allocation20_spill] sm:$0xff] %v10104_v55  ;;  %11628 = vst [vmem:[#allocation22_spill] sm:$0xff] %v10108_v50  ;;  %v10121_v1 = vpack.c.bf16 %v10104_v55, %v10104_v55  ;;  %v10136_v53 = vpack.c.bf16 %v10116_v3, %v10116_v3  ;;  %v8128_v6 = vld [vmem:[%s11378_s3 + $0x64] ss:$12 sps:$4 sm:$0xff]   ;;  %v8134_v62 = vld [vmem:[%s11378_s3 + $0x1fc] ss:$12 sps:$4 sm:$0xff]  }
 0x24c   : > { %11629 = vst [vmem:[#allocation16_spill] sm:$0xff] %v10113_v10  ;;  %11630 = vst [vmem:[#allocation23_spill] sm:$0xff] %v10116_v3  ;;  %2849 = vmatmul.mubr.bf16.gmra.mxu1 %v10113_v10  ;;  %2737 = vmatprep.mubr.bf16.mxu0 %v10125_v58  ;;  %v10142_v20 = vpack.c.bf16 %v10132_v7, %v10132_v7 }
 0x24d   : > { %6681 = vmatprep.mubr.msk.bf16.mxu1 %vm2591_vm5, %v10121_v1  ;;  %11632 = vst [vmem:[#allocation21_spill] sm:$0xff] %v10132_v7 }
 0x252   : > { %2738 = vmatmul.mubr.bf16.gmra.mxu0 %v10136_v53 }
 0x253   : > { %2895 = vmatprep.mubr.bf16.mxu0 %v9738_v60 }
 0x254   : > { %2857 = vmatmul.mubr.bf16.gmra.mxu1 %v10142_v20 }
 0x255   : > { %6682 = vmatprep.mubr.msk.bf16.mxu1 %vm2591_vm5, %v9753_v28 }
 0x25a   : > { %2896 = vmatmul.mubr.bf16.vlgmr.msra.gmra.mxu0 %v9736_v5 }
 0x25b   : > { %3488 = vmatpush1.bf16.msra.mxu0 %v8111_v26  ;;  %2902 = vmatprep.mubr.bf16.mxu0 %v9783_v30  ;;  %v8132_v26 = vld [vmem:[%s11378_s3 + $0x1f8] ss:$12 sps:$4 sm:$0xff]  }
 0x25c   : > { %3489 = vmatprep.subr.bf16.mxu0 %v8119_v19  ;;  %3005 = vmatmul.mubr.bf16.vlgmr.msra.gmra.mxu1 %v9760_v51  ;;  %v8126_v19 = vld [vmem:[%s11378_s3 + $0x60] ss:$12 sps:$4 sm:$0xff]  }
 0x25d   : > { %6683 = vmatprep.mubr.msk.bf16.mxu1 %vm2591_vm5, %v9807_v4  ;;  %3607 = vmatpush1.bf16.msra.mxu1 %v8114_v11  ;;  %v8143_v11 = vld [vmem:[%s11378_s3 + $0x1e4] ss:$12 sps:$4 sm:$0xff]  }
 0x25e   : > { %3608 = vmatprep.subr.bf16.mxu1 %v8125_v56  ;;  %v8141_v56 = vld [vmem:[%s11378_s3 + $0x1e0] ss:$12 sps:$4 sm:$0xff]  }
 0x25f   : > { %3490 = vmatpush1.bf16.msra.mxu0 %v8117_v8  ;;  %v8131_v8 = vld [vmem:[%s11378_s3 + $0x4c] ss:$12 sps:$4 sm:$0xff]  }
 0x260   : > { %3491 = vmatprep.subr.bf16.mxu0 %v8122_v43  ;;  %v8129_v43 = vld [vmem:[%s11378_s3 + $0x48] ss:$12 sps:$4 sm:$0xff]  }
 0x261   : > { %3609 = vmatpush1.bf16.msra.mxu1 %v8123_v21  ;;  %v8137_v21 = vld [vmem:[%s11378_s3 + $0x34] ss:$12 sps:$4 sm:$0xff]  }
 0x262   : > { %2903 = vmatmul.mubr.bf16.gmra.mxu0 %v9791_v24  ;;  %3610 = vmatprep.subr.bf16.mxu1 %v8134_v62  ;;  %v8135_v62 = vld [vmem:[%s11378_s3 + $0x30] ss:$12 sps:$4 sm:$0xff]  }
 0x263   : > { %2909 = vmatprep.mubr.bf16.mxu0 %v9832_v22  ;;  %3492 = vmatpush1.bf16.msra.mxu0 %v8120_v37  ;;  %v8152_v37 = vld [vmem:[%s11378_s3 + $0x1cc] ss:$12 sps:$4 sm:$0xff]  }
 0x264   : > { %3493 = vmatprep.subr.bf16.mxu0 %v8128_v6  ;;  %3012 = vmatmul.mubr.bf16.gmra.mxu1 %v9805_v42  ;;  %v8150_v6 = vld [vmem:[%s11378_s3 + $0x1c8] ss:$12 sps:$4 sm:$0xff]  }
 0x265   : > { %6684 = vmatprep.mubr.msk.bf16.mxu1 %vm2591_vm5, %v9858_v29  ;;  %3611 = vmatpush1.bf16.msra.mxu1 %v8132_v26  ;;  %v8158_v26 = vld [vmem:[%s11378_s3 + $0x1b4] ss:$12 sps:$4 sm:$0xff]  }
 0x266   : > { %3612 = vmatprep.subr.bf16.mxu1 %v8143_v11  ;;  %v8156_v11 = vld [vmem:[%s11378_s3 + $0x1b0] ss:$12 sps:$4 sm:$0xff]  }
 0x267   : > { %3494 = vmatpush1.bf16.msra.mxu0 %v8126_v19  ;;  %v8140_v19 = vld [vmem:[%s11378_s3 + $0x1c] ss:$12 sps:$4 sm:$0xff]  }
 0x268   : > { %3495 = vmatprep.subr.bf16.mxu0 %v8131_v8  ;;  %v8138_v8 = vld [vmem:[%s11378_s3 + $0x18] ss:$12 sps:$4 sm:$0xff]  }
 0x269   : > { %3613 = vmatpush1.bf16.msra.mxu1 %v8141_v56  ;;  %v8146_v56 = vld [vmem:[%s11378_s3 + $0x4] ss:$12 sps:$4 sm:$0xff]  }
 0x26a   : > { %2910 = vmatmul.mubr.bf16.gmra.mxu0 %v9841_v34  ;;  %3614 = vmatprep.subr.bf16.mxu1 %v8152_v37  ;;  %v8144_v37 = vld [vmem:[%s11378_s3] ss:$12 sps:$4 sm:$0xff]  }
 0x26b   : > { %2916 = vmatprep.mubr.bf16.mxu0 %v9883_v61  ;;  %3496 = vmatpush1.bf16.msra.mxu0 %v8129_v43  ;;  %v8167_v43 = vld [vmem:[%s11378_s3 + $0x19c] ss:$12 sps:$4 sm:$0xff]  }
 0x26c   : > { %3497 = vmatprep.subr.bf16.mxu0 %v8137_v21  ;;  %3019 = vmatmul.mubr.bf16.gmra.mxu1 %v9856_v15  ;;  %v8165_v21 = vld [vmem:[%s11378_s3 + $0x198] ss:$12 sps:$4 sm:$0xff]  }
 0x26d   : > { %6685 = vmatprep.mubr.msk.bf16.mxu1 %vm2591_vm5, %v9909_v45  ;;  %3615 = vmatpush1.bf16.msra.mxu1 %v8150_v6  ;;  %v8176_v6 = vld [vmem:[%s11378_s3 + $0x184] ss:$12 sps:$4 sm:$0xff]  }
 0x26e   : > { %3616 = vmatprep.subr.bf16.mxu1 %v8158_v26  ;;  %v8174_v26 = vld [vmem:[%s11378_s3 + $0x180] ss:$12 sps:$4 sm:$0xff]  }
 0x26f   : > { %3498 = vmatpush1.bf16.msra.mxu0 %v8135_v62  ;;  %v8149_v62 = vld [vmem:[%s11378_s3 + $0x16c] ss:$12 sps:$4 sm:$0xff]  }
 0x270   : > { %3499 = vmatprep.subr.bf16.mxu0 %v8140_v19  ;;  %v8147_v19 = vld [vmem:[%s11378_s3 + $0x168] ss:$12 sps:$4 sm:$0xff]  }
 0x271   : > { %3617 = vmatpush1.bf16.msra.mxu1 %v8156_v11  ;;  %v8155_v11 = vld [vmem:[%s11378_s3 + $0x154] ss:$12 sps:$4 sm:$0xff]  }
 0x272   : > { %2917 = vmatmul.mubr.bf16.gmra.mxu0 %v9892_v9  ;;  %3618 = vmatprep.subr.bf16.mxu1 %v8167_v43  ;;  %v8153_v43 = vld [vmem:[%s11378_s3 + $0x150] ss:$12 sps:$4 sm:$0xff]  }
 0x273   : > { %2923 = vmatprep.mubr.bf16.mxu0 %v9931_v38  ;;  %3500 = vmatpush1.bf16.msra.mxu0 %v8138_v8  ;;  %v8185_v8 = vld [vmem:[%s11378_s3 + $0x244] ss:$12 sps:$4 sm:$0xff]  }
 0x274   : > { %3501 = vmatprep.subr.bf16.mxu0 %v8146_v56  ;;  %3026 = vmatmul.mubr.bf16.gmra.mxu1 %v9907_v41  ;;  %v8183_v56 = vld [vmem:[%s11378_s3 + $0x240] ss:$12 sps:$4 sm:$0xff]  }
 0x275   : > { %6686 = vmatprep.mubr.msk.bf16.mxu1 %vm2591_vm5, %v9950_v47  ;;  %3619 = vmatpush1.bf16.msra.mxu1 %v8165_v21  ;;  %v8161_v21 = vld [vmem:[%s11378_s3 + $0x13c] ss:$12 sps:$4 sm:$0xff]  }
 0x276   : > { %3620 = vmatprep.subr.bf16.mxu1 %v8176_v6  ;;  %v8164_v6 = vld [vmem:[%s11378_s3 + $0x124] ss:$12 sps:$4 sm:$0xff]  }
 0x277   : > { %3502 = vmatpush1.bf16.msra.mxu0 %v8144_v37  ;;  %v8159_v37 = vld [vmem:[%s11378_s3 + $0x138] ss:$12 sps:$4 sm:$0xff]  }
 0x278   : > { %3503 = vmatprep.subr.bf16.mxu0 %v8149_v62  ;;  %v8162_v62 = vld [vmem:[%s11378_s3 + $0x120] ss:$12 sps:$4 sm:$0xff]  }
 0x279   : > { %3621 = vmatpush1.bf16.msra.mxu1 %v8174_v26  ;;  %v8170_v26 = vld [vmem:[%s11378_s3 + $0x10c] ss:$12 sps:$4 sm:$0xff]  }
 0x27a   : > { %2924 = vmatmul.mubr.bf16.gmra.mxu0 %v9936_v35  ;;  %3636 = vmatprep.subr.bf16.mxu1 %v8185_v8  ;;  %v8171_v8 = vld [vmem:[%s11378_s3 + $0xf0] ss:$12 sps:$4 sm:$0xff]  }
 0x27b   : > { %2930 = vmatprep.mubr.bf16.mxu0 %v9969_v63  ;;  %3504 = vmatpush2.bf16.msra.mxu0 %v8147_v19  ;;  %v8168_v19 = vld [vmem:[%s11378_s3 + $0x108] ss:$12 sps:$4 sm:$0xff]  }
 0x27c   : > { %3505 = vmatprep.subr.bf16.mxu0 %v8155_v11  ;;  %3033 = vmatmul.mubr.bf16.gmra.mxu1 %v9948_v32  ;;  %v8173_v11 = vld [vmem:[%s11378_s3 + $0xf4] ss:$12 sps:$4 sm:$0xff]  }
 0x27d   : > { %6687 = vmatprep.mubr.msk.bf16.mxu1 %vm2591_vm5, %v9984_v12  ;;  %3637 = vmatpush2.bf16.msra.mxu1 %v8183_v56  ;;  %v8179_v56 = vld [vmem:[%s11378_s3 + $0xdc] ss:$12 sps:$4 sm:$0xff]  }
 0x27e   : > { %3834 = vmatprep.subr.bf16.mxu1 %v11566_v2 }
 0x27f   : > { %3506 = vmatpush2.bf16.msra.mxu0 %v8153_v43  ;;  %v8177_v43 = vld [vmem:[%s11378_s3 + $0xd8] ss:$12 sps:$4 sm:$0xff]  }
 0x280   : > { %3507 = vmatprep.subr.bf16.mxu0 %v8161_v21  ;;  %v8182_v21 = vld [vmem:[%s11378_s3 + $0xc4] ss:$12 sps:$4 sm:$0xff]  }
 0x282   : > { %2931 = vmatmul.mubr.bf16.gmra.mxu0 %v9971_v16 }
 0x283   : > { %2937 = vmatprep.mubr.bf16.mxu0 %v9996_v39  ;;  %3508 = vmatpush2.bf16.msra.mxu0 %v8159_v37  ;;  %v8180_v37 = vld [vmem:[%s11378_s3 + $0xc0] ss:$12 sps:$4 sm:$0xff]  }
 0x284   : > { %3509 = vmatprep.subr.bf16.mxu0 %v8164_v6  ;;  %3040 = vmatmul.mubr.bf16.gmra.mxu1 %v9982_v57  ;;  %v8186_v6 = vld [vmem:[%s11378_s3 + $0x170] ss:$12 sps:$4 sm:$0xff]  }
 0x285   : > { %6688 = vmatprep.mubr.msk.bf16.mxu1 %vm2591_vm5, %v10011_v27 }
 0x287   : > { %3510 = vmatpush2.bf16.msra.mxu0 %v8162_v62  ;;  %v7914_v62 = vpop.permute.xlu0 %7913 }
 0x288   : > { %3511 = vmatprep.subr.bf16.mxu0 %v8170_v26  ;;  %v7909_v26 = vpop.permute.xlu1 %7908 }
 0x28a   : > { %2938 = vmatmul.mubr.bf16.gmra.mxu0 %v9998_v52 }
 0x28b   : > { %2944 = vmatprep.mubr.bf16.mxu0 %v10023_v54  ;;  %3512 = vmatpush2.bf16.msra.mxu0 %v8168_v19  ;;  %v7916_v19 = vunpack.i.h.bf16 %v7914_v62 }
 0x28c   : > { %3513 = vmatprep.subr.bf16.mxu0 %v8173_v11  ;;  %3047 = vmatmul.mubr.bf16.gmra.mxu1 %v10009_v59  ;;  %v7915_v11 = vunpack.i.l.bf16 %v7914_v62 }
 0x28d   : > { %6689 = vmatprep.mubr.msk.bf16.mxu1 %vm2591_vm5, %v10038_v36 }
 0x28f   : > { %3514 = vmatpush2.bf16.msra.mxu0 %v8171_v8  ;;  %v7911_v8 = vunpack.i.h.bf16 %v7909_v26 }
 0x290   : > { %3515 = vmatprep.subr.bf16.mxu0 %v8179_v56  ;;  %v7910_v56 = vunpack.i.l.bf16 %v7909_v26  ;;  %v11633_v26 = vld [vmem:[#allocation68_spill] sm:$0xff] }
 0x292   : > { %2945 = vmatmul.mubr.bf16.gmra.mxu0 %v10025_v46 }
 0x293   : > { %2951 = vmatprep.mubr.bf16.mxu0 %v10050_v33  ;;  %3516 = vmatpush2.bf16.msra.mxu0 %v8177_v43  ;;  %v7924_v43 = vpop.permute.xlu0 %7923 }
 0x294   : > { %3517 = vmatprep.subr.bf16.mxu0 %v8182_v21  ;;  %3054 = vmatmul.mubr.bf16.gmra.mxu1 %v10036_v18  ;;  %v1667_v21 = vsel %vm1662_vm4, %v7915_v11, %v7916_v19  ;;  %v7926_v7 = vunpack.i.h.bf16 %v7924_v43  ;;  %v7925_v3 = vunpack.i.l.bf16 %v7924_v43 }
 0x295   : > { %6690 = vmatprep.mubr.msk.bf16.mxu1 %vm2591_vm5, %v10065_v23 }
 0x297   : > { %3518 = vmatpush2.bf16.msra.mxu0 %v8180_v37  ;;  %v1664_v37 = vsel %vm1662_vm4, %v7910_v56, %v7911_v8 }
 0x298   : > { %7181 = vmatprep.subr.bf16.mxu0 %v8186_v6  ;;  %v7919_v6 = vpop.permute.xlu1 %7918  ;;  %v1839_v62 = vmax.f32 %v9657_v49, %v1664_v37  ;;  %v1668_v49 = vsel %vm1662_vm4, %v7916_v19, %v7926_v7  ;;  %v11637_v37 = vld [vmem:[#allocation9_spill] sm:$0xff]  ;;  %v8192_v19 = vld [vmem:[%s11378_s3 + $0x140] ss:$12 sps:$4 sm:$0xff]  }
 0x299   : > { %v7921_v55 = vunpack.i.h.bf16 %v7919_v6  ;;  %v7920_v50 = vunpack.i.l.bf16 %v7919_v6  ;;  %v1665_v6 = vsel %vm1662_vm4, %v7911_v8, %v7925_v3  ;;  %v8193_v8 = vld [vmem:[%s11378_s3 + $0x80] ss:$12 sps:$4 sm:$0xff]  }
 0x29a   : > { %2952 = vmatmul.mubr.bf16.gmra.mxu0 %v10052_v44 }
 0x29b   : > { %2958 = vmatprep.mubr.bf16.mxu0 %v10082_v48  ;;  %v11634_v48 = vld [vmem:[#allocation69_spill] sm:$0xff] }
 0x29c   : > { %3061 = vmatmul.mubr.bf16.gmra.mxu1 %v10063_v25  ;;  %v1845_v17 = vmax.f32 %v11634_v48, %v7926_v7  ;;  %v1841_v25 = vmax.f32 %v11635_v14, %v7925_v3  ;;  %v8187_v3 = vld [vmem:[%s11378_s3 + $0xb0] ss:$12 sps:$4 sm:$0xff]  }
 0x29d   : > { %6691 = vmatprep.mubr.msk.bf16.mxu1 %vm2591_vm5, %v10100_v40  ;;  %v1843_v40 = vmax.f32 %v11633_v26, %v1667_v21  ;;  %v8196_v26 = vld [vmem:[%s11378_s3 + $0x68] ss:$12 sps:$4 sm:$0xff]  }
 0x29e   : > { %v10359_v21 = vpack.c.bf16 %v1845_v17, %v1841_v25  ;;  %v8189_v25 = vld [vmem:[%s11378_s3 + $0x158] ss:$12 sps:$4 sm:$0xff]   ;;  %v8188_v17 = vld [vmem:[%s11378_s3 + $0x230] ss:$12 sps:$4 sm:$0xff]  }
 0x29f   : > { %v10353_v43 = vpack.c.bf16 %v1843_v40, %v1839_v62  ;;  %v11638_v40 = vld [vmem:[#allocation10_spill] sm:$0xff] }
 0x2a0   : > { %v8194_v62 = vld [vmem:[%s11378_s3 + $0x200] ss:$12 sps:$4 sm:$0xff]  }
 0x2a2   : > { %2959 = vmatmul.mubr.bf16.gmra.mxu0 %v10097_v0  ;;  %v1666_v0 = vsel %vm1662_vm4, %v7921_v55, %v7915_v11  ;;  %v1840_v55 = vmax.f32 %v11638_v40, %v1665_v6  ;;  %v8191_v11 = vld [vmem:[%s11378_s3 + $0x218] ss:$12 sps:$4 sm:$0xff]   ;;  %v8197_v6 = vld [vmem:[%s11378_s3 + $0x1e8] ss:$12 sps:$4 sm:$0xff]  }
 0x2a3   : > { %2965 = vmatprep.mubr.bf16.mxu0 %v10125_v58  ;;  %v1663_v58 = vsel %vm1662_vm4, %v7920_v50, %v7910_v56  ;;  %v11639_v50 = vld [vmem:[#allocation12_spill] sm:$0xff] }
 0x2a4   : > { %3068 = vmatmul.mubr.bf16.gmra.mxu1 %v10113_v10  ;;  %v1838_v14 = vmax.f32 %v11637_v37, %v1663_v58  ;;  %v8195_v56 = vld [vmem:[%s11378_s3 + $0x128] ss:$12 sps:$4 sm:$0xff]   ;;  %v8198_v58 = vld [vmem:[%s11378_s3 + $0x110] ss:$12 sps:$4 sm:$0xff]  }
 0x2a5   : > { %6692 = vmatprep.mubr.msk.bf16.mxu1 %vm2591_vm5, %v10121_v1  ;;  %v11636_v1 = vld [vmem:[#allocation11_spill] sm:$0xff]  ;;  %v8200_v37 = vld [vmem:[%s11378_s3 + $0x1d0] ss:$12 sps:$4 sm:$0xff]  }
 0x2a6   : > { %v1842_v48 = vmax.f32 %v11636_v1, %v1666_v0 }
 0x2a8   : > { %v10371_v7 = vpack.c.bf16 %v1842_v48, %v1838_v14  ;;  %v8202_v48 = vld [vmem:[%s11378_s3 + $0xf8] ss:$12 sps:$4 sm:$0xff]  }
 0x2aa   : > { %2966 = vmatmul.mubr.bf16.gmra.mxu0 %v10136_v53  ;;  %v1844_v53 = vmax.f32 %v11639_v50, %v1668_v49  ;;  %v8199_v49 = vld [vmem:[%s11378_s3 + $0x50] ss:$12 sps:$4 sm:$0xff]  }
 0x2ab   : > { %3519 = vmatprep.mubr.bf16.mxu0 %v10353_v43 }
 0x2ac   : > { %3075 = vmatmul.mubr.bf16.gmra.mxu1 %v10142_v20  ;;  %v10380_v0 = vpack.c.bf16 %v1844_v53, %v1840_v55  ;;  %v8190_v20 = vld [vmem:[%s11378_s3 + $0x98] ss:$12 sps:$4 sm:$0xff]  }
 0x2ad   : > { %6768 = vmatprep.mubr.msk.bf16.mxu1 %vm2591_vm5, %v10359_v21  ;;  %v8203_v55 = vld [vmem:[%s11378_s3 + $0x38] ss:$12 sps:$4 sm:$0xff]  }
 0x2b2   : > { %3520 = vmatmul.mubr.bf16.vlgmr.msra.gmra.mxu0 %v10371_v7 }
 0x2b3   : > { %7182 = vmatpush3.bf16.msra.mxu0 %v8187_v3  ;;  %3527 = vmatprep.mubr.bf16.mxu0 %v9738_v60  ;;  %v8205_v3 = vld [vmem:[%s11378_s3 + $0xe0] ss:$12 sps:$4 sm:$0xff]  }
 0x2b4   : > { %7183 = vmatprep.subr.bf16.mxu0 %v8189_v25  ;;  %3639 = vmatmul.mubr.bf16.vlgmr.msra.gmra.mxu1 %v10380_v0 }
 0x2b5   : > { %6769 = vmatprep.mubr.msk.bf16.mxu1 %vm2591_vm5, %v9753_v28  ;;  %3835 = vmatpush1.bf16.msra.mxu1 %v8188_v17  ;;  %v8201_v17 = vld [vmem:[%s11378_s3 + $0x1b8] ss:$12 sps:$4 sm:$0xff]  }
 0x2b6   : > { %3836 = vmatprep.subr.bf16.mxu1 %v11566_v2 }
 0x2b7   : > { %7184 = vmatpush3.bf16.msra.mxu0 %v8190_v20 }
 0x2b8   : > { %7185 = vmatprep.subr.bf16.mxu0 %v8192_v19 }
 0x2b9   : > { %3837 = vmatpush1.bf16.msra.mxu1 %v8191_v11 }
 0x2ba   : > { %3528 = vmatmul.mubr.bf16.gmra.mxu0 %v9736_v5  ;;  %3838 = vmatprep.subr.bf16.mxu1 %v11566_v2 }
 0x2bb   : > { %3535 = vmatprep.mubr.bf16.mxu0 %v9783_v30  ;;  %7186 = vmatpush3.bf16.msra.mxu0 %v8193_v8  ;;  %v8206_v8 = vld [vmem:[%s11378_s3 + $0x20] ss:$12 sps:$4 sm:$0xff]  }
 0x2bc   : > { %7187 = vmatprep.subr.bf16.mxu0 %v8195_v56  ;;  %3647 = vmatmul.mubr.bf16.gmra.mxu1 %v9760_v51 }
 0x2bd   : > { %6770 = vmatprep.mubr.msk.bf16.mxu1 %vm2591_vm5, %v9807_v4  ;;  %3839 = vmatpush1.bf16.msra.mxu1 %v8194_v62  ;;  %v8208_v62 = vld [vmem:[%s11378_s3 + $0xc8] ss:$12 sps:$4 sm:$0xff]  }
 0x2be   : > { %3840 = vmatprep.subr.bf16.mxu1 %v11566_v2 }
 0x2bf   : > { %7188 = vmatpush3.bf16.msra.mxu0 %v8196_v26 }
 0x2c0   : > { %7189 = vmatprep.subr.bf16.mxu0 %v8198_v58  ;;  %v2659_v1 = vpop.f32.mrf.mxu0  ;;  %v8204_v58 = vld [vmem:[%s11378_s3 + $0x1a0] ss:$12 sps:$4 sm:$0xff]  }
 0x2c1   : > { %3841 = vmatpush1.bf16.msra.mxu1 %v8197_v6 }
 0x2c2   : > { %3536 = vmatmul.mubr.bf16.gmra.mxu0 %v9791_v24  ;;  %v2661_v14 = vpop.f32.mrf.mxu0  ;;  %3842 = vmatprep.subr.bf16.mxu1 %v11566_v2 }
 0x2c3   : > { %3543 = vmatprep.mubr.bf16.mxu0 %v9832_v22  ;;  %7190 = vmatpush3.bf16.msra.mxu0 %v8199_v49  ;;  %v8209_v49 = vld [vmem:[%s11378_s3 + $0x8] ss:$12 sps:$4 sm:$0xff]  }
 0x2c4   : > { %v2778_v40 = vpop.f32.mrf.mxu1  ;;  %3655 = vmatmul.mubr.bf16.gmra.mxu1 %v9805_v42  ;;  %v2663_v53 = vpop.f32.mrf.mxu0  ;;  %7191 = vmatprep.subr.bf16.mxu0 %v8202_v48 }
 0x2c5   : > { %v10436_v50 = vadd.f32 %v2778_v40, %v2659_v1  ;;  %6771 = vmatprep.mubr.msk.bf16.mxu1 %vm2591_vm5, %v9858_v29  ;;  %3843 = vmatpush1.bf16.msra.mxu1 %v8200_v37  ;;  %v8213_v37 = vld [vmem:[%s11378_s3 + $0x55c] ss:$12 sps:$4 sm:$0xff]  }
 0x2c6   : > { %v2780_v25 = vpop.f32.mrf.mxu1  ;;  %v2664_v19 = vpop.f32.mrf.mxu0  ;;  %3844 = vmatprep.subr.bf16.mxu1 %v11566_v2  ;;  %v8207_v40 = vld [vmem:[%s11378_s3 + $0x188] ss:$12 sps:$4 sm:$0xff]  }
 0x2c7   : > { %v10447_v20 = vadd.f32 %v2780_v25, %v2661_v14  ;;  %7192 = vmatpush3.bf16.msra.mxu0 %v8203_v55  ;;  %v8210_v19 = vld [vmem:[%s11378_s3 + $0x248] ss:$12 sps:$4 sm:$0xff]  }
 0x2c8   : > { %v2782_v11 = vpop.f32.mrf.mxu1  ;;  %v2667_v56 = vpop.f32.mrf.mxu0  ;;  %7193 = vmatprep.subr.bf16.mxu0 %v8205_v3 }
 0x2c9   : > { %3845 = vmatpush1.bf16.msra.mxu1 %v8201_v17 }
 0x2ca   : > { %3544 = vmatmul.mubr.bf16.gmra.mxu0 %v9841_v34  ;;  %v2783_v26 = vpop.f32.mrf.mxu1  ;;  %v2669_v6 = vpop.f32.mrf.mxu0  ;;  %3846 = vmatprep.subr.bf16.mxu1 %v11566_v2 }
 0x2cb   : > { %3551 = vmatprep.mubr.bf16.mxu0 %v9883_v61  ;;  %7194 = vmatpush3.bf16.msra.mxu0 %v8206_v8 }
 0x2cc   : > { %v2786_v1 = vpop.f32.mrf.mxu1  ;;  %3663 = vmatmul.mubr.bf16.gmra.mxu1 %v9856_v15  ;;  %v2671_v48 = vpop.f32.mrf.mxu0  ;;  %7195 = vmatprep.subr.bf16.mxu0 %v8208_v62 }
 0x2cd   : > { %v10469_v14 = vadd.f32 %v2786_v1, %v2667_v56  ;;  %6772 = vmatprep.mubr.msk.bf16.mxu1 %vm2591_vm5, %v9909_v45  ;;  %3847 = vmatpush1.bf16.msra.mxu1 %v8204_v58  ;;  %v8216_v56 = vld [vmem:[%s11378_s3 + $0x6dc] ss:$12 sps:$4 sm:$0xff]  }
 0x2ce   : > { %v2788_v55 = vpop.f32.mrf.mxu1  ;;  %v2672_v53 = vpop.f32.mrf.mxu0  ;;  %3848 = vmatprep.subr.bf16.mxu1 %v11566_v2 }
 0x2cf   : > { %v10477_v3 = vadd.f32 %v2788_v55, %v2669_v6  ;;  %7196 = vmatpush3.bf16.msra.mxu0 %v8209_v49 }
 0x2d0   : > { %v2790_v25 = vpop.f32.mrf.mxu1  ;;  %v2675_v17 = vpop.f32.mrf.mxu0  ;;  %4458 = vmatprep.subr.bf16.mxu0 %v8213_v37 }
 0x2d1   : > { %3849 = vmatpush1.bf16.msra.mxu1 %v8207_v40 }
 0x2d2   : > { %3552 = vmatmul.mubr.bf16.gmra.mxu0 %v9892_v9  ;;  %v2791_v11 = vpop.f32.mrf.mxu1  ;;  %v2677_v8 = vpop.f32.mrf.mxu0  ;;  %3864 = vmatprep.subr.bf16.mxu1 %v11566_v2 }
 0x2d3   : > { %3559 = vmatprep.mubr.bf16.mxu0 %v9931_v38 }
 0x2d4   : > { %v2794_v62 = vpop.f32.mrf.mxu1  ;;  %3671 = vmatmul.mubr.bf16.gmra.mxu1 %v9907_v41  ;;  %v2679_v26 = vpop.f32.mrf.mxu0 }
 0x2d5   : > { %v10489_v58 = vadd.f32 %v2794_v62, %v2675_v17  ;;  %6773 = vmatprep.mubr.msk.bf16.mxu1 %vm2591_vm5, %v9950_v47  ;;  %3865 = vmatpush2.bf16.msra.mxu1 %v8210_v19 }
 0x2d6   : > { %v2796_v6 = vpop.f32.mrf.mxu1  ;;  %v2680_v49 = vpop.f32.mrf.mxu0  ;;  %4577 = vmatprep.subr.bf16.mxu1 %v8216_v56 }
 0x2d7   : > { %v10493_v1 = vadd.f32 %v2796_v6, %v2677_v8 }
 0x2d8   : > { %v2798_v48 = vpop.f32.mrf.mxu1  ;;  %v2683_v37 = vpop.f32.mrf.mxu0 }
 0x2da   : > { %3560 = vmatmul.mubr.bf16.gmra.mxu0 %v9936_v35  ;;  %v2799_v40 = vpop.f32.mrf.mxu1  ;;  %v2685_v55 = vpop.f32.mrf.mxu0 }
 0x2db   : > { %3567 = vmatprep.mubr.bf16.mxu0 %v9969_v63 }
 0x2dc   : > { %v2802_v53 = vpop.f32.mrf.mxu1  ;;  %3679 = vmatmul.mubr.bf16.gmra.mxu1 %v9948_v32  ;;  %v2687_v25 = vpop.f32.mrf.mxu0 }
 0x2dd   : > { %v10498_v17 = vadd.f32 %v2802_v53, %v2683_v37  ;;  %6774 = vmatprep.mubr.msk.bf16.mxu1 %vm2591_vm5, %v9984_v12 }
 0x2de   : > { %v2804_v19 = vpop.f32.mrf.mxu1  ;;  %v2688_v11 = vpop.f32.mrf.mxu0 }
 0x2df   : > { %v10502_v8 = vadd.f32 %v2804_v19, %v2685_v55 }
 0x2e0   : > { %v2806_v56 = vpop.f32.mrf.mxu1  ;;  %v2691_v62 = vpop.f32.mrf.mxu0 }
 0x2e2   : > { %3568 = vmatmul.mubr.bf16.gmra.mxu0 %v9971_v16  ;;  %v2807_v26 = vpop.f32.mrf.mxu1  ;;  %v2693_v6 = vpop.f32.mrf.mxu0 }
 0x2e3   : > { %3575 = vmatprep.mubr.bf16.mxu0 %v9996_v39 }
 0x2e4   : > { %v2810_v49 = vpop.f32.mrf.mxu1  ;;  %3687 = vmatmul.mubr.bf16.gmra.mxu1 %v9982_v57  ;;  %v2695_v48 = vpop.f32.mrf.mxu0 }
 0x2e5   : > { %v10507_v37 = vadd.f32 %v2810_v49, %v2691_v62  ;;  %6775 = vmatprep.mubr.msk.bf16.mxu1 %vm2591_vm5, %v10011_v27 }
 0x2e6   : > { %v2812_v40 = vpop.f32.mrf.mxu1  ;;  %v2696_v55 = vpop.f32.mrf.mxu0 }
 0x2e7   : > { %11640 = vst [vmem:[#allocation24_spill] sm:$0xff] %v10507_v37  ;;  %v10511_v53 = vadd.f32 %v2812_v40, %v2693_v6 }
 0x2e8   : > { %v2814_v25 = vpop.f32.mrf.mxu1  ;;  %v2699_v19 = vpop.f32.mrf.mxu0 }
 0x2e9   : > { %11641 = vst [vmem:[#allocation29_spill] sm:$0xff] %v10511_v53 }
 0x2ea   : > { %3576 = vmatmul.mubr.bf16.gmra.mxu0 %v9998_v52  ;;  %v2815_v11 = vpop.f32.mrf.mxu1  ;;  %v2701_v56 = vpop.f32.mrf.mxu0 }
 0x2eb   : > { %3583 = vmatprep.mubr.bf16.mxu0 %v10023_v54 }
 0x2ec   : > { %v2818_v26 = vpop.f32.mrf.mxu1  ;;  %3695 = vmatmul.mubr.bf16.gmra.mxu1 %v10009_v59  ;;  %v2703_v62 = vpop.f32.mrf.mxu0 }
 0x2ed   : > { %v10516_v49 = vadd.f32 %v2818_v26, %v2699_v19  ;;  %6776 = vmatprep.mubr.msk.bf16.mxu1 %vm2591_vm5, %v10038_v36 }
 0x2ee   : > { %v2820_v48 = vpop.f32.mrf.mxu1  ;;  %v2704_v6 = vpop.f32.mrf.mxu0 }
 0x2ef   : > { %11642 = vst [vmem:[#allocation26_spill] sm:$0xff] %v10516_v49  ;;  %v10520_v40 = vadd.f32 %v2820_v48, %v2701_v56 }
 0x2f0   : > { %v2822_v55 = vpop.f32.mrf.mxu1  ;;  %v2707_v25 = vpop.f32.mrf.mxu0 }
 0x2f1   : > { %11643 = vst [vmem:[#allocation27_spill] sm:$0xff] %v10520_v40 }
 0x2f2   : > { %3584 = vmatmul.mubr.bf16.gmra.mxu0 %v10025_v46  ;;  %v2823_v11 = vpop.f32.mrf.mxu1  ;;  %v2709_v10 = vpop.f32.mrf.mxu0 }
 0x2f3   : > { %3591 = vmatprep.mubr.bf16.mxu0 %v10050_v33  ;;  %v10533_v11 = vpack.c.bf16 %v10070_v31, %v10070_v31 }
 0x2f4   : > { %v2826_v53 = vpop.f32.mrf.mxu1  ;;  %3703 = vmatmul.mubr.bf16.gmra.mxu1 %v10036_v18  ;;  %v2711_v19 = vpop.f32.mrf.mxu0 }
 0x2f5   : > { %v10525_v26 = vadd.f32 %v2826_v53, %v2707_v25  ;;  %6777 = vmatprep.mubr.msk.bf16.mxu1 %vm2591_vm5, %v10065_v23  ;;  %v10539_v25 = vpack.c.bf16 %v10088_v13, %v10088_v13 }
 0x2f6   : > { %v2828_v62 = vpop.f32.mrf.mxu1  ;;  %v2712_v56 = vpop.f32.mrf.mxu0 }
 0x2f7   : > { %11644 = vst [vmem:[#allocation30_spill] sm:$0xff] %v10525_v26  ;;  %v10529_v48 = vadd.f32 %v2828_v62, %v2709_v10  ;;  %v11646_v56 = vld [vmem:[#allocation13_spill] sm:$0xff] }
 0x2f8   : > { %v2830_v6 = vpop.f32.mrf.mxu1  ;;  %v2715_v55 = vpop.f32.mrf.mxu0 }
 0x2f9   : > { %11645 = vst [vmem:[#allocation25_spill] sm:$0xff] %v10529_v48 }
 0x2fa   : > { %3592 = vmatmul.mubr.bf16.gmra.mxu0 %v10052_v44  ;;  %v2831_v40 = vpop.f32.mrf.mxu1  ;;  %v2717_v53 = vpop.f32.mrf.mxu0 }
 0x2fb   : > { %3599 = vmatprep.mubr.bf16.mxu0 %v10533_v11  ;;  %v11649_v40 = vld [vmem:[#allocation15_spill] sm:$0xff] }
 0x2fc   : > { %v2834_v19 = vpop.f32.mrf.mxu1  ;;  %3711 = vmatmul.mubr.bf16.gmra.mxu1 %v11646_v56  ;;  %v2719_v10 = vpop.f32.mrf.mxu0  ;;  %v10550_v26 = vpack.c.bf16 %v11649_v40, %v11649_v40  ;;  %v8219_v40 = vld [vmem:[%s11378_s3 + $0x544] ss:$12 sps:$4 sm:$0xff]  }
 0x2fd   : > { %v10542_v62 = vadd.f32 %v2834_v19, %v2715_v55  ;;  %6778 = vmatprep.mubr.msk.bf16.mxu1 %vm2591_vm5, %v10539_v25  ;;  %v11650_v19 = vld [vmem:[#allocation17_spill] sm:$0xff] }
 0x2fe   : > { %v2836_v31 = vpop.f32.mrf.mxu1  ;;  %v2720_v6 = vpop.f32.mrf.mxu0  ;;  %v10556_v10 = vpack.c.bf16 %v11650_v19, %v11650_v19 }
 0x2ff   : > { %11647 = vst [vmem:[#allocation32_spill] sm:$0xff] %v10542_v62  ;;  %v10546_v48 = vadd.f32 %v2836_v31, %v2717_v53 }
 0x300   : > { %v2838_v49 = vpop.f32.mrf.mxu1  ;;  %v2723_v13 = vpop.f32.mrf.mxu0 }
 0x301   : > { %11648 = vst [vmem:[#allocation28_spill] sm:$0xff] %v10546_v48 }
 0x302   : > { %3600 = vmatmul.mubr.bf16.gmra.mxu0 %v10550_v26  ;;  %v2839_v37 = vpop.f32.mrf.mxu1  ;;  %v2725_v55 = vpop.f32.mrf.mxu0 }
 0x303   : > { %3757 = vmatprep.mubr.bf16.mxu0 %v10353_v43  ;;  %v8211_v43 = vld [vmem:[%s11378_s3 + $0x558] ss:$12 sps:$4 sm:$0xff]  }
 0x304   : > { %v2842_v62 = vpop.f32.mrf.mxu1  ;;  %3719 = vmatmul.mubr.bf16.gmra.mxu1 %v10556_v10  ;;  %v2727_v53 = vpop.f32.mrf.mxu0 }
 0x305   : > { %v10559_v31 = vadd.f32 %v2842_v62, %v2723_v13  ;;  %6779 = vmatprep.mubr.msk.bf16.mxu1 %vm2591_vm5, %v10359_v21  ;;  %v8214_v21 = vld [vmem:[%s11378_s3 + $0x6d8] ss:$12 sps:$4 sm:$0xff]   ;;  %v8217_v13 = vld [vmem:[%s11378_s3 + $0x540] ss:$12 sps:$4 sm:$0xff]  }
 0x306   : > { %v2844_v49 = vpop.f32.mrf.mxu1  ;;  %v2728_v6 = vpop.f32.mrf.mxu0 }
 0x307   : > { %v10566_v37 = vadd.f32 %v2844_v49, %v2725_v55  ;;  %v8225_v55 = vld [vmem:[%s11378_s3 + $0x6c4] ss:$12 sps:$4 sm:$0xff]  }
 0x308   : > { %v2846_v19 = vpop.f32.mrf.mxu1 }
 0x30a   : > { %v2731_v48 = vpop.f32.mrf.mxu0  ;;  %3758 = vmatmul.mubr.bf16.vlgmr.msra.gmra.mxu0 %v10371_v7  ;;  %v2847_v62 = vpop.f32.mrf.mxu1  ;;  %v8222_v7 = vld [vmem:[%s11378_s3 + $0x52c] ss:$12 sps:$4 sm:$0xff]  }
 0x30b   : > { %4459 = vmatpush1.bf16.msra.mxu0 %v8211_v43  ;;  %3764 = vmatprep.mubr.bf16.mxu0 %v9738_v60  ;;  %v8223_v43 = vld [vmem:[%s11378_s3 + $0x6c0] ss:$12 sps:$4 sm:$0xff]  }
 0x30c   : > { %v2733_v53 = vpop.f32.mrf.mxu0  ;;  %4460 = vmatprep.subr.bf16.mxu0 %v8219_v40  ;;  %v2850_v49 = vpop.f32.mrf.mxu1  ;;  %3867 = vmatmul.mubr.bf16.vlgmr.msra.gmra.mxu1 %v10380_v0  ;;  %v8220_v40 = vld [vmem:[%s11378_s3 + $0x528] ss:$12 sps:$4 sm:$0xff]  }
 0x30d   : > { %v10586_v6 = vadd.f32 %v2850_v49, %v2731_v48  ;;  %6780 = vmatprep.mubr.msk.bf16.mxu1 %vm2591_vm5, %v9753_v28  ;;  %4578 = vmatpush1.bf16.msra.mxu1 %v8214_v21  ;;  %v8228_v28 = vld [vmem:[%s11378_s3 + $0x514] ss:$12 sps:$4 sm:$0xff]   ;;  %v8234_v48 = vld [vmem:[%s11378_s3 + $0x6ac] ss:$12 sps:$4 sm:$0xff]  }
 0x30e   : > { %v2735_v60 = vpop.f32.mrf.mxu0  ;;  %v2852_v19 = vpop.f32.mrf.mxu1  ;;  %4579 = vmatprep.subr.bf16.mxu1 %v8225_v55 }
 0x30f   : > { %4461 = vmatpush1.bf16.msra.mxu0 %v8217_v13  ;;  %v10596_v62 = vadd.f32 %v2852_v19, %v2733_v53  ;;  %v8232_v13 = vld [vmem:[%s11378_s3 + $0x6a8] ss:$12 sps:$4 sm:$0xff]   ;;  %v8226_v53 = vld [vmem:[%s11378_s3 + $0x510] ss:$12 sps:$4 sm:$0xff]  }
 0x310   : > { %v2736_v0 = vpop.f32.mrf.mxu0  ;;  %4462 = vmatprep.subr.bf16.mxu0 %v8222_v7  ;;  %v2854_v21 = vpop.f32.mrf.mxu1  ;;  %v8243_v7 = vld [vmem:[%s11378_s3 + $0x694] ss:$12 sps:$4 sm:$0xff]  }
 0x311   : > { %4580 = vmatpush1.bf16.msra.mxu1 %v8223_v43  ;;  %v8252_v21 = vld [vmem:[%s11378_s3 + $0x67c] ss:$12 sps:$4 sm:$0xff]  }
 0x312   : > { %v2739_v49 = vpop.f32.mrf.mxu0  ;;  %3765 = vmatmul.mubr.bf16.gmra.mxu0 %v9736_v5  ;;  %v2855_v55 = vpop.f32.mrf.mxu1  ;;  %v8231_v5 = vld [vmem:[%s11378_s3 + $0x4fc] ss:$12 sps:$4 sm:$0xff]   ;;  %4581 = vmatprep.subr.bf16.mxu1 %v8234_v48 }
 0x313   : > { %3771 = vmatprep.mubr.bf16.mxu0 %v9783_v30  ;;  %4463 = vmatpush1.bf16.msra.mxu0 %v8220_v40  ;;  %v8241_v40 = vld [vmem:[%s11378_s3 + $0x690] ss:$12 sps:$4 sm:$0xff]   ;;  %v8250_v55 = vld [vmem:[%s11378_s3 + $0x678] ss:$12 sps:$4 sm:$0xff]  }
 0x314   : > { %v2740_v60 = vpop.f32.mrf.mxu0  ;;  %4464 = vmatprep.subr.bf16.mxu0 %v8228_v28  ;;  %v2858_v43 = vpop.f32.mrf.mxu1  ;;  %3874 = vmatmul.mubr.bf16.gmra.mxu1 %v9760_v51  ;;  %v8229_v28 = vld [vmem:[%s11378_s3 + $0x4f8] ss:$12 sps:$4 sm:$0xff]  }
 0x315   : > { %6781 = vmatprep.mubr.msk.bf16.mxu1 %vm2591_vm5, %v9807_v4  ;;  %4582 = vmatpush1.bf16.msra.mxu1 %v8232_v13  ;;  %v8237_v51 = vld [vmem:[%s11378_s3 + $0x4e4] ss:$12 sps:$4 sm:$0xff]   ;;  %v8240_v43 = vld [vmem:[%s11378_s3 + $0x4cc] ss:$12 sps:$4 sm:$0xff]  }
 0x316   : > { %v2741_v19 = vpop.f32.mrf.mxu0  ;;  %v2859_v0 = vpop.f32.mrf.mxu1  ;;  %4583 = vmatprep.subr.bf16.mxu1 %v8243_v7  ;;  %v8235_v7 = vld [vmem:[%s11378_s3 + $0x4e0] ss:$12 sps:$4 sm:$0xff]   ;;  %v8258_v60 = vld [vmem:[%s11378_s3 + $0x664] ss:$12 sps:$4 sm:$0xff]  }
 0x317   : > { %4465 = vmatpush1.bf16.msra.mxu0 %v8226_v53 }
 0x318   : > { %v2742_v48 = vpop.f32.mrf.mxu0  ;;  %4466 = vmatprep.subr.bf16.mxu0 %v8231_v5  ;;  %v2860_v49 = vpop.f32.mrf.mxu1 }
 0x319   : > { %4584 = vmatpush1.bf16.msra.mxu1 %v8241_v40 }
 0x31a   : > { %v7115_v13 = vpop.f32.mrf.mxu0  ;;  %3772 = vmatmul.mubr.bf16.gmra.mxu0 %v9791_v24  ;;  %v2861_v53 = vpop.f32.mrf.mxu1  ;;  %4585 = vmatprep.subr.bf16.mxu1 %v8252_v21  ;;  %v8238_v21 = vld [vmem:[%s11378_s3 + $0x4c8] ss:$12 sps:$4 sm:$0xff]  }
 0x31b   : > { %3778 = vmatprep.mubr.bf16.mxu0 %v9832_v22  ;;  %4467 = vmatpush1.bf16.msra.mxu0 %v8229_v28  ;;  %v8256_v28 = vld [vmem:[%s11378_s3 + $0x660] ss:$12 sps:$4 sm:$0xff]  }
 0x31c   : > { %v7116_v5 = vpop.f32.mrf.mxu0  ;;  %4468 = vmatprep.subr.bf16.mxu0 %v8237_v51  ;;  %v3006_v40 = vpop.f32.mrf.mxu1  ;;  %3881 = vmatmul.mubr.bf16.gmra.mxu1 %v9805_v42 }
 0x31d   : > { %v7117_v19 = vadd.f32 %v7116_v5, %v7115_v13  ;;  %6782 = vmatprep.mubr.msk.bf16.mxu1 %vm2591_vm5, %v9858_v29  ;;  %4586 = vmatpush1.bf16.msra.mxu1 %v8250_v55  ;;  %v8246_v13 = vld [vmem:[%s11378_s3 + $0x4b4] ss:$12 sps:$4 sm:$0xff]   ;;  %v8267_v55 = vld [vmem:[%s11378_s3 + $0x64c] ss:$12 sps:$4 sm:$0xff]  }
 0x31e   : > { %v7118_v0 = vpop.f32.mrf.mxu0  ;;  %v3008_v51 = vpop.f32.mrf.mxu1  ;;  %4587 = vmatprep.subr.bf16.mxu1 %v8258_v60 }
 0x31f   : > { %v10653_v48 = vadd.f32 %v7117_v19, %v3006_v40  ;;  %4469 = vmatpush1.bf16.msra.mxu0 %v8235_v7  ;;  %v8265_v7 = vld [vmem:[%s11378_s3 + $0x648] ss:$12 sps:$4 sm:$0xff]  }
 0x320   : > { %v7119_v49 = vpop.f32.mrf.mxu0  ;;  %4470 = vmatprep.subr.bf16.mxu0 %v8240_v43  ;;  %v3009_v53 = vpop.f32.mrf.mxu1  ;;  %v8244_v43 = vld [vmem:[%s11378_s3 + $0x4b0] ss:$12 sps:$4 sm:$0xff]   ;;  %v8276_v19 = vld [vmem:[%s11378_s3 + $0x634] ss:$12 sps:$4 sm:$0xff]  }
 0x321   : > { %4588 = vmatpush1.bf16.msra.mxu1 %v8256_v28  ;;  %v8249_v0 = vld [vmem:[%s11378_s3 + $0x61c] ss:$12 sps:$4 sm:$0xff]  }
 0x322   : > { %v7121_v5 = vpop.f32.mrf.mxu0  ;;  %3779 = vmatmul.mubr.bf16.gmra.mxu0 %v9841_v34  ;;  %v3010_v60 = vpop.f32.mrf.mxu1  ;;  %4589 = vmatprep.subr.bf16.mxu1 %v8267_v55  ;;  %v8274_v49 = vld [vmem:[%s11378_s3 + $0x630] ss:$12 sps:$4 sm:$0xff]   ;;  %v8247_v55 = vld [vmem:[%s11378_s3 + $0x618] ss:$12 sps:$4 sm:$0xff]  }
 0x323   : > { %3785 = vmatprep.mubr.bf16.mxu0 %v9883_v61  ;;  %4471 = vmatpush1.bf16.msra.mxu0 %v8238_v21  ;;  %v8255_v60 = vld [vmem:[%s11378_s3 + $0x604] ss:$12 sps:$4 sm:$0xff]  }
 0x324   : > { %v7122_v40 = vpop.f32.mrf.mxu0  ;;  %4472 = vmatprep.subr.bf16.mxu0 %v8246_v13  ;;  %v3013_v51 = vpop.f32.mrf.mxu1  ;;  %3888 = vmatmul.mubr.bf16.gmra.mxu1 %v9856_v15 }
 0x325   : > { %v7123_v28 = vadd.f32 %v7122_v40, %v7121_v5  ;;  %6783 = vmatprep.mubr.msk.bf16.mxu1 %vm2591_vm5, %v9909_v45  ;;  %4590 = vmatpush1.bf16.msra.mxu1 %v8265_v7  ;;  %v8285_v7 = vld [vmem:[%s11378_s3 + $0x6f4] ss:$12 sps:$4 sm:$0xff]  }
 0x326   : > { %v7124_v21 = vpop.f32.mrf.mxu0  ;;  %v3015_v13 = vpop.f32.mrf.mxu1  ;;  %4591 = vmatprep.subr.bf16.mxu1 %v8276_v19 }
 0x327   : > { %v10684_v53 = vadd.f32 %v7123_v28, %v3013_v51  ;;  %4473 = vmatpush1.bf16.msra.mxu0 %v8244_v43  ;;  %v8283_v43 = vld [vmem:[%s11378_s3 + $0x6f0] ss:$12 sps:$4 sm:$0xff]   ;;  %v8261_v21 = vld [vmem:[%s11378_s3 + $0x5ec] ss:$12 sps:$4 sm:$0xff]  }
 0x328   : > { %v7125_v5 = vpop.f32.mrf.mxu0  ;;  %4474 = vmatprep.subr.bf16.mxu0 %v8249_v0  ;;  %v3016_v40 = vpop.f32.mrf.mxu1  ;;  %v8253_v0 = vld [vmem:[%s11378_s3 + $0x600] ss:$12 sps:$4 sm:$0xff]  }
 0x329   : > { %11651 = vst [vmem:[#allocation31_spill] sm:$0xff] %v10684_v53  ;;  %4592 = vmatpush1.bf16.msra.mxu1 %v8274_v49 }
 0x32a   : > { %v7127_v28 = vpop.f32.mrf.mxu0  ;;  %3786 = vmatmul.mubr.bf16.gmra.mxu0 %v9892_v9  ;;  %v3017_v19 = vpop.f32.mrf.mxu1  ;;  %4607 = vmatprep.subr.bf16.mxu1 %v8285_v7 }
 0x32b   : > { %3792 = vmatprep.mubr.bf16.mxu0 %v9931_v38  ;;  %4475 = vmatpush2.bf16.msra.mxu0 %v8247_v55 }
 0x32c   : > { %v7128_v51 = vpop.f32.mrf.mxu0  ;;  %4476 = vmatprep.subr.bf16.mxu0 %v8255_v60  ;;  %v3020_v13 = vpop.f32.mrf.mxu1  ;;  %3895 = vmatmul.mubr.bf16.gmra.mxu1 %v9907_v41  ;;  %v8259_v60 = vld [vmem:[%s11378_s3 + $0x5e8] ss:$12 sps:$4 sm:$0xff]  }
 0x32d   : > { %v7129_v49 = vadd.f32 %v7128_v51, %v7127_v28  ;;  %6784 = vmatprep.mubr.msk.bf16.mxu1 %vm2591_vm5, %v9950_v47  ;;  %4608 = vmatpush2.bf16.msra.mxu1 %v8283_v43  ;;  %v8264_v28 = vld [vmem:[%s11378_s3 + $0x5d4] ss:$12 sps:$4 sm:$0xff]  }
 0x32e   : > { %v7130_v5 = vpop.f32.mrf.mxu0  ;;  %v3022_v40 = vpop.f32.mrf.mxu1  ;;  %4805 = vmatprep.subr.bf16.mxu1 %v11566_v2 }
 0x32f   : > { %v10709_v55 = vadd.f32 %v7129_v49, %v3020_v13  ;;  %4477 = vmatpush2.bf16.msra.mxu0 %v8253_v0  ;;  %v8262_v0 = vld [vmem:[%s11378_s3 + $0x5d0] ss:$12 sps:$4 sm:$0xff]  }
 0x330   : > { %v7131_v7 = vpop.f32.mrf.mxu0  ;;  %4478 = vmatprep.subr.bf16.mxu0 %v8261_v21  ;;  %v3023_v19 = vpop.f32.mrf.mxu1  ;;  %v8270_v21 = vld [vmem:[%s11378_s3 + $0x5bc] ss:$12 sps:$4 sm:$0xff]  }
 0x331   : > { %11652 = vst [vmem:[#allocation36_spill] sm:$0xff] %v10709_v55 }
 0x332   : > { %v7133_v51 = vpop.f32.mrf.mxu0  ;;  %3793 = vmatmul.mubr.bf16.gmra.mxu0 %v9936_v35  ;;  %v3024_v43 = vpop.f32.mrf.mxu1 }
 0x333   : > { %3799 = vmatprep.mubr.bf16.mxu0 %v9969_v63  ;;  %4479 = vmatpush2.bf16.msra.mxu0 %v8259_v60 }
 0x334   : > { %v7134_v49 = vpop.f32.mrf.mxu0  ;;  %4480 = vmatprep.subr.bf16.mxu0 %v8264_v28  ;;  %v3027_v5 = vpop.f32.mrf.mxu1  ;;  %3902 = vmatmul.mubr.bf16.gmra.mxu1 %v9948_v32  ;;  %v8268_v28 = vld [vmem:[%s11378_s3 + $0x5b8] ss:$12 sps:$4 sm:$0xff]  }
 0x335   : > { %v7135_v13 = vadd.f32 %v7134_v49, %v7133_v51  ;;  %6785 = vmatprep.mubr.msk.bf16.mxu1 %vm2591_vm5, %v9984_v12  ;;  %v8273_v51 = vld [vmem:[%s11378_s3 + $0x5a4] ss:$12 sps:$4 sm:$0xff]  }
 0x336   : > { %v7136_v40 = vpop.f32.mrf.mxu0  ;;  %v3029_v60 = vpop.f32.mrf.mxu1 }
 0x337   : > { %v10729_v7 = vadd.f32 %v7135_v13, %v3027_v5  ;;  %4481 = vmatpush2.bf16.msra.mxu0 %v8262_v0  ;;  %v8271_v0 = vld [vmem:[%s11378_s3 + $0x5a0] ss:$12 sps:$4 sm:$0xff]  }
 0x338   : > { %v7137_v19 = vpop.f32.mrf.mxu0  ;;  %4482 = vmatprep.subr.bf16.mxu0 %v8270_v21  ;;  %v3030_v43 = vpop.f32.mrf.mxu1  ;;  %v8279_v21 = vld [vmem:[%s11378_s3 + $0x58c] ss:$12 sps:$4 sm:$0xff]  }
 0x339   : > { %11653 = vst [vmem:[#allocation34_spill] sm:$0xff] %v10729_v7 }
 0x33a   : > { %v7139_v49 = vpop.f32.mrf.mxu0  ;;  %3800 = vmatmul.mubr.bf16.gmra.mxu0 %v9971_v16  ;;  %v3031_v40 = vpop.f32.mrf.mxu1 }
 0x33b   : > { %3806 = vmatprep.mubr.bf16.mxu0 %v9996_v39  ;;  %4483 = vmatpush2.bf16.msra.mxu0 %v8268_v28 }
 0x33c   : > { %v7140_v13 = vpop.f32.mrf.mxu0  ;;  %4484 = vmatprep.subr.bf16.mxu0 %v8273_v51  ;;  %v3034_v60 = vpop.f32.mrf.mxu1  ;;  %3909 = vmatmul.mubr.bf16.gmra.mxu1 %v9982_v57  ;;  %v8277_v51 = vld [vmem:[%s11378_s3 + $0x588] ss:$12 sps:$4 sm:$0xff]  }
 0x33d   : > { %v7141_v5 = vadd.f32 %v7140_v13, %v7139_v49  ;;  %6786 = vmatprep.mubr.msk.bf16.mxu1 %vm2591_vm5, %v10011_v27  ;;  %v8282_v49 = vld [vmem:[%s11378_s3 + $0x574] ss:$12 sps:$4 sm:$0xff]  }
 0x33e   : > { %v7142_v19 = vpop.f32.mrf.mxu0  ;;  %v3036_v28 = vpop.f32.mrf.mxu1 }
 0x33f   : > { %v10748_v43 = vadd.f32 %v7141_v5, %v3034_v60  ;;  %4485 = vmatpush2.bf16.msra.mxu0 %v8271_v0  ;;  %v8280_v0 = vld [vmem:[%s11378_s3 + $0x570] ss:$12 sps:$4 sm:$0xff]  }
 0x340   : > { %v7143_v40 = vpop.f32.mrf.mxu0  ;;  %4486 = vmatprep.subr.bf16.mxu0 %v8279_v21  ;;  %v3037_v13 = vpop.f32.mrf.mxu1  ;;  %v8286_v21 = vld [vmem:[%s11378_s3 + $0x620] ss:$12 sps:$4 sm:$0xff]  }
 0x341   : > { %11654 = vst [vmem:[#allocation35_spill] sm:$0xff] %v10748_v43 }
 0x342   : > { %v7145_v7 = vpop.f32.mrf.mxu0  ;;  %3807 = vmatmul.mubr.bf16.gmra.mxu0 %v9998_v52  ;;  %v3038_v19 = vpop.f32.mrf.mxu1 }
 0x343   : > { %3813 = vmatprep.mubr.bf16.mxu0 %v10023_v54  ;;  %4487 = vmatpush2.bf16.msra.mxu0 %v8277_v51 }
 0x344   : > { %v7146_v5 = vpop.f32.mrf.mxu0  ;;  %4488 = vmatprep.subr.bf16.mxu0 %v8282_v49  ;;  %v3041_v28 = vpop.f32.mrf.mxu1  ;;  %3916 = vmatmul.mubr.bf16.gmra.mxu1 %v10009_v59 }
 0x345   : > { %v7147_v60 = vadd.f32 %v7146_v5, %v7145_v7  ;;  %6787 = vmatprep.mubr.msk.bf16.mxu1 %vm2591_vm5, %v10038_v36 }
 0x346   : > { %v7148_v40 = vpop.f32.mrf.mxu0  ;;  %v3043_v51 = vpop.f32.mrf.mxu1 }
 0x347   : > { %v10767_v13 = vadd.f32 %v7147_v60, %v3041_v28  ;;  %4489 = vmatpush2.bf16.msra.mxu0 %v8280_v0 }
 0x348   : > { %v7149_v19 = vpop.f32.mrf.mxu0  ;;  %7263 = vmatprep.subr.bf16.mxu0 %v8286_v21  ;;  %v3044_v43 = vpop.f32.mrf.mxu1 }
 0x349   : > { %11655 = vst [vmem:[#allocation38_spill] sm:$0xff] %v10767_v13 }
 0x34a   : > { %v7151_v49 = vpop.f32.mrf.mxu0  ;;  %3814 = vmatmul.mubr.bf16.gmra.mxu0 %v10025_v46  ;;  %v3045_v55 = vpop.f32.mrf.mxu1 }
 0x34b   : > { %3820 = vmatprep.mubr.bf16.mxu0 %v10050_v33 }
 0x34c   : > { %v7152_v7 = vpop.f32.mrf.mxu0  ;;  %v3048_v53 = vpop.f32.mrf.mxu1  ;;  %3923 = vmatmul.mubr.bf16.gmra.mxu1 %v10036_v18 }
 0x34d   : > { %v7153_v5 = vadd.f32 %v7152_v7, %v7151_v49  ;;  %6788 = vmatprep.mubr.msk.bf16.mxu1 %vm2591_vm5, %v10065_v23 }
 0x34e   : > { %v7154_v40 = vpop.f32.mrf.mxu0  ;;  %v3050_v0 = vpop.f32.mrf.mxu1 }
 0x34f   : > { %v10774_v60 = vadd.f32 %v7153_v5, %v3048_v53 }
 0x350   : > { %v7155_v21 = vpop.f32.mrf.mxu0  ;;  %v3051_v43 = vpop.f32.mrf.mxu1 }
 0x351   : > { %11656 = vst [vmem:[#allocation33_spill] sm:$0xff] %v10774_v60  ;;  %v11680_v60 = vld [vmem:[#allocation22_spill] sm:$0xff] }
 0x352   : > { %v7157_v28 = vpop.f32.mrf.mxu0  ;;  %3821 = vmatmul.mubr.bf16.gmra.mxu0 %v10052_v44  ;;  %v3052_v55 = vpop.f32.mrf.mxu1 }
 0x353   : > { %3827 = vmatprep.mubr.bf16.mxu0 %v10533_v11 }
 0x354   : > { %v7158_v51 = vpop.f32.mrf.mxu0  ;;  %v3055_v49 = vpop.f32.mrf.mxu1  ;;  %3930 = vmatmul.mubr.bf16.gmra.mxu1 %v11646_v56 }
 0x355   : > { %v7159_v19 = vadd.f32 %v7158_v51, %v7157_v28  ;;  %6789 = vmatprep.mubr.msk.bf16.mxu1 %vm2591_vm5, %v10539_v25 }
 0x356   : > { %v7160_v7 = vpop.f32.mrf.mxu0  ;;  %v3057_v5 = vpop.f32.mrf.mxu1 }
 0x357   : > { %v10781_v53 = vadd.f32 %v7159_v19, %v3055_v49  ;;  %v8287_v49 = vld [vmem:[%s11378_s3 + $0x560] ss:$12 sps:$4 sm:$0xff]   ;;  %v8289_v7 = vld [vmem:[%s11378_s3 + $0x608] ss:$12 sps:$4 sm:$0xff]  }
 0x358   : > { %v7161_v40 = vpop.f32.mrf.mxu0  ;;  %v3058_v0 = vpop.f32.mrf.mxu1 }
 0x359   : > { %11657 = vst [vmem:[#allocation39_spill] sm:$0xff] %v10781_v53 }
 0x35a   : > { %v7163_v21 = vpop.f32.mrf.mxu0  ;;  %3828 = vmatmul.mubr.bf16.gmra.mxu0 %v10550_v26  ;;  %v3059_v43 = vpop.f32.mrf.mxu1 }
 0x35b   : > { %4490 = vmatprep.mubr.bf16.mxu0 %v9783_v30 }
 0x35c   : > { %v7164_v11 = vpop.f32.mrf.mxu0  ;;  %v3062_v55 = vpop.f32.mrf.mxu1  ;;  %3937 = vmatmul.mubr.bf16.gmra.mxu1 %v10556_v10  ;;  %v8288_v10 = vld [vmem:[%s11378_s3 + $0x6e0] ss:$12 sps:$4 sm:$0xff]  }
 0x35d   : > { %v7165_v28 = vadd.f32 %v7164_v11, %v7163_v21  ;;  %6965 = vmatprep.mubr.msk.bf16.mxu1 %vm2591_vm5, %v9807_v4  ;;  %v8290_v21 = vld [vmem:[%s11378_s3 + $0x548] ss:$12 sps:$4 sm:$0xff]   ;;  %v8292_v11 = vld [vmem:[%s11378_s3 + $0x5f0] ss:$12 sps:$4 sm:$0xff]  }
 0x35e   : > { %v7166_v51 = vpop.f32.mrf.mxu0  ;;  %v3064_v19 = vpop.f32.mrf.mxu1 }
 0x35f   : > { %v10788_v25 = vadd.f32 %v7165_v28, %v3062_v55  ;;  %v8291_v19 = vld [vmem:[%s11378_s3 + $0x6c8] ss:$12 sps:$4 sm:$0xff]  }
 0x360   : > { %v7167_v26 = vpop.f32.mrf.mxu0  ;;  %v3065_v5 = vpop.f32.mrf.mxu1 }
 0x361   : > { %11658 = vst [vmem:[#allocation37_spill] sm:$0xff] %v10788_v25 }
 0x362   : > { %v7169_v40 = vpop.f32.mrf.mxu0  ;;  %4491 = vmatmul.mubr.bf16.vlgmr.msra.gmra.mxu0 %v9791_v24  ;;  %v3066_v0 = vpop.f32.mrf.mxu1 }
 0x363   : > { %7264 = vmatpush3.bf16.msra.mxu0 %v8287_v49  ;;  %4498 = vmatprep.mubr.bf16.mxu0 %v9832_v22 }
 0x364   : > { %v7170_v43 = vpop.f32.mrf.mxu0  ;;  %7265 = vmatprep.subr.bf16.mxu0 %v8289_v7  ;;  %v3069_v55 = vpop.f32.mrf.mxu1  ;;  %4610 = vmatmul.mubr.bf16.vlgmr.msra.gmra.mxu1 %v9805_v42  ;;  %v8293_v7 = vld [vmem:[%s11378_s3 + $0x530] ss:$12 sps:$4 sm:$0xff]  }
 0x365   : > { %v7171_v28 = vadd.f32 %v7170_v43, %v7169_v40  ;;  %6966 = vmatprep.mubr.msk.bf16.mxu1 %vm2591_vm5, %v9858_v29  ;;  %4806 = vmatpush1.bf16.msra.mxu1 %v8288_v10  ;;  %v8295_v40 = vld [vmem:[%s11378_s3 + $0x5d8] ss:$12 sps:$4 sm:$0xff]  }
 0x366   : > { %v7172_v51 = vpop.f32.mrf.mxu0  ;;  %v3071_v26 = vpop.f32.mrf.mxu1  ;;  %4807 = vmatprep.subr.bf16.mxu1 %v11566_v2 }
 0x367   : > { %v10813_v49 = vadd.f32 %v7171_v28, %v3069_v55  ;;  %7266 = vmatpush3.bf16.msra.mxu0 %v8290_v21  ;;  %v8294_v21 = vld [vmem:[%s11378_s3 + $0x6b0] ss:$12 sps:$4 sm:$0xff]   ;;  %v8298_v55 = vld [vmem:[%s11378_s3 + $0x5c0] ss:$12 sps:$4 sm:$0xff]   ;;  %v8297_v26 = vld [vmem:[%s11378_s3 + $0x698] ss:$12 sps:$4 sm:$0xff]  }
 0x368   : > { %v7173_v5 = vpop.f32.mrf.mxu0  ;;  %7267 = vmatprep.subr.bf16.mxu0 %v8292_v11  ;;  %v3072_v10 = vpop.f32.mrf.mxu1  ;;  %v8296_v11 = vld [vmem:[%s11378_s3 + $0x518] ss:$12 sps:$4 sm:$0xff]  }
 0x369   : > { %11659 = vst [vmem:[#allocation41_spill] sm:$0xff] %v10813_v49  ;;  %4808 = vmatpush1.bf16.msra.mxu1 %v8291_v19  ;;  %v11677_v49 = vld [vmem:[#allocation18_spill] sm:$0xff] }
 0x36a   : > { %v7175_v0 = vpop.f32.mrf.mxu0  ;;  %4499 = vmatmul.mubr.bf16.gmra.mxu0 %v9841_v34  ;;  %v3073_v43 = vpop.f32.mrf.mxu1  ;;  %4809 = vmatprep.subr.bf16.mxu1 %v11566_v2 }
 0x36b   : > { %4506 = vmatprep.mubr.bf16.mxu0 %v9883_v61  ;;  %7268 = vmatpush3.bf16.msra.mxu0 %v8293_v7  ;;  %v8302_v0 = vld [vmem:[%s11378_s3 + $0x5a8] ss:$12 sps:$4 sm:$0xff]   ;;  %v8300_v43 = vld [vmem:[%s11378_s3 + $0x680] ss:$12 sps:$4 sm:$0xff]  }
 0x36c   : > { %v7176_v28 = vpop.f32.mrf.mxu0  ;;  %7269 = vmatprep.subr.bf16.mxu0 %v8295_v40  ;;  %v3076_v51 = vpop.f32.mrf.mxu1  ;;  %4618 = vmatmul.mubr.bf16.gmra.mxu1 %v9856_v15  ;;  %v8299_v40 = vld [vmem:[%s11378_s3 + $0x500] ss:$12 sps:$4 sm:$0xff]  }
 0x36d   : > { %6967 = vmatprep.mubr.msk.bf16.mxu1 %vm2591_vm5, %v9909_v45  ;;  %4810 = vmatpush1.bf16.msra.mxu1 %v8294_v21  ;;  %v8303_v51 = vld [vmem:[%s11378_s3 + $0x4e8] ss:$12 sps:$4 sm:$0xff]  }
 0x36e   : > { %v7178_v19 = vpop.f32.mrf.mxu0  ;;  %v3077_v7 = vpop.f32.mrf.mxu1  ;;  %4811 = vmatprep.subr.bf16.mxu1 %v11566_v2 }
 0x36f   : > { %7270 = vmatpush3.bf16.msra.mxu0 %v8296_v11 }
 0x370   : > { %v7179_v5 = vpop.f32.mrf.mxu0  ;;  %7271 = vmatprep.subr.bf16.mxu0 %v8298_v55  ;;  %v3078_v10 = vpop.f32.mrf.mxu1 }
 0x371   : > { %4812 = vmatpush1.bf16.msra.mxu1 %v8297_v26 }
 0x372   : > { %v3521_v21 = vpop.f32.mrf.mxu0  ;;  %4507 = vmatmul.mubr.bf16.gmra.mxu0 %v9892_v9  ;;  %v3079_v28 = vpop.f32.mrf.mxu1  ;;  %4813 = vmatprep.subr.bf16.mxu1 %v11566_v2 }
 0x373   : > { %v3522_v11 = vadd.f32 %v3521_v21, %v10436_v50  ;;  %4514 = vmatprep.mubr.bf16.mxu0 %v9931_v38  ;;  %7272 = vmatpush3.bf16.msra.mxu0 %v8299_v40  ;;  %v8305_v50 = vld [vmem:[%s11378_s3 + $0x590] ss:$12 sps:$4 sm:$0xff]   ;;  %v8301_v40 = vld [vmem:[%s11378_s3 + $0x668] ss:$12 sps:$4 sm:$0xff]  }
 0x374   : > { %v3523_v55 = vpop.f32.mrf.mxu0  ;;  %v3640_v26 = vpop.f32.mrf.mxu1  ;;  %4626 = vmatmul.mubr.bf16.gmra.mxu1 %v9907_v41  ;;  %7273 = vmatprep.subr.bf16.mxu0 %v8302_v0  ;;  %v8306_v21 = vld [vmem:[%s11378_s3 + $0x4d0] ss:$12 sps:$4 sm:$0xff]  }
 0x375   : > { %v3524_v19 = vadd.f32 %v3523_v55, %v10447_v20  ;;  %v10862_v7 = vadd.f32 %v3640_v26, %v3522_v11  ;;  %6968 = vmatprep.mubr.msk.bf16.mxu1 %vm2591_vm5, %v9950_v47  ;;  %4814 = vmatpush1.bf16.msra.mxu1 %v8300_v43  ;;  %v8308_v43 = vld [vmem:[%s11378_s3 + $0x578] ss:$12 sps:$4 sm:$0xff]   ;;  %v8304_v55 = vld [vmem:[%s11378_s3 + $0x650] ss:$12 sps:$4 sm:$0xff]  }
 0x376   : > { %v3525_v5 = vpop.f32.mrf.mxu0  ;;  %v3642_v20 = vpop.f32.mrf.mxu1  ;;  %4815 = vmatprep.subr.bf16.mxu1 %v11566_v2 }
 0x377   : > { %11660 = vst [vmem:[#allocation43_spill] sm:$0xff] %v10862_v7  ;;  %v10870_v10 = vadd.f32 %v3642_v20, %v3524_v19  ;;  %7274 = vmatpush3.bf16.msra.mxu0 %v8303_v51 }
 0x378   : > { %v3526_v0 = vpop.f32.mrf.mxu0  ;;  %v3644_v11 = vpop.f32.mrf.mxu1  ;;  %7275 = vmatprep.subr.bf16.mxu0 %v8305_v50  ;;  %v8309_v50 = vld [vmem:[%s11378_s3 + $0x4b8] ss:$12 sps:$4 sm:$0xff]  }
 0x379   : > { %11661 = vst [vmem:[#allocation42_spill] sm:$0xff] %v10870_v10  ;;  %4816 = vmatpush1.bf16.msra.mxu1 %v8301_v40  ;;  %v8307_v0 = vld [vmem:[%s11378_s3 + $0x638] ss:$12 sps:$4 sm:$0xff]  }
 0x37a   : > { %v3529_v28 = vpop.f32.mrf.mxu0  ;;  %4515 = vmatmul.mubr.bf16.gmra.mxu0 %v9936_v35  ;;  %v3645_v19 = vpop.f32.mrf.mxu1  ;;  %4817 = vmatprep.subr.bf16.mxu1 %v11566_v2 }
 0x37b   : > { %v3530_v51 = vadd.f32 %v3529_v28, %v10469_v14  ;;  %4522 = vmatprep.mubr.bf16.mxu0 %v9969_v63  ;;  %7276 = vmatpush3.bf16.msra.mxu0 %v8306_v21 }
 0x37c   : > { %v3531_v26 = vpop.f32.mrf.mxu0  ;;  %v3648_v40 = vpop.f32.mrf.mxu1  ;;  %4634 = vmatmul.mubr.bf16.gmra.mxu1 %v9948_v32  ;;  %7277 = vmatprep.subr.bf16.mxu0 %v8308_v43 }
 0x37d   : > { %v3532_v5 = vadd.f32 %v3531_v26, %v10477_v3  ;;  %v10890_v20 = vadd.f32 %v3648_v40, %v3530_v51  ;;  %6969 = vmatprep.mubr.msk.bf16.mxu1 %vm2591_vm5, %v9984_v12  ;;  %4818 = vmatpush1.bf16.msra.mxu1 %v8304_v55  ;;  %v8310_v55 = vld [vmem:[%s11378_s3 + $0x6f8] ss:$12 sps:$4 sm:$0xff]  }
 0x37e   : > { %v3533_v14 = vpop.f32.mrf.mxu0  ;;  %v3650_v21 = vpop.f32.mrf.mxu1  ;;  %4819 = vmatprep.subr.bf16.mxu1 %v11566_v2 }
 0x37f   : > { %11662 = vst [vmem:[#allocation44_spill] sm:$0xff] %v10890_v20  ;;  %v10898_v11 = vadd.f32 %v3650_v21, %v3532_v5  ;;  %7278 = vmatpush3.bf16.msra.mxu0 %v8309_v50 }
 0x380   : > { %v3534_v3 = vpop.f32.mrf.mxu0  ;;  %v3652_v28 = vpop.f32.mrf.mxu1 }
 0x381   : > { %11663 = vst [vmem:[#allocation46_spill] sm:$0xff] %v10898_v11  ;;  %4820 = vmatpush1.bf16.msra.mxu1 %v8307_v0  ;;  %v11674_v11 = vld [vmem:[#allocation27_spill] sm:$0xff] }
 0x382   : > { %v3537_v43 = vpop.f32.mrf.mxu0  ;;  %4523 = vmatmul.mubr.bf16.gmra.mxu0 %v9971_v16  ;;  %v3653_v19 = vpop.f32.mrf.mxu1  ;;  %4835 = vmatprep.subr.bf16.mxu1 %v11566_v2 }
 0x383   : > { %v3538_v51 = vadd.f32 %v3537_v43, %v10489_v58  ;;  %4530 = vmatprep.mubr.bf16.mxu0 %v9996_v39 }
 0x384   : > { %v3539_v26 = vpop.f32.mrf.mxu0  ;;  %v3656_v50 = vpop.f32.mrf.mxu1  ;;  %4642 = vmatmul.mubr.bf16.gmra.mxu1 %v9982_v57 }
 0x385   : > { %v3540_v5 = vadd.f32 %v3539_v26, %v10493_v1  ;;  %v10909_v40 = vadd.f32 %v3656_v50, %v3538_v51  ;;  %6970 = vmatprep.mubr.msk.bf16.mxu1 %vm2591_vm5, %v10011_v27  ;;  %4836 = vmatpush2.bf16.msra.mxu1 %v8310_v55 }
 0x386   : > { %v3541_v14 = vpop.f32.mrf.mxu0  ;;  %v3658_v0 = vpop.f32.mrf.mxu1 }
 0x387   : > { %11664 = vst [vmem:[#allocation40_spill] sm:$0xff] %v10909_v40  ;;  %v10913_v58 = vadd.f32 %v3658_v0, %v3540_v5  ;;  %v11672_v40 = vld [vmem:[#allocation26_spill] sm:$0xff] }
 0x388   : > { %v3542_v21 = vpop.f32.mrf.mxu0  ;;  %v3660_v3 = vpop.f32.mrf.mxu1 }
 0x389   : > { %11665 = vst [vmem:[#allocation47_spill] sm:$0xff] %v10913_v58  ;;  %v7929_v21 = vpop.permute.xlu1 %7928  ;;  %v11668_v3 = vld [vmem:[#allocation24_spill] sm:$0xff] }
 0x38a   : > { %v3545_v28 = vpop.f32.mrf.mxu0  ;;  %4531 = vmatmul.mubr.bf16.gmra.mxu0 %v9998_v52  ;;  %v3661_v1 = vpop.f32.mrf.mxu1 }
 0x38b   : > { %v3546_v2 = vadd.f32 %v3545_v28, %v10498_v17  ;;  %4538 = vmatprep.mubr.bf16.mxu0 %v10023_v54  ;;  %v1647_v1 = vpop.permute.xlu0 %1646 }
 0x38c   : > { %v3547_v43 = vpop.f32.mrf.mxu0  ;;  %v3664_v19 = vpop.f32.mrf.mxu1  ;;  %4650 = vmatmul.mubr.bf16.gmra.mxu1 %v10009_v59 }
 0x38d   : > { %v3548_v51 = vadd.f32 %v3547_v43, %v10502_v8  ;;  %v10920_v55 = vadd.f32 %v3664_v19, %v3546_v2  ;;  %6971 = vmatprep.mubr.msk.bf16.mxu1 %vm2591_vm5, %v10038_v36  ;;  %v11669_v43 = vld [vmem:[#allocation29_spill] sm:$0xff] }
 0x38e   : > { %v3549_v26 = vpop.f32.mrf.mxu0  ;;  %v3666_v5 = vpop.f32.mrf.mxu1 }
 0x38f   : > { %11666 = vst [vmem:[#allocation45_spill] sm:$0xff] %v10920_v55  ;;  %v10924_v50 = vadd.f32 %v3666_v5, %v3548_v51  ;;  %v7931_v51 = vunpack.i.h.bf16 %v7929_v21  ;;  %v7930_v5 = vunpack.i.l.bf16 %v7929_v21 }
 0x390   : > { %v3550_v14 = vpop.f32.mrf.mxu0  ;;  %v3668_v17 = vpop.f32.mrf.mxu1 }
 0x391   : > { %11667 = vst [vmem:[#allocation48_spill] sm:$0xff] %v10924_v50  ;;  %v1733_v58 = vsel %vm1662_vm4, %v7930_v5, %v7931_v51 }
 0x392   : > { %v3553_v0 = vpop.f32.mrf.mxu0  ;;  %4539 = vmatmul.mubr.bf16.gmra.mxu0 %v10025_v46  ;;  %v3669_v28 = vpop.f32.mrf.mxu1 }
 0x393   : > { %v3554_v8 = vadd.f32 %v3553_v0, %v11668_v3  ;;  %4546 = vmatprep.mubr.bf16.mxu0 %v10050_v33  ;;  %v7934_v28 = vpop.permute.xlu1 %7933 }
 0x394   : > { %v3555_v2 = vpop.f32.mrf.mxu0  ;;  %v3672_v26 = vpop.f32.mrf.mxu1  ;;  %4658 = vmatmul.mubr.bf16.gmra.mxu1 %v10036_v18 }
 0x395   : > { %v3556_v19 = vadd.f32 %v3555_v2, %v11669_v43  ;;  %v10931_v14 = vadd.f32 %v3672_v26, %v3554_v8  ;;  %6972 = vmatprep.mubr.msk.bf16.mxu1 %vm2591_vm5, %v10065_v23  ;;  %v7939_v43 = vpop.permute.xlu0 %7938  ;;  %v11673_v26 = vld [vmem:[#allocation14_spill] sm:$0xff] }
 0x396   : > { %v3557_v17 = vpop.f32.mrf.mxu0  ;;  %v3674_v50 = vpop.f32.mrf.mxu1 }
 0x397   : > { %11670 = vst [vmem:[#allocation53_spill] sm:$0xff] %v10931_v14  ;;  %v10935_v0 = vadd.f32 %v3674_v50, %v3556_v19  ;;  %v7935_v17 = vunpack.i.l.bf16 %v7934_v28  ;;  %v11675_v19 = vld [vmem:[#allocation71_spill] sm:$0xff] }
 0x398   : > { %v3558_v3 = vpop.f32.mrf.mxu0  ;;  %v3676_v55 = vpop.f32.mrf.mxu1 }
 0x399   : > { %11671 = vst [vmem:[#allocation50_spill] sm:$0xff] %v10935_v0  ;;  %v1931_v55 = vmax.f32 %v11675_v19, %v1733_v58  ;;  %v7940_v3 = vunpack.i.l.bf16 %v7939_v43  ;;  %v7936_v0 = vunpack.i.h.bf16 %v7934_v28  ;;  %v11681_v28 = vld [vmem:[#allocation19_spill] sm:$0xff] }
 0x39a   : > { %v3561_v2 = vpop.f32.mrf.mxu0  ;;  %4547 = vmatmul.mubr.bf16.gmra.mxu0 %v10052_v44  ;;  %v3677_v8 = vpop.f32.mrf.mxu1 }
 0x39b   : > { %v3562_v21 = vadd.f32 %v3561_v2, %v11672_v40  ;;  %4554 = vmatprep.mubr.bf16.mxu0 %v11673_v26  ;;  %v11678_v2 = vld [vmem:[#allocation77_spill] sm:$0xff]  ;;  %v10953_v13 = vpack.c.bf16 %v1931_v55, %v11680_v60  ;;  %v7941_v60 = vunpack.i.h.bf16 %v7939_v43  ;;  %v1661_v55 = vpop.permute.xlu1 %1660 }
 0x39c   : > { %v3563_v14 = vpop.f32.mrf.mxu0  ;;  %v3680_v50 = vpop.f32.mrf.mxu1  ;;  %4666 = vmatmul.mubr.bf16.gmra.mxu1 %v11646_v56  ;;  %v1933_v8 = vmax.f32 %v11678_v2, %v7935_v17  ;;  %v11683_v2 = vld [vmem:[#allocation75_spill] sm:$0xff] }
 0x39d   : > { %v3564_v20 = vadd.f32 %v3563_v14, %v11674_v11  ;;  %v10944_v10 = vadd.f32 %v3680_v50, %v3562_v21  ;;  %6973 = vmatprep.mubr.msk.bf16.mxu1 %vm2591_vm5, %v11677_v49  ;;  %v1732_v11 = vsel %vm1662_vm4, %v1647_v1, %v7930_v5  ;;  %v11682_v21 = vld [vmem:[#allocation30_spill] sm:$0xff]  ;;  %v11687_v49 = vld [vmem:[#allocation76_spill] sm:$0xff] }
 0x39e   : > { %v3565_v7 = vpop.f32.mrf.mxu0  ;;  %v3682_v40 = vpop.f32.mrf.mxu1 }
 0x39f   : > { %11676 = vst [vmem:[#allocation51_spill] sm:$0xff] %v10944_v10  ;;  %v10949_v25 = vadd.f32 %v3682_v40, %v3564_v20  ;;  %v1736_v7 = vsel %vm1662_vm4, %v7936_v0, %v7940_v3  ;;  %v1930_v20 = vmax.f32 %v11683_v2, %v1732_v11  ;;  %v11684_v40 = vld [vmem:[#allocation20_spill] sm:$0xff]  ;;  %v11689_v11 = vld [vmem:[#allocation78_spill] sm:$0xff] }
 0x3a0   : > { %v3566_v53 = vpop.f32.mrf.mxu0  ;;  %v3684_v14 = vpop.f32.mrf.mxu1  ;;  %v10962_v1 = vpack.c.bf16 %v1933_v8, %v11684_v40  ;;  %v1937_v2 = vmax.f32 %v11689_v11, %v1661_v55 }
 0x3a1   : > { %11679 = vst [vmem:[#allocation54_spill] sm:$0xff] %v10949_v25  ;;  %v1734_v53 = vsel %vm1662_vm4, %v7931_v51, %v7935_v17  ;;  %v11685_v14 = vld [vmem:[#allocation25_spill] sm:$0xff]  ;;  %v11688_v51 = vld [vmem:[#allocation72_spill] sm:$0xff] }
 0x3a2   : > { %v3569_v58 = vpop.f32.mrf.mxu0  ;;  %4555 = vmatmul.mubr.bf16.gmra.mxu0 %v11681_v28  ;;  %v3685_v19 = vpop.f32.mrf.mxu1  ;;  %v11686_v28 = vld [vmem:[#allocation16_spill] sm:$0xff]  ;;  %v1932_v17 = vmax.f32 %v11688_v51, %v1734_v53  ;;  %v11692_v51 = vld [vmem:[#allocation21_spill] sm:$0xff] }
 0x3a3   : > { %v3570_v50 = vadd.f32 %v3569_v58, %v11682_v21  ;;  %4562 = vmatprep.mubr.bf16.mxu0 %v10953_v13  ;;  %v1935_v58 = vmax.f32 %v11687_v49, %v1736_v7 }
 0x3a4   : > { %v3571_v5 = vpop.f32.mrf.mxu0  ;;  %v3688_v10 = vpop.f32.mrf.mxu1  ;;  %4674 = vmatmul.mubr.bf16.gmra.mxu1 %v11686_v28  ;;  %v1735_v28 = vsel %vm1662_vm4, %v7941_v60, %v7936_v0  ;;  %v11694_v60 = vld [vmem:[#allocation28_spill] sm:$0xff] }
 0x3a5   : > { %v3572_v25 = vadd.f32 %v3571_v5, %v11685_v14  ;;  %v10967_v21 = vadd.f32 %v3688_v10, %v3570_v50  ;;  %6974 = vmatprep.mubr.msk.bf16.mxu1 %vm2591_vm5, %v10962_v1  ;;  %v11690_v5 = vld [vmem:[#allocation23_spill] sm:$0xff]  ;;  %v10979_v10 = vpack.c.bf16 %v1935_v58, %v1935_v58  ;;  %v11691_v50 = vld [vmem:[#allocation32_spill] sm:$0xff] }
 0x3a6   : > { %v3573_v19 = vpop.f32.mrf.mxu0  ;;  %v3690_v8 = vpop.f32.mrf.mxu1  ;;  %v10976_v14 = vpack.c.bf16 %v1930_v20, %v11690_v5  ;;  %v1737_v20 = vsel %vm1662_vm4, %v7940_v3, %v1661_v55 }
 0x3a7   : > { %v10973_v43 = vadd.f32 %v3690_v8, %v3572_v25  ;;  %v10985_v25 = vpack.c.bf16 %v1932_v17, %v11692_v51  ;;  %v11693_v8 = vld [vmem:[#allocation73_spill] sm:$0xff]  ;;  %v11695_v17 = vld [vmem:[#allocation74_spill] sm:$0xff] }
 0x3a8   : > { %v3574_v40 = vpop.f32.mrf.mxu0  ;;  %v3692_v49 = vpop.f32.mrf.mxu1  ;;  %v1934_v11 = vmax.f32 %v11693_v8, %v1735_v28 }
 0x3a9   : > { %v10989_v40 = vpack.c.bf16 %v1937_v2, %v1937_v2 }
 0x3aa   : > { %v3577_v7 = vpop.f32.mrf.mxu0  ;;  %4563 = vmatmul.mubr.bf16.gmra.mxu0 %v10976_v14  ;;  %v3693_v53 = vpop.f32.mrf.mxu1  ;;  %v11000_v55 = vpack.c.bf16 %v1934_v11, %v1934_v11 }
 0x3ab   : > { %v3578_v19 = vadd.f32 %v3577_v7, %v11691_v50  ;;  %4570 = vmatprep.mubr.bf16.mxu0 %v10979_v10  ;;  %v1936_v50 = vmax.f32 %v11695_v17, %v1737_v20 }
 0x3ac   : > { %v3579_v0 = vpop.f32.mrf.mxu0  ;;  %v3696_v5 = vpop.f32.mrf.mxu1  ;;  %4682 = vmatmul.mubr.bf16.gmra.mxu1 %v10985_v25 }
 0x3ad   : > { %v3580_v58 = vadd.f32 %v3579_v0, %v11694_v60  ;;  %v10993_v49 = vadd.f32 %v3696_v5, %v3578_v19  ;;  %6975 = vmatprep.mubr.msk.bf16.mxu1 %vm2591_vm5, %v10989_v40  ;;  %v11003_v8 = vpack.c.bf16 %v1936_v50, %v1936_v50 }
 0x3ae   : > { %v3581_v7 = vpop.f32.mrf.mxu0  ;;  %v3698_v53 = vpop.f32.mrf.mxu1 }
 0x3af   : > { %v10998_v28 = vadd.f32 %v3698_v53, %v3580_v58 }
 0x3b0   : > { %v3582_v3 = vpop.f32.mrf.mxu0  ;;  %v3700_v2 = vpop.f32.mrf.mxu1 }
 0x3b2   : > { %v3585_v51 = vpop.f32.mrf.mxu0  ;;  %4571 = vmatmul.mubr.bf16.gmra.mxu0 %v11000_v55  ;;  %v3701_v0 = vpop.f32.mrf.mxu1 }
 0x3b3   : > { %v3586_v19 = vadd.f32 %v3585_v51, %v10559_v31  ;;  %4728 = vmatprep.mubr.bf16.mxu0 %v9783_v30 }
 0x3b4   : > { %v3587_v60 = vpop.f32.mrf.mxu0  ;;  %v3704_v5 = vpop.f32.mrf.mxu1  ;;  %4690 = vmatmul.mubr.bf16.gmra.mxu1 %v11003_v8 }
 0x3b5   : > { %v3588_v20 = vadd.f32 %v3587_v60, %v10566_v37  ;;  %v11009_v58 = vadd.f32 %v3704_v5, %v3586_v19  ;;  %6976 = vmatprep.mubr.msk.bf16.mxu1 %vm2591_vm5, %v9807_v4 }
 0x3b6   : > { %v3589_v11 = vpop.f32.mrf.mxu0  ;;  %v3706_v7 = vpop.f32.mrf.mxu1 }
 0x3b7   : > { %v11013_v17 = vadd.f32 %v3706_v7, %v3588_v20 }
 0x3b8   : > { %v3590_v50 = vpop.f32.mrf.mxu0  ;;  %v3708_v31 = vpop.f32.mrf.mxu1 }
 0x3ba   : > { %v3593_v53 = vpop.f32.mrf.mxu0  ;;  %4729 = vmatmul.mubr.bf16.vlgmr.msra.gmra.mxu0 %v9791_v24  ;;  %v3709_v37 = vpop.f32.mrf.mxu1 }
 0x3bb   : > { %v3594_v30 = vadd.f32 %v3593_v53, %v10586_v6  ;;  %4735 = vmatprep.mubr.bf16.mxu0 %v9832_v22 }
 0x3bc   : > { %v3595_v3 = vpop.f32.mrf.mxu0  ;;  %v3712_v51 = vpop.f32.mrf.mxu1  ;;  %4838 = vmatmul.mubr.bf16.vlgmr.msra.gmra.mxu1 %v9805_v42 }
 0x3bd   : > { %v3596_v2 = vadd.f32 %v3595_v3, %v10596_v62  ;;  %v11020_v4 = vadd.f32 %v3712_v51, %v3594_v30  ;;  %6977 = vmatprep.mubr.msk.bf16.mxu1 %vm2591_vm5, %v9858_v29 }
 0x3be   : > { %v3597_v19 = vpop.f32.mrf.mxu0  ;;  %v3714_v0 = vpop.f32.mrf.mxu1 }
 0x3bf   : > { %v11024_v60 = vadd.f32 %v3714_v0, %v3596_v2 }
 0x3c0   : > { %v3598_v24 = vpop.f32.mrf.mxu0  ;;  %v3716_v6 = vpop.f32.mrf.mxu1 }
 0x3c2   : > { %v3601_v20 = vpop.f32.mrf.mxu0  ;;  %4736 = vmatmul.mubr.bf16.gmra.mxu0 %v9841_v34  ;;  %v3717_v22 = vpop.f32.mrf.mxu1 }
 0x3c3   : > { %4742 = vmatprep.mubr.bf16.mxu0 %v9883_v61 }
 0x3c4   : > { %v3602_v62 = vpop.f32.mrf.mxu0  ;;  %v3720_v5 = vpop.f32.mrf.mxu1  ;;  %4845 = vmatmul.mubr.bf16.gmra.mxu1 %v9856_v15 }
 0x3c5   : > { %6978 = vmatprep.mubr.msk.bf16.mxu1 %vm2591_vm5, %v9909_v45 }
 0x3c6   : > { %v3603_v42 = vpop.f32.mrf.mxu0  ;;  %v3721_v29 = vpop.f32.mrf.mxu1 }
 0x3c8   : > { %v3604_v11 = vpop.f32.mrf.mxu0  ;;  %v3722_v7 = vpop.f32.mrf.mxu1 }
 0x3ca   : > { %v7197_v50 = vpop.f32.mrf.mxu0  ;;  %4743 = vmatmul.mubr.bf16.gmra.mxu0 %v9892_v9  ;;  %v3723_v31 = vpop.f32.mrf.mxu1 }
 0x3cb   : > { %4749 = vmatprep.mubr.bf16.mxu0 %v9931_v38 }
 0x3cc   : > { %v7198_v34 = vpop.f32.mrf.mxu0  ;;  %v3868_v61 = vpop.f32.mrf.mxu1  ;;  %4852 = vmatmul.mubr.bf16.gmra.mxu1 %v9907_v41 }
 0x3cd   : > { %v7199_v53 = vadd.f32 %v7198_v34, %v7197_v50  ;;  %6979 = vmatprep.mubr.msk.bf16.mxu1 %vm2591_vm5, %v9950_v47  ;;  %v11696_v47 = vld [vmem:[#allocation31_spill] sm:$0xff] }
 0x3ce   : > { %v7200_v30 = vpop.f32.mrf.mxu0  ;;  %v3870_v45 = vpop.f32.mrf.mxu1 }
 0x3cf   : > { %v3760_v15 = vadd.f32 %v7199_v53, %v10653_v48 }
 0x3d0   : > { %v7201_v37 = vpop.f32.mrf.mxu0  ;;  %v3871_v2 = vpop.f32.mrf.mxu1 }
 0x3d1   : > { %v11037_v3 = vadd.f32 %v3868_v61, %v3760_v15 }
 0x3d2   : > { %v7203_v9 = vpop.f32.mrf.mxu0  ;;  %4750 = vmatmul.mubr.bf16.gmra.mxu0 %v9936_v35  ;;  %v3872_v38 = vpop.f32.mrf.mxu1 }
 0x3d3   : > { %4756 = vmatprep.mubr.bf16.mxu0 %v9969_v63 }
 0x3d4   : > { %v7204_v51 = vpop.f32.mrf.mxu0  ;;  %v3875_v41 = vpop.f32.mrf.mxu1  ;;  %4859 = vmatmul.mubr.bf16.gmra.mxu1 %v9948_v32 }
 0x3d5   : > { %v7205_v19 = vadd.f32 %v7204_v51, %v7203_v9  ;;  %6980 = vmatprep.mubr.msk.bf16.mxu1 %vm2591_vm5, %v9984_v12  ;;  %v11697_v12 = vld [vmem:[#allocation36_spill] sm:$0xff] }
 0x3d6   : > { %v7206_v0 = vpop.f32.mrf.mxu0  ;;  %v3877_v24 = vpop.f32.mrf.mxu1 }
 0x3d7   : > { %v3767_v48 = vadd.f32 %v7205_v19, %v11696_v47 }
 0x3d8   : > { %v7207_v6 = vpop.f32.mrf.mxu0  ;;  %v3878_v22 = vpop.f32.mrf.mxu1 }
 0x3d9   : > { %v11045_v20 = vadd.f32 %v3875_v41, %v3767_v48 }
 0x3da   : > { %v7209_v35 = vpop.f32.mrf.mxu0  ;;  %4757 = vmatmul.mubr.bf16.gmra.mxu0 %v9971_v16  ;;  %v3879_v63 = vpop.f32.mrf.mxu1 }
 0x3db   : > { %4763 = vmatprep.mubr.bf16.mxu0 %v9996_v39 }
 0x3dc   : > { %v7210_v62 = vpop.f32.mrf.mxu0  ;;  %v3882_v32 = vpop.f32.mrf.mxu1  ;;  %4866 = vmatmul.mubr.bf16.gmra.mxu1 %v9982_v57 }
 0x3dd   : > { %v7211_v5 = vadd.f32 %v7210_v62, %v7209_v35  ;;  %6981 = vmatprep.mubr.msk.bf16.mxu1 %vm2591_vm5, %v10011_v27  ;;  %v11698_v27 = vld [vmem:[#allocation34_spill] sm:$0xff] }
 0x3de   : > { %v7212_v42 = vpop.f32.mrf.mxu0  ;;  %v3884_v11 = vpop.f32.mrf.mxu1  ;;  %v11701_v35 = vld [vmem:[#allocation38_spill] sm:$0xff] }
 0x3df   : > { %v3774_v29 = vadd.f32 %v7211_v5, %v11697_v12  ;;  %v11702_v12 = vld [vmem:[#allocation19_spill] sm:$0xff] }
 0x3e0   : > { %v7213_v7 = vpop.f32.mrf.mxu0  ;;  %v3885_v31 = vpop.f32.mrf.mxu1 }
 0x3e1   : > { %v11053_v50 = vadd.f32 %v3882_v32, %v3774_v29  ;;  %v11703_v7 = vld [vmem:[#allocation16_spill] sm:$0xff] }
 0x3e2   : > { %v7215_v16 = vpop.f32.mrf.mxu0  ;;  %4764 = vmatmul.mubr.bf16.gmra.mxu0 %v9998_v52  ;;  %v3886_v39 = vpop.f32.mrf.mxu1 }
 0x3e3   : > { %4770 = vmatprep.mubr.bf16.mxu0 %v10023_v54 }
 0x3e4   : > { %v7216_v34 = vpop.f32.mrf.mxu0  ;;  %v3889_v57 = vpop.f32.mrf.mxu1  ;;  %4873 = vmatmul.mubr.bf16.gmra.mxu1 %v10009_v59 }
 0x3e5   : > { %v7217_v53 = vadd.f32 %v7216_v34, %v7215_v16  ;;  %6982 = vmatprep.mubr.msk.bf16.mxu1 %vm2591_vm5, %v10038_v36  ;;  %v11699_v36 = vld [vmem:[#allocation35_spill] sm:$0xff]  ;;  %v11704_v16 = vld [vmem:[#allocation33_spill] sm:$0xff] }
 0x3e6   : > { %v7218_v61 = vpop.f32.mrf.mxu0  ;;  %v3891_v15 = vpop.f32.mrf.mxu1 }
 0x3e7   : > { %v3781_v30 = vadd.f32 %v7217_v53, %v11698_v27 }
 0x3e8   : > { %v7219_v45 = vpop.f32.mrf.mxu0  ;;  %v3892_v2 = vpop.f32.mrf.mxu1 }
 0x3e9   : > { %v11061_v37 = vadd.f32 %v3889_v57, %v3781_v30 }
 0x3ea   : > { %v7221_v52 = vpop.f32.mrf.mxu0  ;;  %4771 = vmatmul.mubr.bf16.gmra.mxu0 %v10025_v46  ;;  %v3893_v54 = vpop.f32.mrf.mxu1 }
 0x3eb   : > { %4777 = vmatprep.mubr.bf16.mxu0 %v10050_v33 }
 0x3ec   : > { %v7222_v9 = vpop.f32.mrf.mxu0  ;;  %v3896_v59 = vpop.f32.mrf.mxu1  ;;  %4880 = vmatmul.mubr.bf16.gmra.mxu1 %v10036_v18 }
 0x3ed   : > { %v7223_v38 = vadd.f32 %v7222_v9, %v7221_v52  ;;  %6983 = vmatprep.mubr.msk.bf16.mxu1 %vm2591_vm5, %v10065_v23  ;;  %v11700_v23 = vld [vmem:[#allocation18_spill] sm:$0xff] }
 0x3ee   : > { %v7224_v51 = vpop.f32.mrf.mxu0  ;;  %v3898_v41 = vpop.f32.mrf.mxu1 }
 0x3ef   : > { %v3788_v19 = vadd.f32 %v7223_v38, %v11699_v36  ;;  %v11706_v41 = vld [vmem:[#allocation37_spill] sm:$0xff] }
 0x3f0   : > { %v7225_v0 = vpop.f32.mrf.mxu0  ;;  %v3899_v48 = vpop.f32.mrf.mxu1 }
 0x3f1   : > { %v11069_v47 = vadd.f32 %v3896_v59, %v3788_v19 }
 0x3f2   : > { %v7227_v46 = vpop.f32.mrf.mxu0  ;;  %4778 = vmatmul.mubr.bf16.gmra.mxu0 %v10052_v44  ;;  %v3900_v33 = vpop.f32.mrf.mxu1 }
 0x3f3   : > { %4784 = vmatprep.mubr.bf16.mxu0 %v11673_v26 }
 0x3f4   : > { %v7228_v24 = vpop.f32.mrf.mxu0  ;;  %v3903_v18 = vpop.f32.mrf.mxu1  ;;  %4887 = vmatmul.mubr.bf16.gmra.mxu1 %v11646_v56 }
 0x3f5   : > { %v7229_v6 = vadd.f32 %v7228_v24, %v7227_v46  ;;  %6984 = vmatprep.mubr.msk.bf16.mxu1 %vm2591_vm5, %v11700_v23 }
 0x3f6   : > { %v7230_v22 = vpop.f32.mrf.mxu0  ;;  %v3905_v62 = vpop.f32.mrf.mxu1 }
 0x3f7   : > { %v3795_v63 = vadd.f32 %v7229_v6, %v11701_v35  ;;  %v11707_v35 = vld [vmem:[#allocation41_spill] sm:$0xff] }
 0x3f8   : > { %v7231_v5 = vpop.f32.mrf.mxu0  ;;  %v3906_v42 = vpop.f32.mrf.mxu1 }
 0x3f9   : > { %v11077_v32 = vadd.f32 %v3903_v18, %v3795_v63 }
 0x3fa   : > { %v7233_v44 = vpop.f32.mrf.mxu0  ;;  %4785 = vmatmul.mubr.bf16.gmra.mxu0 %v11702_v12  ;;  %v3907_v26 = vpop.f32.mrf.mxu1 }
 0x3fb   : > { %4791 = vmatprep.mubr.bf16.mxu0 %v10953_v13 }
 0x3fc   : > { %v7234_v29 = vpop.f32.mrf.mxu0  ;;  %v3910_v56 = vpop.f32.mrf.mxu1  ;;  %4894 = vmatmul.mubr.bf16.gmra.mxu1 %v11703_v7 }
 0x3fd   : > { %v7235_v11 = vadd.f32 %v7234_v29, %v7233_v44  ;;  %6985 = vmatprep.mubr.msk.bf16.mxu1 %vm2591_vm5, %v10962_v1  ;;  %v11705_v1 = vld [vmem:[#allocation39_spill] sm:$0xff] }
 0x3fe   : > { %v7236_v31 = vpop.f32.mrf.mxu0  ;;  %v3912_v34 = vpop.f32.mrf.mxu1 }
 0x3ff   : > { %v3802_v39 = vadd.f32 %v7235_v11, %v11704_v16 }
 0x400   : > { %v7237_v53 = vpop.f32.mrf.mxu0  ;;  %v3913_v61 = vpop.f32.mrf.mxu1 }
 0x401   : > { %v11085_v57 = vadd.f32 %v3910_v56, %v3802_v39 }
 0x402   : > { %v7239_v27 = vpop.f32.mrf.mxu0  ;;  %4792 = vmatmul.mubr.bf16.gmra.mxu0 %v10976_v14  ;;  %v3914_v13 = vpop.f32.mrf.mxu1 }
 0x403   : > { %4798 = vmatprep.mubr.bf16.mxu0 %v10979_v10 }
 0x404   : > { %v7240_v30 = vpop.f32.mrf.mxu0  ;;  %v3917_v45 = vpop.f32.mrf.mxu1  ;;  %4901 = vmatmul.mubr.bf16.gmra.mxu1 %v10985_v25 }
 0x405   : > { %v7241_v15 = vadd.f32 %v7240_v30, %v7239_v27  ;;  %6986 = vmatprep.mubr.msk.bf16.mxu1 %vm2591_vm5, %v10989_v40  ;;  %v11708_v30 = vld [vmem:[#allocation43_spill] sm:$0xff] }
 0x406   : > { %v7242_v2 = vpop.f32.mrf.mxu0  ;;  %v3919_v54 = vpop.f32.mrf.mxu1 }
 0x407   : > { %v3809_v52 = vadd.f32 %v7241_v15, %v11705_v1  ;;  %v11107_v1 = vld [vmem:[%s11379_s4] sm:$0x7] }
 0x408   : > { %v7243_v9 = vpop.f32.mrf.mxu0  ;;  %v3920_v59 = vpop.f32.mrf.mxu1  ;;  %v11709_v54 = vld [vmem:[#allocation42_spill] sm:$0xff] }
 0x409   : > { %v11093_v38 = vadd.f32 %v3917_v45, %v3809_v52 }
 0x40a   : > { %v7245_v14 = vpop.f32.mrf.mxu0  ;;  %4799 = vmatmul.mubr.bf16.gmra.mxu0 %v11000_v55  ;;  %v3921_v10 = vpop.f32.mrf.mxu1 }
 0x40b   : > { %v11710_v10 = vld [vmem:[#allocation8_spill] sm:$0xff] }
 0x40c   : > { %v7246_v51 = vpop.f32.mrf.mxu0  ;;  %v3924_v19 = vpop.f32.mrf.mxu1  ;;  %4908 = vmatmul.mubr.bf16.gmra.mxu1 %v11003_v8 }
 0x40d   : > { %v7247_v36 = vadd.f32 %v7246_v51, %v7245_v14  ;;  %v11711_v51 = vsub.s32 0, %v11710_v10 }
 0x40e   : > { %v7248_v25 = vpop.f32.mrf.mxu0  ;;  %v3926_v40 = vpop.f32.mrf.mxu1 }
 0x40f   : > { %v3816_v0 = vadd.f32 %v7247_v36, %v11706_v41  ;;  %v11113_v36 = vrot.slane %v11107_v1, %v11711_v51  ;;  %v11712_v41 = vsub.s32 1, %v11710_v10 }
 0x410   : > { %v7249_v48 = vpop.f32.mrf.mxu0  ;;  %v3927_v33 = vpop.f32.mrf.mxu1 }
 0x411   : > { %v11098_v46 = vadd.f32 %v3924_v19, %v3816_v0  ;;  %v11118_v0 = vrot.slane %v11107_v1, %v11712_v41 }
 0x412   : > { %v7251_v24 = vpop.f32.mrf.mxu0  ;;  %v3928_v6 = vpop.f32.mrf.mxu1 }
 0x413   : > { %v11713_v6 = vld [vmem:[#allocation44_spill] sm:$0xff] }
 0x414   : > { %v7252_v18 = vpop.f32.mrf.mxu0  ;;  %v3931_v23 = vpop.f32.mrf.mxu1 }
 0x415   : > { %v7253_v22 = vadd.f32 %v7252_v18, %v7251_v24 }
 0x416   : > { %v7254_v55 = vpop.f32.mrf.mxu0  ;;  %v3933_v62 = vpop.f32.mrf.mxu1 }
 0x417   : > { %v3823_v63 = vadd.f32 %v7253_v22, %v11707_v35  ;;  %v11714_v62 = vld [vmem:[#allocation46_spill] sm:$0xff] }
 0x418   : > { %v7255_v5 = vpop.f32.mrf.mxu0  ;;  %v3934_v8 = vpop.f32.mrf.mxu1 }
 0x419   : > { %v11101_v42 = vadd.f32 %v3931_v23, %v3823_v63 }
 0x41a   : > { %v7257_v44 = vpop.f32.mrf.mxu0  ;;  %v3935_v12 = vpop.f32.mrf.mxu1 }
 0x41c   : > { %v7258_v26 = vpop.f32.mrf.mxu0  ;;  %v3938_v29 = vpop.f32.mrf.mxu1 }
 0x41e   : > { %v7260_v11 = vpop.f32.mrf.mxu0  ;;  %v3939_v56 = vpop.f32.mrf.mxu1 }
 0x420   : > { %v7261_v7 = vpop.f32.mrf.mxu0  ;;  %v3940_v31 = vpop.f32.mrf.mxu1 }
 0x422   : > { %v4492_v16 = vpop.f32.mrf.mxu0  ;;  %v3941_v39 = vpop.f32.mrf.mxu1 }
 0x424   : > { %v4494_v34 = vpop.f32.mrf.mxu0  ;;  %v4611_v53 = vpop.f32.mrf.mxu1 }
 0x425   : > { %v4612_v61 = vadd.f32 %v4611_v53, %v4492_v16 }
 0x426   : > { %v4496_v27 = vpop.f32.mrf.mxu0  ;;  %v4613_v13 = vpop.f32.mrf.mxu1 }
 0x427   : > { %v4914_v15 = vadd.f32 %v4612_v61, %v11708_v30  ;;  %v4614_v45 = vadd.f32 %v4613_v13, %v4494_v34 }
 0x428   : > { %v4497_v2 = vpop.f32.mrf.mxu0  ;;  %v4615_v52 = vpop.f32.mrf.mxu1 }
 0x429   : > { %v4915_v9 = vadd.f32 %v4614_v45, %v11709_v54  ;;  %v4961_v24 = vadd.f32 %v11113_v36, %v4914_v15  ;;  %v11715_v2 = vld [vmem:[#allocation40_spill] sm:$0xff] }
 0x42a   : > { %v4500_v59 = vpop.f32.mrf.mxu0  ;;  %v4616_v14 = vpop.f32.mrf.mxu1 }
 0x42b   : > { %v4962_v35 = vadd.f32 %v11118_v0, %v4915_v9  ;;  %v4991_v12 = vmax.f32 %v4961_v24, 0.0 }
 0x42c   : > { %v4502_v19 = vpop.f32.mrf.mxu0  ;;  %v4619_v25 = vpop.f32.mrf.mxu1 }
 0x42d   : > { %v4620_v40 = vadd.f32 %v4619_v25, %v4500_v59  ;;  %v4992_v7 = vmax.f32 %v4962_v35, 0.0  ;;  %v11716_v59 = vld [vmem:[#allocation47_spill] sm:$0xff] }
 0x42e   : > { %v4504_v48 = vpop.f32.mrf.mxu0  ;;  %v4621_v33 = vpop.f32.mrf.mxu1 }
 0x42f   : > { %v4917_v18 = vadd.f32 %v4620_v40, %v11713_v6  ;;  %v4622_v22 = vadd.f32 %v4621_v33, %v4502_v19  ;;  %v11717_v40 = vld [vmem:[#allocation45_spill] sm:$0xff] }
 0x430   : > { %v4505_v23 = vpop.f32.mrf.mxu0  ;;  %v4623_v55 = vpop.f32.mrf.mxu1 }
 0x431   : > { %v4964_v63 = vadd.f32 %v11113_v36, %v4917_v18  ;;  %v4918_v5 = vadd.f32 %v4622_v22, %v11714_v62  ;;  %v11718_v23 = vld [vmem:[#allocation48_spill] sm:$0xff] }
 0x432   : > { %v4508_v8 = vpop.f32.mrf.mxu0  ;;  %v4624_v44 = vpop.f32.mrf.mxu1 }
 0x433   : > { %v4994_v26 = vmax.f32 %v4964_v63, 0.0  ;;  %v4965_v29 = vadd.f32 %v11118_v0, %v4918_v5 }
 0x434   : > { %v4510_v11 = vpop.f32.mrf.mxu0  ;;  %v4627_v56 = vpop.f32.mrf.mxu1 }
 0x435   : > { %v4995_v31 = vmax.f32 %v4965_v29, 0.0  ;;  %v11126_v39 = vmax.f32 %v4991_v12, %v4994_v26  ;;  %v4628_v53 = vadd.f32 %v4627_v56, %v4508_v8 }
 0x436   : > { %v4512_v16 = vpop.f32.mrf.mxu0  ;;  %v4629_v34 = vpop.f32.mrf.mxu1 }
 0x437   : > { %v11128_v27 = vmax.f32 %v4992_v7, %v4995_v31  ;;  %v4630_v30 = vadd.f32 %v4629_v34, %v4510_v11  ;;  %v4920_v52 = vadd.f32 %v4628_v53, %v11715_v2  ;;  %v11719_v16 = vld [vmem:[#allocation53_spill] sm:$0xff] }
 0x438   : > { %v4513_v61 = vpop.f32.mrf.mxu0  ;;  %v4631_v13 = vpop.f32.mrf.mxu1 }
 0x439   : > { %v4921_v14 = vadd.f32 %v4630_v30, %v11716_v59  ;;  %v4967_v41 = vadd.f32 %v11113_v36, %v4920_v52 }
 0x43a   : > { %v4516_v15 = vpop.f32.mrf.mxu0  ;;  %v4632_v45 = vpop.f32.mrf.mxu1 }
 0x43b   : > { %v4968_v18 = vadd.f32 %v11118_v0, %v4921_v14  ;;  %v4997_v62 = vmax.f32 %v4967_v41, 0.0  ;;  %v11721_v41 = vld [vmem:[#allocation51_spill] sm:$0xff] }
 0x43c   : > { %v4518_v54 = vpop.f32.mrf.mxu0  ;;  %v4635_v9 = vpop.f32.mrf.mxu1 }
 0x43d   : > { %v4636_v51 = vadd.f32 %v4635_v9, %v4516_v15  ;;  %v4998_v26 = vmax.f32 %v4968_v18, 0.0  ;;  %v11720_v15 = vld [vmem:[#allocation50_spill] sm:$0xff] }
 0x43e   : > { %v4520_v19 = vpop.f32.mrf.mxu0  ;;  %v4637_v25 = vpop.f32.mrf.mxu1 }
 0x43f   : > { %v4923_v48 = vadd.f32 %v4636_v51, %v11717_v40  ;;  %v4638_v33 = vadd.f32 %v4637_v25, %v4518_v54 }
 0x440   : > { %v4521_v24 = vpop.f32.mrf.mxu0  ;;  %v4639_v6 = vpop.f32.mrf.mxu1 }
 0x441   : > { %v4970_v22 = vadd.f32 %v11113_v36, %v4923_v48  ;;  %v4924_v55 = vadd.f32 %v4638_v33, %v11718_v23 }
 0x442   : > { %v4524_v35 = vpop.f32.mrf.mxu0  ;;  %v4640_v63 = vpop.f32.mrf.mxu1 }
 0x443   : > { %v5000_v5 = vmax.f32 %v4970_v22, 0.0  ;;  %v4971_v8 = vadd.f32 %v11118_v0, %v4924_v55  ;;  %v11722_v22 = vld [vmem:[#allocation54_spill] sm:$0xff] }
 0x444   : > { %v4526_v44 = vpop.f32.mrf.mxu0  ;;  %v4643_v12 = vpop.f32.mrf.mxu1 }
 0x445   : > { %v5001_v29 = vmax.f32 %v4971_v8, 0.0  ;;  %v4644_v11 = vadd.f32 %v4643_v12, %v4524_v35  ;;  %v11138_v7 = vmax.f32 %v4997_v62, %v5000_v5 }
 0x446   : > { %v4528_v56 = vpop.f32.mrf.mxu0  ;;  %v4645_v31 = vpop.f32.mrf.mxu1 }
 0x447   : > { %v4926_v34 = vadd.f32 %v4644_v11, %v11719_v16  ;;  %v4646_v53 = vadd.f32 %v4645_v31, %v4526_v44  ;;  %v11141_v13 = vmax.f32 %v4998_v26, %v5001_v29 }
 0x448   : > { %v4529_v61 = vpop.f32.mrf.mxu0  ;;  %v4647_v30 = vpop.f32.mrf.mxu1 }
 0x449   : > { %v4927_v45 = vadd.f32 %v4646_v53, %v11720_v15  ;;  %v7942_v52 = vpack.i.bf16 %v11141_v13, %v11138_v7  ;;  %v4973_v25 = vadd.f32 %v11113_v36, %v4926_v34 }
 0x44a   : > { %v4532_v2 = vpop.f32.mrf.mxu0  ;;  %v4648_v54 = vpop.f32.mrf.mxu1 }
 0x44b   : > { %7943 = vrot.lane.b32.xlu0 %v7942_v52, %s8540_s16  ;;  %v4974_v6 = vadd.f32 %v11118_v0, %v4927_v45  ;;  %v5003_v63 = vmax.f32 %v4973_v25, 0.0 }
 0x44c   : > { %v4534_v9 = vpop.f32.mrf.mxu0  ;;  %v4651_v59 = vpop.f32.mrf.mxu1 }
 0x44d   : > { %v4652_v14 = vadd.f32 %v4651_v59, %v4532_v2  ;;  %v5004_v12 = vmax.f32 %v4974_v6, 0.0  ;;  %v8311_v6 = vld [vmem:[#allocation2 + $0x78] sm:$0xff]  }
 0x44e   : > { %v4536_v51 = vpop.f32.mrf.mxu0  ;;  %v4653_v19 = vpop.f32.mrf.mxu1  ;;  %7345 = vmatprep.subr.bf16.mxu0 %v8311_v6 }
 0x44f   : > { %v4929_v40 = vadd.f32 %v4652_v14, %v11721_v41  ;;  %v4654_v48 = vadd.f32 %v4653_v19, %v4534_v9 }
 0x450   : > { %v4537_v33 = vpop.f32.mrf.mxu0  ;;  %v4655_v24 = vpop.f32.mrf.mxu1 }
 0x451   : > { %v4976_v18 = vadd.f32 %v11113_v36, %v4929_v40  ;;  %v4930_v23 = vadd.f32 %v4654_v48, %v11722_v22 }
 0x452   : > { %v4540_v55 = vpop.f32.mrf.mxu0  ;;  %v4656_v35 = vpop.f32.mrf.mxu1 }
 0x453   : > { %v5006_v62 = vmax.f32 %v4976_v18, 0.0  ;;  %v4977_v5 = vadd.f32 %v11118_v0, %v4930_v23  ;;  %v8312_v18 = vld [vmem:[#allocation2 + $0x38] sm:$0xff]  }
 0x454   : > { %v4542_v8 = vpop.f32.mrf.mxu0  ;;  %v4659_v44 = vpop.f32.mrf.mxu1  ;;  %7346 = vmatpush3.bf16.msra.mxu0 %v8312_v18 }
 0x455   : > { %v5007_v26 = vmax.f32 %v4977_v5, 0.0  ;;  %v11153_v11 = vmax.f32 %v5003_v63, %v5006_v62  ;;  %v4660_v31 = vadd.f32 %v4659_v44, %v4540_v55  ;;  %v8314_v62 = vld [vmem:[#allocation2 + $0x30] sm:$0xff]  }
 0x456   : > { %v4544_v29 = vpop.f32.mrf.mxu0  ;;  %v4661_v56 = vpop.f32.mrf.mxu1 }
 0x457   : > { %v11155_v34 = vmax.f32 %v5004_v12, %v5007_v26  ;;  %v4662_v61 = vadd.f32 %v4661_v56, %v4542_v8  ;;  %v4932_v45 = vadd.f32 %v4660_v31, %v10967_v21 }
 0x458   : > { %v4545_v16 = vpop.f32.mrf.mxu0  ;;  %v4663_v53 = vpop.f32.mrf.mxu1 }
 0x459   : > { %v4933_v54 = vadd.f32 %v4662_v61, %v10973_v43  ;;  %v4979_v51 = vadd.f32 %v11113_v36, %v4932_v45  ;;  %v8313_v43 = vld [vmem:[#allocation2 + $0x70] sm:$0xff]  }
 0x45a   : > { %v4548_v30 = vpop.f32.mrf.mxu0  ;;  %v4664_v15 = vpop.f32.mrf.mxu1  ;;  %7347 = vmatprep.subr.bf16.mxu0 %v8313_v43 }
 0x45b   : > { %v4980_v48 = vadd.f32 %v11118_v0, %v4933_v54  ;;  %v5009_v23 = vmax.f32 %v4979_v51, 0.0  ;;  %7348 = vmatpush3.bf16.msra.mxu0 %v8314_v62 }
 0x45c   : > { %v4550_v2 = vpop.f32.mrf.mxu0  ;;  %v4667_v52 = vpop.f32.mrf.mxu1 }
 0x45d   : > { %v4668_v9 = vadd.f32 %v4667_v52, %v4548_v30  ;;  %v5010_v5 = vmax.f32 %v4980_v48, 0.0  ;;  %v8316_v30 = vld [vmem:[#allocation2 + $0x28] sm:$0xff]   ;;  %v8317_v52 = vld [vmem:[#allocation2 + $0x60] sm:$0xff]  }
 0x45e   : > { %v4552_v59 = vpop.f32.mrf.mxu0  ;;  %v4669_v14 = vpop.f32.mrf.mxu1 }
 0x45f   : > { %v4935_v19 = vadd.f32 %v4668_v9, %v10993_v49  ;;  %v4670_v25 = vadd.f32 %v4669_v14, %v4550_v2  ;;  %v8318_v59 = vld [vmem:[#allocation2 + $0x20] sm:$0xff]  }
 0x460   : > { %v4553_v41 = vpop.f32.mrf.mxu0  ;;  %v4671_v40 = vpop.f32.mrf.mxu1 }
 0x461   : > { %v4982_v33 = vadd.f32 %v11113_v36, %v4935_v19  ;;  %v4936_v21 = vadd.f32 %v4670_v25, %v10998_v28  ;;  %v8315_v28 = vld [vmem:[#allocation2 + $0x68] sm:$0xff]   ;;  %v8319_v19 = vld [vmem:[#allocation2 + $0x58] sm:$0xff]  }
 0x462   : > { %v4556_v24 = vpop.f32.mrf.mxu0  ;;  %v4672_v22 = vpop.f32.mrf.mxu1  ;;  %7349 = vmatprep.subr.bf16.mxu0 %v8315_v28 }
 0x463   : > { %v5012_v55 = vmax.f32 %v4982_v33, 0.0  ;;  %v4983_v35 = vadd.f32 %v11118_v0, %v4936_v21  ;;  %7350 = vmatpush3.bf16.msra.mxu0 %v8316_v30  ;;  %v8320_v21 = vld [vmem:[#allocation2 + $0x18] sm:$0xff]  }
 0x464   : > { %v4558_v63 = vpop.f32.mrf.mxu0  ;;  %v4675_v49 = vpop.f32.mrf.mxu1  ;;  %7351 = vmatprep.subr.bf16.mxu0 %v8317_v52 }
 0x465   : > { %v5013_v8 = vmax.f32 %v4983_v35, 0.0  ;;  %v4676_v44 = vadd.f32 %v4675_v49, %v4556_v24  ;;  %v11165_v26 = vmax.f32 %v5009_v23, %v5012_v55 }
 0x466   : > { %v4560_v12 = vpop.f32.mrf.mxu0  ;;  %v4677_v29 = vpop.f32.mrf.mxu1 }
 0x467   : > { %v4938_v56 = vadd.f32 %v4676_v44, %v11009_v58  ;;  %v4678_v31 = vadd.f32 %v4677_v29, %v4558_v63  ;;  %v11168_v53 = vmax.f32 %v5010_v5, %v5013_v8  ;;  %7352 = vmatpush3.bf16.msra.mxu0 %v8318_v59 }
 0x468   : > { %v4561_v16 = vpop.f32.mrf.mxu0  ;;  %v4679_v61 = vpop.f32.mrf.mxu1  ;;  %7353 = vmatprep.subr.bf16.mxu0 %v8319_v19 }
 0x469   : > { %v4939_v15 = vadd.f32 %v4678_v31, %v11013_v17  ;;  %v7947_v2 = vpack.i.bf16 %v11168_v53, %v11165_v26  ;;  %v4985_v17 = vadd.f32 %v11113_v36, %v4938_v56 }
 0x46a   : > { %v4564_v45 = vpop.f32.mrf.mxu0  ;;  %v4680_v54 = vpop.f32.mrf.mxu1 }
 0x46b   : > { %7948 = vrot.lane.b32.xlu0 %v7947_v2, %s8540_s16  ;;  %v4986_v24 = vadd.f32 %v11118_v0, %v4939_v15  ;;  %v5015_v23 = vmax.f32 %v4985_v17, 0.0  ;;  %7354 = vmatpush3.bf16.msra.mxu0 %v8320_v21 }
 0x46c   : > { %v4566_v9 = vpop.f32.mrf.mxu0  ;;  %v4683_v58 = vpop.f32.mrf.mxu1 }
 0x46d   : > { %v4684_v14 = vadd.f32 %v4683_v58, %v4564_v45  ;;  %v5016_v49 = vmax.f32 %v4986_v24, 0.0  ;;  %v11723_v58 = vsub.s32 2, %v11710_v10 }
 0x46e   : > { %v4568_v51 = vpop.f32.mrf.mxu0  ;;  %v4685_v25 = vpop.f32.mrf.mxu1 }
 0x46f   : > { %v4941_v41 = vadd.f32 %v4684_v14, %v11020_v4  ;;  %v4686_v40 = vadd.f32 %v4685_v25, %v4566_v9  ;;  %5051 = vrot.lane.b32.xlu0 %v11126_v39, %s8540_s16  ;;  %v11190_v59 = vrot.slane %v11107_v1, %v11723_v58 }
 0x470   : > { %v4569_v48 = vpop.f32.mrf.mxu0  ;;  %v4687_v33 = vpop.f32.mrf.mxu1 }
 0x471   : > { %v4988_v6 = vadd.f32 %v11113_v36, %v4941_v41  ;;  %v4942_v18 = vadd.f32 %v4686_v40, %v11024_v60 }
 0x472   : > { %v4572_v43 = vpop.f32.mrf.mxu0  ;;  %v4688_v22 = vpop.f32.mrf.mxu1 }
 0x473   : > { %v5018_v55 = vmax.f32 %v4988_v6, 0.0  ;;  %v4989_v4 = vadd.f32 %v11118_v0, %v4942_v18 }
 0x474   : > { %v4573_v35 = vpop.f32.mrf.mxu0  ;;  %v4691_v63 = vpop.f32.mrf.mxu1 }
 0x475   : > { %v5019_v62 = vmax.f32 %v4989_v4, 0.0  ;;  %v11182_v8 = vmax.f32 %v5015_v23, %v5018_v55 }
 0x476   : > { %v4574_v5 = vpop.f32.mrf.mxu0  ;;  %v4692_v44 = vpop.f32.mrf.mxu1 }
 0x477   : > { %v11184_v36 = vmax.f32 %v5016_v49, %v5019_v62 }
 0x478   : > { %v4575_v12 = vpop.f32.mrf.mxu0  ;;  %v4693_v60 = vpop.f32.mrf.mxu1 }
 0x479   : > { %v8321_v60 = vld [vmem:[#allocation2 + $0x50] sm:$0xff]  }
 0x47a   : > { %v7279_v28 = vpop.f32.mrf.mxu0  ;;  %v4694_v29 = vpop.f32.mrf.mxu1  ;;  %7355 = vmatprep.subr.bf16.mxu0 %v8321_v60 }
 0x47c   : > { %v7280_v56 = vpop.f32.mrf.mxu0  ;;  %v4839_v16 = vpop.f32.mrf.mxu1 }
 0x47d   : > { %v7281_v31 = vadd.f32 %v7280_v56, %v7279_v28  ;;  %v8322_v28 = vld [vmem:[#allocation2 + $0x10] sm:$0xff]  }
 0x47e   : > { %v7282_v61 = vpop.f32.mrf.mxu0  ;;  %v4841_v0 = vpop.f32.mrf.mxu1  ;;  %7356 = vmatpush3.bf16.msra.mxu0 %v8322_v28 }
 0x47f   : > { %v4840_v15 = vadd.f32 %v7281_v31, %v4839_v16 }
 0x480   : > { %v7283_v30 = vpop.f32.mrf.mxu0  ;;  %v4842_v45 = vpop.f32.mrf.mxu1 }
 0x481   : > { %v4916_v9 = vadd.f32 %v4840_v15, %v11037_v3  ;;  %v8323_v45 = vld [vmem:[#allocation2 + $0x48] sm:$0xff]  }
 0x482   : > { %v7285_v2 = vpop.f32.mrf.mxu0  ;;  %v4843_v52 = vpop.f32.mrf.mxu1  ;;  %7357 = vmatprep.subr.bf16.mxu0 %v8323_v45 }
 0x483   : > { %v4963_v40 = vadd.f32 %v11190_v59, %v4916_v9  ;;  %v8324_v52 = vld [vmem:[#allocation2 + $0x8] sm:$0xff]  }
 0x484   : > { %v7286_v54 = vpop.f32.mrf.mxu0  ;;  %v4846_v51 = vpop.f32.mrf.mxu1  ;;  %7358 = vmatpush3.bf16.msra.mxu0 %v8324_v52 }
 0x485   : > { %v7287_v14 = vadd.f32 %v7286_v54, %v7285_v2  ;;  %v4993_v10 = vmax.f32 %v4963_v40, 0.0 }
 0x486   : > { %v7288_v19 = vpop.f32.mrf.mxu0  ;;  %v4848_v17 = vpop.f32.mrf.mxu1 }
 0x487   : > { %v4847_v25 = vadd.f32 %v7287_v14, %v4846_v51  ;;  %v8325_v19 = vld [vmem:[#allocation2 + $0x40] sm:$0xff]  }
 0x488   : > { %v7289_v41 = vpop.f32.mrf.mxu0  ;;  %v4849_v33 = vpop.f32.mrf.mxu1  ;;  %7359 = vmatprep.subr.bf16.mxu0 %v8325_v19 }
 0x489   : > { %v4919_v48 = vadd.f32 %v4847_v25, %v11045_v20  ;;  %v8326_v25 = vld [vmem:[#allocation2] sm:$0xff]  }
 0x48a   : > { %v7291_v21 = vpop.f32.mrf.mxu0  ;;  %v4850_v3 = vpop.f32.mrf.mxu1  ;;  %7360 = vmatpush3.bf16.msra.mxu0 %v8326_v25 }
 0x48b   : > { %v4966_v24 = vadd.f32 %v11190_v59, %v4919_v48 }
 0x48c   : > { %v7292_v6 = vpop.f32.mrf.mxu0  ;;  %v4853_v43 = vpop.f32.mrf.mxu1 }
 0x48d   : > { %v4996_v18 = vmax.f32 %v4966_v24, 0.0  ;;  %v7293_v1 = vadd.f32 %v7292_v6, %v7291_v21 }
 0x48e   : > { %v7294_v22 = vpop.f32.mrf.mxu0  ;;  %v4855_v23 = vpop.f32.mrf.mxu1 }
 0x48f   : > { %v11195_v55 = vmax.f32 %v4993_v10, %v4996_v18  ;;  %v4854_v35 = vadd.f32 %v7293_v1, %v4853_v43 }
 0x490   : > { %v7295_v4 = vpop.f32.mrf.mxu0  ;;  %v4856_v63 = vpop.f32.mrf.mxu1 }
 0x491   : > { %v4922_v5 = vadd.f32 %v4854_v35, %v11053_v50  ;;  %v7952_v3 = vpack.i.bf16 %v11195_v55, %v11128_v27 }
 0x492   : > { %v7297_v49 = vpop.f32.mrf.mxu0  ;;  %v4857_v62 = vpop.f32.mrf.mxu1 }
 0x493   : > { %v4969_v61 = vadd.f32 %v11190_v59, %v4922_v5 }
 0x494   : > { %v7298_v20 = vpop.f32.mrf.mxu0  ;;  %v4860_v12 = vpop.f32.mrf.mxu1 }
 0x495   : > { %v7299_v44 = vadd.f32 %v7298_v20, %v7297_v49  ;;  %v4999_v9 = vmax.f32 %v4969_v61, 0.0 }
 0x496   : > { %v7300_v29 = vpop.f32.mrf.mxu0  ;;  %v4862_v31 = vpop.f32.mrf.mxu1 }
 0x497   : > { %v4861_v56 = vadd.f32 %v7299_v44, %v4860_v12 }
 0x498   : > { %v7301_v16 = vpop.f32.mrf.mxu0  ;;  %v4863_v30 = vpop.f32.mrf.mxu1 }
 0x499   : > { %v4925_v0 = vadd.f32 %v4861_v56, %v11061_v37 }
 0x49a   : > { %v7303_v15 = vpop.f32.mrf.mxu0  ;;  %v4864_v50 = vpop.f32.mrf.mxu1 }
 0x49b   : > { %v4972_v2 = vadd.f32 %v11190_v59, %v4925_v0 }
 0x49c   : > { %v7304_v54 = vpop.f32.mrf.mxu0  ;;  %v4867_v51 = vpop.f32.mrf.mxu1 }
 0x49d   : > { %v5002_v58 = vmax.f32 %v4972_v2, 0.0  ;;  %v7305_v14 = vadd.f32 %v7304_v54, %v7303_v15 }
 0x49e   : > { %v7306_v17 = vpop.f32.mrf.mxu0  ;;  %v4869_v41 = vpop.f32.mrf.mxu1 }
 0x49f   : > { %v11201_v40 = vmax.f32 %v4999_v9, %v5002_v58  ;;  %v4868_v48 = vadd.f32 %v7305_v14, %v4867_v51  ;;  %v8327_v14 = vld [vmem:[#allocation2 + $0xf8] sm:$0xff]  }
 0x4a0   : > { %v7307_v37 = vpop.f32.mrf.mxu0  ;;  %v4870_v33 = vpop.f32.mrf.mxu1  ;;  %v8328_v17 = vld [vmem:[#allocation2 + $0xb8] sm:$0xff]   ;;  %7367 = vmatprep.subr.bf16.mxu1 %v8327_v14 }
 0x4a1   : > { %5061 = vrot.lane.b32.xlu1 %v11201_v40, %s8540_s16  ;;  %v4928_v10 = vadd.f32 %v4868_v48, %v11069_v47  ;;  %7368 = vmatpush3.bf16.msra.mxu1 %v8328_v17  ;;  %v8344_v17 = vld [vmem:[#allocation2 + $0xc8] sm:$0xff]  }
 0x4a2   : > { %v7309_v21 = vpop.f32.mrf.mxu0  ;;  %v4871_v24 = vpop.f32.mrf.mxu1 }
 0x4a3   : > { %v4975_v35 = vadd.f32 %v11190_v59, %v4928_v10 }
 0x4a4   : > { %v7310_v6 = vpop.f32.mrf.mxu0  ;;  %v4874_v1 = vpop.f32.mrf.mxu1 }
 0x4a5   : > { %v7311_v18 = vadd.f32 %v7310_v6, %v7309_v21  ;;  %7953 = vrot.lane.b32.xlu1 %v7952_v3, %s8540_s16  ;;  %v5005_v12 = vmax.f32 %v4975_v35, 0.0 }
 0x4a6   : > { %v7312_v43 = vpop.f32.mrf.mxu0  ;;  %v4876_v23 = vpop.f32.mrf.mxu1 }
 0x4a7   : > { %v4875_v22 = vadd.f32 %v7311_v18, %v4874_v1  ;;  %v8329_v43 = vld [vmem:[#allocation2 + $0xf0] sm:$0xff]  }
 0x4a8   : > { %v7313_v4 = vpop.f32.mrf.mxu0  ;;  %v4877_v49 = vpop.f32.mrf.mxu1  ;;  %7369 = vmatprep.subr.bf16.mxu1 %v8329_v43 }
 0x4a9   : > { %v4931_v63 = vadd.f32 %v4875_v22, %v11077_v32  ;;  %v8331_v22 = vld [vmem:[#allocation2 + $0xe8] sm:$0xff]  }
 0x4aa   : > { %v7315_v62 = vpop.f32.mrf.mxu0  ;;  %v4878_v5 = vpop.f32.mrf.mxu1  ;;  %v8332_v49 = vld [vmem:[#allocation2 + $0xa8] sm:$0xff]  }
 0x4ab   : > { %v4978_v20 = vadd.f32 %v11190_v59, %v4931_v63  ;;  %v7962_v5 = vpack.i.bf16 %v11155_v34, %v11153_v11 }
 0x4ac   : > { %v7316_v44 = vpop.f32.mrf.mxu0  ;;  %v4881_v28 = vpop.f32.mrf.mxu1 }
 0x4ad   : > { %v5008_v47 = vmax.f32 %v4978_v20, 0.0  ;;  %v7317_v60 = vadd.f32 %v7316_v44, %v7315_v62  ;;  %v8339_v62 = vld [vmem:[#allocation2 + $0x178] sm:$0xff]   ;;  %v8333_v44 = vld [vmem:[#allocation2 + $0xe0] sm:$0xff]  }
 0x4ae   : > { %v7318_v29 = vpop.f32.mrf.mxu0  ;;  %v4883_v56 = vpop.f32.mrf.mxu1  ;;  %7389 = vmatprep.subr.bf16.mxu0 %v8339_v62 }
 0x4af   : > { %v11212_v31 = vmax.f32 %v5005_v12, %v5008_v47  ;;  %v4882_v61 = vadd.f32 %v7317_v60, %v4881_v28  ;;  %v8334_v28 = vld [vmem:[#allocation2 + $0xa0] sm:$0xff]  }
 0x4b0   : > { %v7319_v16 = vpop.f32.mrf.mxu0  ;;  %v4884_v0 = vpop.f32.mrf.mxu1 }
 0x4b1   : > { %v4934_v45 = vadd.f32 %v4882_v61, %v11085_v57  ;;  %v8335_v16 = vld [vmem:[#allocation2 + $0xd8] sm:$0xff]  }
 0x4b2   : > { %v7321_v30 = vpop.f32.mrf.mxu0  ;;  %v4885_v15 = vpop.f32.mrf.mxu1 }
 0x4b3   : > { %v4981_v51 = vadd.f32 %v11190_v59, %v4934_v45  ;;  %v8336_v45 = vld [vmem:[#allocation2 + $0x98] sm:$0xff]  }
 0x4b4   : > { %v7322_v32 = vpop.f32.mrf.mxu0  ;;  %v4888_v50 = vpop.f32.mrf.mxu1 }
 0x4b5   : > { %v7323_v2 = vadd.f32 %v7322_v32, %v7321_v30  ;;  %v5011_v33 = vmax.f32 %v4981_v51, 0.0 }
 0x4b6   : > { %v7324_v52 = vpop.f32.mrf.mxu0  ;;  %v4890_v9 = vpop.f32.mrf.mxu1 }
 0x4b7   : > { %v4889_v54 = vadd.f32 %v7323_v2, %v4888_v50  ;;  %v8337_v52 = vld [vmem:[#allocation2 + $0xd0] sm:$0xff]  }
 0x4b8   : > { %v7325_v58 = vpop.f32.mrf.mxu0  ;;  %v4891_v25 = vpop.f32.mrf.mxu1 }
 0x4b9   : > { %v4937_v19 = vadd.f32 %v4889_v54, %v11093_v38  ;;  %v8330_v38 = vld [vmem:[#allocation2 + $0xb0] sm:$0xff]  }
 0x4ba   : > { %v7327_v41 = vpop.f32.mrf.mxu0  ;;  %v4892_v48 = vpop.f32.mrf.mxu1  ;;  %7370 = vmatpush3.bf16.msra.mxu1 %v8330_v38 }
 0x4bb   : > { %v4984_v37 = vadd.f32 %v11190_v59, %v4937_v19  ;;  %7371 = vmatprep.subr.bf16.mxu1 %v8331_v22  ;;  %v8338_v19 = vld [vmem:[#allocation2 + $0x90] sm:$0xff]   ;;  %v8346_v48 = vld [vmem:[#allocation2 + $0x88] sm:$0xff]  }
 0x4bc   : > { %v7328_v57 = vpop.f32.mrf.mxu0  ;;  %v4895_v3 = vpop.f32.mrf.mxu1 }
 0x4bd   : > { %v5014_v21 = vmax.f32 %v4984_v37, 0.0  ;;  %v7329_v24 = vadd.f32 %v7328_v57, %v7327_v41  ;;  %v8351_v57 = vld [vmem:[#allocation2 + $0xc0] sm:$0xff]  }
 0x4be   : > { %v7330_v6 = vpop.f32.mrf.mxu0  ;;  %v4897_v18 = vpop.f32.mrf.mxu1  ;;  %7372 = vmatpush3.bf16.msra.mxu1 %v8332_v49 }
 0x4bf   : > { %v4896_v10 = vadd.f32 %v7329_v24, %v4895_v3  ;;  %v11218_v1 = vmax.f32 %v5011_v33, %v5014_v21  ;;  %7373 = vmatprep.subr.bf16.mxu1 %v8333_v44  ;;  %v8353_v33 = vld [vmem:[#allocation2 + $0x80] sm:$0xff]   ;;  %v7944_v21 = vpop.permute.xlu0 %7943  ;;  %v8359_v6 = vld [vmem:[#allocation2 + $0x1f8] sm:$0xff]  }
 0x4c0   : > { %v7331_v23 = vpop.f32.mrf.mxu0  ;;  %v4898_v35 = vpop.f32.mrf.mxu1  ;;  %v7946_v24 = vunpack.i.h.bf16 %v7944_v21  ;;  %v7945_v3 = vunpack.i.l.bf16 %v7944_v21 }
 0x4c1   : > { %v4940_v4 = vadd.f32 %v4896_v10, %v11098_v46  ;;  %5073 = vrot.lane.b32.xlu1 %v11218_v1, %s8540_s16 }
 0x4c2   : > { %v7333_v63 = vpop.f32.mrf.mxu0  ;;  %v4899_v20 = vpop.f32.mrf.mxu1  ;;  %7374 = vmatpush3.bf16.msra.mxu1 %v8334_v28  ;;  %v5084_v10 = vsel %vm5081_vm6, %v7945_v3, %v7946_v24 }
 0x4c3   : > { %v4987_v0 = vadd.f32 %v11190_v59, %v4940_v4  ;;  %7375 = vmatprep.subr.bf16.mxu1 %v8335_v16  ;;  %v5110_v23 = vmax.f32 %v11138_v7, %v5084_v10 }
 0x4c4   : > { %v7334_v12 = vpop.f32.mrf.mxu0  ;;  %v4902_v60 = vpop.f32.mrf.mxu1 }
 0x4c5   : > { %v7335_v47 = vadd.f32 %v7334_v12, %v7333_v63  ;;  %7963 = vrot.lane.b32.xlu1 %v7962_v5, %s8540_s16  ;;  %v5017_v9 = vmax.f32 %v4987_v0, 0.0  ;;  %v8347_v0 = vld [vmem:[#allocation2 + $0x160] sm:$0xff]  }
 0x4c6   : > { %v7336_v46 = vpop.f32.mrf.mxu0  ;;  %v4904_v56 = vpop.f32.mrf.mxu1  ;;  %7376 = vmatpush3.bf16.msra.mxu1 %v8336_v45  ;;  %v8354_v45 = vld [vmem:[#allocation2 + $0x110] sm:$0xff]  }
 0x4c7   : > { %v4903_v29 = vadd.f32 %v7335_v47, %v4902_v60  ;;  %7377 = vmatprep.subr.bf16.mxu1 %v8337_v52  ;;  %v8341_v56 = vld [vmem:[#allocation2 + $0x170] sm:$0xff]  }
 0x4c8   : > { %v7337_v61 = vpop.f32.mrf.mxu0  ;;  %v4905_v15 = vpop.f32.mrf.mxu1 }
 0x4c9   : > { %v4943_v30 = vadd.f32 %v4903_v29, %v11101_v42  ;;  %5067 = vrot.lane.b32.xlu1 %v11212_v31, %s8540_s16  ;;  %v8340_v29 = vld [vmem:[#allocation2 + $0x138] sm:$0xff]   ;;  %v8345_v61 = vld [vmem:[#allocation2 + $0x128] sm:$0xff]  }
 0x4ca   : > { %v7339_v32 = vpop.f32.mrf.mxu0  ;;  %v4906_v50 = vpop.f32.mrf.mxu1  ;;  %7378 = vmatpush3.bf16.msra.mxu1 %v8338_v19  ;;  %v8350_v15 = vld [vmem:[#allocation2 + $0x118] sm:$0xff]  }
 0x4cb   : > { %v4990_v2 = vadd.f32 %v11190_v59, %v4943_v30  ;;  %7379 = vmatprep.subr.bf16.mxu1 %v8344_v17  ;;  %v8348_v30 = vld [vmem:[#allocation2 + $0x120] sm:$0xff]   ;;  %v8352_v32 = vld [vmem:[#allocation2 + $0x150] sm:$0xff]  }
 0x4cc   : > { %v7340_v54 = vpop.f32.mrf.mxu0  ;;  %v4909_v14 = vpop.f32.mrf.mxu1 }
 0x4cd   : > { %v5020_v58 = vmax.f32 %v4990_v2, 0.0  ;;  %v8355_v2 = vld [vmem:[#allocation2 + $0x148] sm:$0xff]   ;;  %v8357_v14 = vld [vmem:[#allocation2 + $0x140] sm:$0xff]  }
 0x4ce   : > { %v7342_v51 = vpop.f32.mrf.mxu0  ;;  %v4910_v42 = vpop.f32.mrf.mxu1  ;;  %7380 = vmatpush3.bf16.msra.mxu1 %v8346_v48 }
 0x4cf   : > { %v11231_v25 = vmax.f32 %v5017_v9, %v5020_v58  ;;  %7381 = vmatprep.subr.bf16.mxu1 %v8351_v57  ;;  %v8356_v58 = vld [vmem:[#allocation2 + $0x108] sm:$0xff]  }
 0x4d0   : > { %v7343_v41 = vpop.f32.mrf.mxu0  ;;  %v4911_v37 = vpop.f32.mrf.mxu1 }
 0x4d1   : > { %v8358_v41 = vld [vmem:[#allocation2 + $0x100] sm:$0xff]  }
 0x4d2   : > { %v4912_v59 = vpop.f32.mrf.mxu1  ;;  %7382 = vmatpush3.bf16.msra.mxu1 %v8353_v33 }
 0x4d3   : > { %7411 = vmatprep.subr.bf16.mxu1 %v8359_v6 }
 0x4dd   : > { %v7949_v18 = vpop.permute.xlu0 %7948 }
 0x4de   : > { %v7951_v63 = vunpack.i.h.bf16 %v7949_v18  ;;  %v7950_v49 = vunpack.i.l.bf16 %v7949_v18 }
 0x4e0   : > { %v5088_v60 = vsel %vm5081_vm6, %v7950_v49, %v7951_v63  ;;  %v8364_v49 = vld [vmem:[#allocation2 + $0x1b0] sm:$0xff]  }
 0x4e1   : > { %v5052_v5 = vpop.permute.xlu0 %5051  ;;  %v5116_v16 = vmax.f32 %v11165_v26, %v5088_v60  ;;  %v8349_v26 = vld [vmem:[#allocation2 + $0x158] sm:$0xff]   ;;  %v8372_v60 = vld [vmem:[#allocation2 + $0x1a0] sm:$0xff]  }
 0x513   : > { %v5062_v43 = vpop.permute.xlu1 %5061 }
 0x514   : > { %v5085_v38 = vsel %vm5081_vm6, %v7946_v24, %v5062_v43  ;;  %v5112_v7 = vmax.f32 %v11201_v40, %v5062_v43  ;;  %v8342_v40 = vld [vmem:[#allocation2 + $0x130] sm:$0xff]   ;;  %v8360_v43 = vld [vmem:[#allocation2 + $0x1b8] sm:$0xff]  }
 0x515   : > { %v5111_v22 = vmax.f32 %v11141_v13, %v5085_v38 }
 0x517   : > { %v11237_v4 = vpop.permute.xlu1 %7953  ;;  %v7957_v35 = vpack.i.bf16 %v5111_v22, %v5110_v23  ;;  %v8362_v22 = vld [vmem:[#allocation2 + $0x238] sm:$0xff]   ;;  %v8363_v23 = vld [vmem:[#allocation2 + $0x1f0] sm:$0xff]  }
 0x518   : > { %v7956_v62 = vunpack.i.h.bf16 %v11237_v4  ;;  %v7955_v20 = vunpack.i.l.bf16 %v11237_v4  ;;  %v8365_v4 = vld [vmem:[#allocation2 + $0x270] sm:$0xff]  }
 0x519   : > { %7958 = vrot.lane.b32.xlu0 %v7957_v35, %s8541_s21 }
 0x51a   : > { %v5082_v44 = vsel %vm5081_vm6, %v5052_v5, %v7955_v20  ;;  %v5083_v13 = vsel %vm5081_vm6, %v7955_v20, %v7956_v62  ;;  %v5109_v57 = vmax.f32 %v11195_v55, %v7956_v62  ;;  %v8366_v20 = vld [vmem:[#allocation2 + $0x230] sm:$0xff]   ;;  %v8367_v5 = vld [vmem:[#allocation2 + $0x1e8] sm:$0xff]  }
 0x51b   : > { %v5107_v12 = vmax.f32 %v11126_v39, %v5082_v44  ;;  %v5108_v47 = vmax.f32 %v11128_v27, %v5083_v13  ;;  %v8343_v39 = vld [vmem:[#allocation2 + $0x168] sm:$0xff]   ;;  %v7972_v27 = vpack.i.bf16 %v11231_v25, %v11184_v36 }
 0x51c   : > { %v8369_v13 = vld [vmem:[#allocation2 + $0x268] sm:$0xff]  }
 0x51d   : > { %v5153_v46 = vpack.c.bf16 %v5107_v12, %v5107_v12  ;;  %5129 = vrot.lane.b32.xlu0 %v5112_v7, %s8541_s21  ;;  %v5154_v28 = vpack.c.bf16 %v5108_v47, %v5108_v47  ;;  %v8368_v7 = vld [vmem:[#allocation2 + $0x1a8] sm:$0xff]   ;;  %v8371_v12 = vld [vmem:[#allocation2 + $0x1e0] sm:$0xff]  }
 0x51e   : > { %v8373_v47 = vld [vmem:[#allocation2 + $0x260] sm:$0xff]  }
 0x51f   : > { %6008 = vmatprep.mubr.bf16.mxu0 %v5154_v28  ;;  %v8375_v28 = vld [vmem:[#allocation2 + $0x1d8] sm:$0xff]  }
 0x520   : > { %6009 = vmatmul.mubr.bf16.vlgmr.msra.gmra.mxu0 %v5153_v46  ;;  %v8374_v46 = vld [vmem:[#allocation2 + $0x220] sm:$0xff]  }
 0x521   : > { %5140 = vrot.lane.b32.xlu0 %v5116_v16, %s8541_s21  ;;  %7390 = vmatpush3.bf16.msra.mxu0 %v8340_v29  ;;  %v8377_v29 = vld [vmem:[#allocation2 + $0x258] sm:$0xff]  }
 0x522   : > { %7391 = vmatprep.subr.bf16.mxu0 %v8341_v56  ;;  %v8376_v56 = vld [vmem:[#allocation2 + $0x198] sm:$0xff]  }
 0x523   : > { %v8378_v16 = vld [vmem:[#allocation2 + $0x218] sm:$0xff]  }
 0x525   : > { %7973 = vrot.lane.b32.xlu0 %v7972_v27, %s8540_s16  ;;  %7392 = vmatpush3.bf16.msra.mxu0 %v8342_v40  ;;  %v8379_v40 = vld [vmem:[#allocation2 + $0x1d0] sm:$0xff]  }
 0x526   : > { %7393 = vmatprep.subr.bf16.mxu0 %v8343_v39  ;;  %v8381_v39 = vld [vmem:[#allocation2 + $0x250] sm:$0xff]  }
 0x527   : > { %v8380_v27 = vld [vmem:[#allocation2 + $0x190] sm:$0xff]  }
 0x529   : > { %7394 = vmatpush3.bf16.msra.mxu0 %v8345_v61 }
 0x52a   : > { %7395 = vmatprep.subr.bf16.mxu0 %v8347_v0  ;;  %v8382_v0 = vld [vmem:[#allocation2 + $0x210] sm:$0xff]  }
 0x52d   : > { %7396 = vmatpush3.bf16.msra.mxu0 %v8348_v30  ;;  %v8383_v30 = vld [vmem:[#allocation2 + $0x1c8] sm:$0xff]  }
 0x52e   : > { %7397 = vmatprep.subr.bf16.mxu0 %v8349_v26  ;;  %v8385_v26 = vld [vmem:[#allocation2 + $0x248] sm:$0xff]  }
 0x531   : > { %7398 = vmatpush3.bf16.msra.mxu0 %v8350_v15 }
 0x532   : > { %7399 = vmatprep.subr.bf16.mxu0 %v8352_v32 }
 0x533   : > { %v5074_v50 = vpop.permute.xlu1 %5073 }
 0x534   : > { %v5089_v52 = vsel %vm5081_vm6, %v7951_v63, %v5074_v50  ;;  %v5118_v54 = vmax.f32 %v11218_v1, %v5074_v50  ;;  %v8387_v50 = vld [vmem:[#allocation2 + $0x1c0] sm:$0xff]  }
 0x535   : > { %v5117_v9 = vmax.f32 %v11168_v53, %v5089_v52  ;;  %7400 = vmatpush3.bf16.msra.mxu0 %v8354_v45  ;;  %v8361_v53 = vld [vmem:[#allocation2 + $0x278] sm:$0xff]   ;;  %v8384_v45 = vld [vmem:[#allocation2 + $0x188] sm:$0xff]  }
 0x536   : > { %7401 = vmatprep.subr.bf16.mxu0 %v8355_v2  ;;  %v8386_v2 = vld [vmem:[#allocation2 + $0x208] sm:$0xff]  }
 0x537   : > { %v7967_v51 = vpack.i.bf16 %v5118_v54, %v5117_v9  ;;  %v11259_v19 = vpop.permute.xlu1 %7963  ;;  %v8389_v54 = vld [vmem:[#allocation2 + $0x240] sm:$0xff]  }
 0x538   : > { %v7966_v42 = vunpack.i.h.bf16 %v11259_v19  ;;  %v7965_v17 = vunpack.i.l.bf16 %v11259_v19  ;;  %v8390_v19 = vld [vmem:[#allocation2 + $0x200] sm:$0xff]  }
 0x539   : > { %7968 = vrot.lane.b32.xlu1 %v7967_v51, %s8541_s21  ;;  %7402 = vmatpush3.bf16.msra.mxu0 %v8356_v58  ;;  %v8388_v58 = vld [vmem:[#allocation2 + $0x180] sm:$0xff]  }
 0x53a   : > { %v5086_v1 = vsel %vm5081_vm6, %v7965_v17, %v7966_v42  ;;  %7403 = vmatprep.subr.bf16.mxu0 %v8357_v14 }
 0x53b   : > { %v5113_v37 = vmax.f32 %v11153_v11, %v5086_v1  ;;  %v11275_v11 = vpop.permute.xlu1 %5067  ;;  %v8391_v1 = vld [vmem:[#allocation2 + $0x2f8] sm:$0xff]  }
 0x53c   : > { %v5115_v55 = vmax.f32 %v11212_v31, %v11275_v11  ;;  %v8370_v31 = vld [vmem:[#allocation2 + $0x228] sm:$0xff]   ;;  %v5087_v52 = vsel %vm5081_vm6, %v7966_v42, %v11275_v11  ;;  %v8395_v11 = vld [vmem:[#allocation2 + $0x2b0] sm:$0xff]  }
 0x53d   : > { %5075 = vrot.lane.b32.xlu1 %v11182_v8, %s8540_s16  ;;  %v5158_v48 = vpack.c.bf16 %v5113_v37, %v5113_v37  ;;  %7404 = vmatpush3.bf16.msra.mxu0 %v8358_v41  ;;  %v5114_v51 = vmax.f32 %v11155_v34, %v5087_v52  ;;  %v8393_v34 = vld [vmem:[#allocation2 + $0x318] sm:$0xff]   ;;  %s8544_s16 = smov [#allocation5]  }
 0x53e   : > { %7433 = vmatprep.subr.bf16.mxu0 %v8361_v53  ;;  %s8471_s21 = sshll.u32 %s8544_s16, 4  ;;  %s8472_s21 = int_to_ptr.vmem [resolvable:$false] %s8471_s21 }
 0x53f   : > { %6088 = vmatprep.mubr.bf16.mxu0 %v5158_v48  ;;  %s8473_s13 = scalar_lea.vmem %s8472_s21, 256  ;;  %p8474_p11 = scmp.lt.s32.totalorder %s6366_s25, %s8472_s21 }
 0x540   : > { %p8475_p12 = scmp.lt.s32.totalorder %s8473_s13, %s8467_s14 }
 0x542   : > { %p8476_p13 = por %p8475_p12, %p8474_p11 }
 0x544   : > { %p8477_p0 = pnand %p8476_p13, %p8470_p10 }
 0x58b   : > { %v7959_v59 = vpop.permute.xlu0 %7958 }
 0x58c   : > { %v7961_v33 = vunpack.i.h.bf16 %v7959_v59  ;;  %v7960_v21 = vunpack.i.l.bf16 %v7959_v59 }
 0x58e   : > { %v5151_v24 = vsel %vm5131_vm7, %v5109_v57, %v7960_v21  ;;  %v5132_v3 = vsel %vm5131_vm7, %v7960_v21, %v7961_v33  ;;  %v8392_v57 = vld [vmem:[#allocation2 + $0x2b8] sm:$0xff]   ;;  %v8542_v21 = vmov 0.0  }
 0x58f   : > { %v5155_v6 = vpack.c.bf16 %v5151_v24, %v5151_v24  ;;  %v5130_v10 = vpop.permute.xlu0 %5129  ;;  %v5156_v18 = vpack.c.bf16 %v5132_v3, %v5132_v3  ;;  %v8394_v24 = vld [vmem:[#allocation2 + $0x2f0] sm:$0xff]  }
 0x590   : > { %v5133_v38 = vsel %vm5131_vm7, %v7961_v33, %v5130_v10  ;;  %v5159_v33 = vpack.c.bf16 %v5114_v51, %v5114_v51  ;;  %v8398_v10 = vld [vmem:[#allocation2 + $0x2a8] sm:$0xff]  }
 0x591   : > { %v5157_v35 = vpack.c.bf16 %v5133_v38, %v5133_v38  ;;  %6048 = vmatprep.mubr.bf16.mxu1 %v5156_v18  ;;  %v8399_v18 = vld [vmem:[#allocation2 + $0x308] sm:$0xff]   ;;  %v8401_v38 = vld [vmem:[#allocation2 + $0x2a0] sm:$0xff]  }
 0x592   : > { %6049 = vmatmul.mubr.bf16.vlgmr.msra.gmra.mxu1 %v5155_v6  ;;  %v8397_v6 = vld [vmem:[#allocation2 + $0x2e8] sm:$0xff]  }
 0x593   : > { %7412 = vmatpush3.bf16.msra.mxu1 %v8360_v43  ;;  %v11280_v63 = vpop.permute.xlu0 %5140  ;;  %6089 = vmatmul.mubr.bf16.vlgmr.msra.gmra.mxu0 %v5157_v35  ;;  %v8400_v43 = vld [vmem:[#allocation2 + $0x2e0] sm:$0xff]  }
 0x594   : > { %v5152_v62 = vsel %vm5131_vm7, %v5115_v55, %v11280_v63  ;;  %7434 = vmatpush3.bf16.msra.mxu0 %v8362_v22  ;;  %7413 = vmatprep.subr.bf16.mxu1 %v8363_v23  ;;  %v8402_v22 = vld [vmem:[#allocation2 + $0x300] sm:$0xff]   ;;  %v8403_v23 = vld [vmem:[#allocation2 + $0x2d8] sm:$0xff]   ;;  %v8405_v55 = vld [vmem:[#allocation2 + $0x2d0] sm:$0xff]  }
 0x595   : > { %v5160_v44 = vpack.c.bf16 %v5152_v62, %v5152_v62  ;;  %7435 = vmatprep.subr.bf16.mxu0 %v8365_v4  ;;  %v8404_v4 = vld [vmem:[#allocation2 + $0x298] sm:$0xff]   ;;  %v8407_v62 = vld [vmem:[#allocation2 + $0x2c8] sm:$0xff]  }
 0x597   : > { %7414 = vmatpush3.bf16.msra.mxu1 %v8364_v49  ;;  %6128 = vmatprep.mubr.bf16.mxu1 %v5160_v44  ;;  %v11284_v61 = vpop.permute.xlu0 %7973  ;;  %v8406_v49 = vld [vmem:[#allocation2 + $0x290] sm:$0xff]   ;;  %v8409_v44 = vld [vmem:[#allocation2 + $0x2c0] sm:$0xff]  }
 0x598   : > { %7436 = vmatpush3.bf16.msra.mxu0 %v8366_v20  ;;  %7415 = vmatprep.subr.bf16.mxu1 %v8367_v5  ;;  %v7976_v15 = vunpack.i.h.bf16 %v11284_v61  ;;  %v7975_v32 = vunpack.i.l.bf16 %v11284_v61  ;;  %v8408_v5 = vld [vmem:[#allocation2 + $0x288] sm:$0xff]  }
 0x599   : > { %7437 = vmatprep.subr.bf16.mxu0 %v8369_v13  ;;  %v8410_v13 = vld [vmem:[#allocation2 + $0x280] sm:$0xff]  }
 0x59a   : > { %v5091_v14 = vsel %vm5081_vm6, %v7975_v32, %v7976_v15  ;;  %v5121_v35 = vmax.f32 %v11231_v25, %v7976_v15 }
 0x59b   : > { %7416 = vmatpush3.bf16.msra.mxu1 %v8368_v7  ;;  %v5120_v37 = vmax.f32 %v11184_v36, %v5091_v14  ;;  %v8396_v36 = vld [vmem:[#allocation2 + $0x310] sm:$0xff]  }
 0x59c   : > { %7438 = vmatpush3.bf16.msra.mxu0 %v8370_v31  ;;  %7417 = vmatprep.subr.bf16.mxu1 %v8371_v12 }
 0x59d   : > { %7439 = vmatprep.subr.bf16.mxu0 %v8373_v47  ;;  %v5164_v3 = vpack.c.bf16 %v5120_v37, %v5120_v37 }
 0x59f   : > { %7418 = vmatpush3.bf16.msra.mxu1 %v8372_v60 }
 0x5a0   : > { %7440 = vmatpush3.bf16.msra.mxu0 %v8374_v46  ;;  %7419 = vmatprep.subr.bf16.mxu1 %v8375_v28 }
 0x5a1   : > { %7441 = vmatprep.subr.bf16.mxu0 %v8377_v29  ;;  %v8411_v29 = vld [vmem:[%s11382_s7 + $0x18] sm:$0xff]  }
 0x5a3   : > { %7420 = vmatpush3.bf16.msra.mxu1 %v8376_v56  ;;  %v8413_v56 = vld [vmem:[%s11382_s7 + $0x8] sm:$0xff]  }
 0x5a4   : > { %7442 = vmatpush3.bf16.msra.mxu0 %v8378_v16  ;;  %7421 = vmatprep.subr.bf16.mxu1 %v8379_v40  ;;  %v8414_v16 = vld [vmem:[%s11382_s7] sm:$0xff]  }
 0x5a5   : > { %7443 = vmatprep.subr.bf16.mxu0 %v8381_v39 }
 0x5a7   : > { %7422 = vmatpush3.bf16.msra.mxu1 %v8380_v27 }
 0x5a8   : > { %7444 = vmatpush3.bf16.msra.mxu0 %v8382_v0  ;;  %7423 = vmatprep.subr.bf16.mxu1 %v8383_v30 }
 0x5a9   : > { %7445 = vmatprep.subr.bf16.mxu0 %v8385_v26 }
 0x5ab   : > { %7424 = vmatpush3.bf16.msra.mxu1 %v8384_v45  ;;  %v7969_v9 = vpop.permute.xlu1 %7968 }
 0x5ac   : > { %v7971_v17 = vunpack.i.h.bf16 %v7969_v9  ;;  %v7970_v41 = vunpack.i.l.bf16 %v7969_v9  ;;  %7446 = vmatpush3.bf16.msra.mxu0 %v8386_v2  ;;  %7425 = vmatprep.subr.bf16.mxu1 %v8387_v50 }
 0x5ad   : > { %7447 = vmatprep.subr.bf16.mxu0 %v8389_v54 }
 0x5ae   : > { %v5146_v42 = vsel %vm5131_vm7, %v11280_v63, %v7970_v41  ;;  %v5147_v53 = vsel %vm5131_vm7, %v7970_v41, %v7971_v17  ;;  %v5165_v63 = vpack.c.bf16 %v5121_v35, %v5121_v35  ;;  %v6987_v17 = vld [vmem:[%s11381_s6] ss:$0 sm:$0xff] }
 0x5af   : > { %v5161_v48 = vpack.c.bf16 %v5146_v42, %v5146_v42  ;;  %7426 = vmatpush3.bf16.msra.mxu1 %v8388_v58  ;;  %v5162_v59 = vpack.c.bf16 %v5147_v53, %v5147_v53  ;;  %v5076_v20 = vpop.permute.xlu1 %5075 }
 0x5b0   : > { %7448 = vmatpush3.bf16.msra.mxu0 %v8390_v19  ;;  %7455 = vmatprep.subr.bf16.mxu1 %v8391_v1  ;;  %v5090_v25 = vsel %vm5081_vm6, %v5076_v20, %v7975_v32 }
 0x5b1   : > { %6168 = vmatprep.mubr.bf16.mxu0 %v5162_v59  ;;  %7487 = vmatprep.subr.bf16.mxu0 %v8542_v21  ;;  %v5119_v7 = vmax.f32 %v11182_v8, %v5090_v25  ;;  %v8412_v8 = vld [vmem:[%s11382_s7 + $0x10] sm:$0xff]  }
 0x5b2   : > { %6129 = vmatmul.mubr.bf16.vlgmr.msra.gmra.mxu1 %v5159_v33 }
 0x5b3   : > { %6169 = vmatmul.mubr.bf16.vlgmr.msra.gmra.mxu0 %v5161_v48  ;;  %7456 = vmatpush3.bf16.msra.mxu1 %v8392_v57  ;;  %v5163_v31 = vpack.c.bf16 %v5119_v7, %v5119_v7 }
 0x5b4   : > { %6208 = vmatprep.mubr.bf16.mxu1 %v5164_v3  ;;  %7488 = vmatpush3.bf16.msra.mxu0 %v8393_v34 }
 0x5b5   : > { %7457 = vmatprep.subr.bf16.mxu1 %v8394_v24  ;;  %7489 = vmatprep.subr.bf16.mxu0 %v8542_v21 }
 0x5b6   : > { %7495 = vmatprep.mubr.msk.bf16.mxu0 %vm8543_vm8, %v8542_v21 }
 0x5b7   : > { %7458 = vmatpush3.bf16.msra.mxu1 %v8395_v11 }
 0x5b8   : > { %7490 = vmatpush3.bf16.msra.mxu0 %v8396_v36  ;;  %7459 = vmatprep.subr.bf16.mxu1 %v8397_v6 }
 0x5b9   : > { %7491 = vmatprep.subr.bf16.mxu0 %v8542_v21 }
 0x5bb   : > { %7460 = vmatpush3.bf16.msra.mxu1 %v8398_v10 }
 0x5bc   : > { %7492 = vmatpush3.bf16.msra.mxu0 %v8399_v18  ;;  %7461 = vmatprep.subr.bf16.mxu1 %v8400_v43 }
 0x5bd   : > { %7493 = vmatprep.subr.bf16.mxu0 %v8542_v21 }
 0x5bf   : > { %7462 = vmatpush3.bf16.msra.mxu1 %v8401_v38  ;;  %v7089_v38 = vld [vmem:[%s11383_s8] ss:$0 sm:$0xff] }
 0x5c0   : > { %7494 = vmatpush3.bf16.msra.mxu0 %v8402_v22  ;;  %7463 = vmatprep.subr.bf16.mxu1 %v8403_v23 }
 0x5c3   : > { %7464 = vmatpush3.bf16.msra.mxu1 %v8404_v4  ;;  %7496 = vmatmul.mubr.msk.bf16.vlgmr.msra.gmra.mxu0 %vm5131_vm7, %v5165_v63 }
 0x5c4   : > { %7465 = vmatprep.subr.bf16.mxu1 %v8405_v55 }
 0x5c7   : > { %7466 = vmatpush3.bf16.msra.mxu1 %v8406_v49 }
 0x5c8   : > { %7467 = vmatprep.subr.bf16.mxu1 %v8407_v62 }
 0x5cb   : > { %7468 = vmatpush3.bf16.msra.mxu1 %v8408_v5 }
 0x5cc   : > { %7469 = vmatprep.subr.bf16.mxu1 %v8409_v44 }
 0x5cf   : > { %7470 = vmatpush3.bf16.msra.mxu1 %v8410_v13 }
 0x5d0   : > { %7499 = vmatprep.subr.bf16.mxu1 %v8542_v21 }
 0x5d2   : > { %6209 = vmatmul.mubr.bf16.vlgmr.msra.gmra.mxu1 %v5163_v31 }
 0x5d3   : > { %7507 = vmatprep.mubr.msk.bf16.mxu1 %vm8543_vm8, %v8542_v21  ;;  %7500 = vmatpush3.bf16.msra.mxu1 %v8411_v29 }
 0x5d4   : > { %7501 = vmatprep.subr.bf16.mxu1 %v8542_v21 }
 0x5d7   : > { %7502 = vmatpush3.bf16.msra.mxu1 %v8412_v8 }
 0x5d8   : > { %7503 = vmatprep.subr.bf16.mxu1 %v8542_v21 }
 0x5db   : > { %7504 = vmatpush3.bf16.msra.mxu1 %v8413_v56 }
 0x5dc   : > { %7505 = vmatprep.subr.bf16.mxu1 %v8542_v21 }
 0x5df   : > { %7506 = vmatpush3.bf16.msra.mxu1 %v8414_v16 }
 0x5e0   : > { %v7361_v12 = vpop.f32.mrf.mxu0 }
 0x5e2   : > { %v7362_v47 = vpop.f32.mrf.mxu0 }
 0x5e3   : > { %v7363_v60 = vadd.f32 %v7362_v47, %v7361_v12 }
 0x5e4   : > { %v7364_v46 = vpop.f32.mrf.mxu0 }
 0x5e5   : > { %v6011_v1 = vadd.f32 %v7363_v60, %v6987_v17 }
 0x5e6   : > { %v7365_v28 = vpop.f32.mrf.mxu0 }
 0x652   : > { %v7383_v40 = vpop.f32.mrf.mxu1 }
 0x653   : > { %v7405_v39 = vpop.f32.mrf.mxu0 }
 0x654   : > { %v7384_v27 = vpop.f32.mrf.mxu1 }
 0x655   : > { %v7406_v61 = vpop.f32.mrf.mxu0  ;;  %v7385_v41 = vadd.f32 %v7384_v27, %v7383_v40 }
 0x656   : > { %v7386_v0 = vpop.f32.mrf.mxu1  ;;  %v7407_v37 = vadd.f32 %v7406_v61, %v7405_v39 }
 0x657   : > { %v7408_v30 = vpop.f32.mrf.mxu0  ;;  %v6051_v53 = vadd.f32 %v7385_v41, %v6011_v1 }
 0x658   : > { %v7387_v26 = vpop.f32.mrf.mxu1 }
 0x659   : > { %v7409_v15 = vpop.f32.mrf.mxu0  ;;  %v6091_v59 = vadd.f32 %v7407_v37, %v6051_v53 }
 0x672   : > { %v7427_v32 = vpop.f32.mrf.mxu1 }
 0x673   : > { %v7449_v45 = vpop.f32.mrf.mxu0 }
 0x674   : > { %v7428_v2 = vpop.f32.mrf.mxu1 }
 0x675   : > { %v7450_v50 = vpop.f32.mrf.mxu0  ;;  %v7429_v48 = vadd.f32 %v7428_v2, %v7427_v32 }
 0x676   : > { %v7430_v52 = vpop.f32.mrf.mxu1  ;;  %v7451_v33 = vadd.f32 %v7450_v50, %v7449_v45 }
 0x677   : > { %v7452_v54 = vpop.f32.mrf.mxu0  ;;  %v6131_v57 = vadd.f32 %v7429_v48, %v6091_v59 }
 0x678   : > { %v7431_v9 = vpop.f32.mrf.mxu1 }
 0x679   : > { %v7453_v58 = vpop.f32.mrf.mxu0  ;;  %v6171_v24 = vadd.f32 %v7451_v33, %v6131_v57 }
 0x683   : > { %v6250_v14 = vpop.f32.mrf.mxu0 }
 0x685   : > { %v7497_v51 = vpop.f32.mrf.mxu0 }
 0x687   : > { %v6253_v19 = vpop.f32.mrf.mxu0 }
 0x689   : > { %v7498_v42 = vpop.f32.mrf.mxu0 }
 0x692   : > { %v7471_v34 = vpop.f32.mrf.mxu1 }
 0x694   : > { %v7472_v21 = vpop.f32.mrf.mxu1 }
 0x695   : > { %v7473_v3 = vadd.f32 %v7472_v21, %v7471_v34 }
 0x696   : > { %v7474_v11 = vpop.f32.mrf.mxu1 }
 0x697   : > { %v6211_v36 = vadd.f32 %v7473_v3, %v6171_v24 }
 0x698   : > { %v7475_v6 = vpop.f32.mrf.mxu1 }
 0x699   : > { %v6251_v10 = vadd.f32 %v6250_v14, %v6211_v36 }
 0x69b   : > { %v6256_v18 = vmax.f32 %v6251_v10, 0.0 }
 0x69d   : > { %v6257_v43 = vpack.c.bf16 %v6256_v18, %v6256_v18 }
 0x69f   : > { %7508 = vmatmul.mubr.msk.bf16.vlgmr.msra.gmra.mxu1 %vm5131_vm7, %v6257_v43 }
 0x75f   : > { %v6334_v22 = vpop.f32.mrf.mxu1 }
 0x760   : > { %v6335_v23 = vadd.f32 %v7089_v38, %v6334_v22 }
 0x761   : > { %v7509_v35 = vpop.f32.mrf.mxu1 }
 0x762   : > { %6340 = vmax.xlane.f32.xlu0 %v6335_v23 }
 0x763   : > { %v6337_v4 = vpop.f32.mrf.mxu1 }
 0x765   : > { %v7510_v55 = vpop.f32.mrf.mxu1 }
 0x7eb   : > { %v6341_v63 = vpop.xlane.xlu0 %6340 }
 0x7ec   : > { %v6342_v49 = vsub.f32 %v6335_v23, %v6341_v63 }
 0x7ee   : > { %v6343_v62 = vmul.f32 1.442695, %v6342_v49 }
 0x7f0   : > { %8415 = vpow2.f32 %v6343_v62 }
 0x7fd   : > { %v8416_v20 = vpop.eup %8415 }
 0x7fe   : > { %6345 = vadd.xlane.f32.xlu1 %v8416_v20 }
 0x887   : > { %v6346_v5 = vpop.xlane.xlu1 %6345 }
 0x888   : > { %8417 = vlog2.f32 %v6346_v5 }
 0x895   : > { %v8418_v44 = vpop.eup %8417 }
 0x896   : > { %v6348_v25 = vmul.f32 0.6931472, %v8418_v44 }
 0x898   : > { %v6349_v13 = vsub.f32 %v6342_v49, %v6348_v25 }
 0x89a   : > { %6350 = vst [vmem:[%s340_s24] sm:$0xff] %v6349_v13 }
 0x89b   : > { %8480 = shalt.err (!%p8477_p0)
}
 0x89c   : > { %s8481_s23 = scalar_lea.hbm %s6363_s28, 128  ;;  %s8485_s24 = scalar_lea.hbm %s11384_s9, 256 }
 0x89d   : > { %p8482_p1 = scmp.ne.s32.totalorder %s6363_s28, %s8481_s23  ;;  %p8486_p4 = scmp.lt.s32.totalorder %s6363_s28, %s11384_s9 }
 0x89e   : > { %p8487_p7 = scmp.lt.s32.totalorder %s8485_s24, %s8481_s23 }
 0x89f   : > { %p8483_p2 = pnand %p8482_p1, %p8633_p5 }
 0x8a0   : > { %p8488_p8 = por %p8487_p7, %p8486_p4 }
 0x8a1   : > { %p8484_p3 = pneg %p8483_p2 }
 0x8a3   : > { %p8489_p6 = pnand %p8488_p8, %p8484_p3 }
 0x8a5   : > { %8492 = shalt.err (!%p8489_p6)
}
 0x8a6   : > { %7516 = dma.vmem_to_hbm [thread:$0]  (%p8633_p5), %s6366_s25, 128, %s6363_s28, %s6352_s29  }
 0x8a7 PF: > { %p7528_p9 = scmp.ge.s32.totalorder %s8531_s12, 2  ;;  %s6377_s14 = sand.u32 1, %s8519_s30  }
 0x8a8   : > { %p11724_p10 = scmp.ne.s32.totalorder %s11481_s20, 0  ;;  %s6378_s16 = scalar_lea.sflag [#allocation4], %s6377_s14 }
 0x8aa   : > { %p7523_p11 = pnand %p7528_p9, %p11724_p10 }
 0x8ac   : > { %p7524_p12 = pneg %p7523_p11 }
 0x8ae   : > { %8514 = dma.done.wait (%p7524_p12), %s6378_s16, 128  }
 0x8af   : > { %8516 = vsyncadd (%p7524_p12), %s6378_s16, 4294967168  ;;  %p20_p13 = scmp.ge.s32.totalorder %s8620_s15, 4   ;;  %s11725_s30 = smov %s8523_s10 }
 0x8b0   : > { %s11726_s10 = smov %s8527_s11  ;;  %s11727_s11 = smov %s8631_s18 }
 0x8b1   : > { %s11728_s12 = smov %s8620_s15  ;;  %22 = sbr.rel (!%p20_p13) target bundleno = 4 (0x4), region = 98 }
 0x8b6   :  { %6383 = vsyncpa [#allocation3], 1 }
 0x8b7   :  { %6385 = vsyncpa [#allocation3 + $0x1], 1 }
 0x8b8   :  { %6386 = vsyncpa [#allocation4], 1 }
 0x8b9   :  { %6388 = vsyncpa [#allocation4 + $0x1], 1 }

</bundles_post_ra>
